<compile_context>
chip_gen: v7x
topology: tpu7x:2x2x1
jax: 0.10.0
libtpu: 0.0.40
codegen_flags: <defaults>
</compile_context>

<pallas_src>
import functools

import jax
import jax.numpy as jnp
from jax.experimental import pallas as pl
from jax.experimental.pallas import tpu as pltpu

_LANE = 128
_SUBLANE = 8


def _round_up(n, m):
    return ((n + m - 1) // m) * m


def _cdiv(a, b):
    return -(-a // b)


def _fcn_kernel(x_ref, w1_ref, b1_ref, w2_ref, b2_ref, w3_ref, b3_ref, o_ref):
    # Hidden layer 1: linear + sin (MXU matmul, f32 accumulation)
    h = jnp.dot(x_ref[...], w1_ref[...], preferred_element_type=jnp.float32)
    h = jnp.sin(h + b1_ref[...])
    # Hidden layer 2: linear + sin
    h = jnp.dot(h.astype(w2_ref.dtype), w2_ref[...],
                preferred_element_type=jnp.float32)
    h = jnp.sin(h + b2_ref[...])
    # Output layer: linear + sigmoid (tanh form -> EUP slot, VALU stays free)
    z = jnp.dot(h.astype(w3_ref.dtype), w3_ref[...],
                preferred_element_type=jnp.float32)
    z = z + b3_ref[...]
    o_ref[...] = (0.5 * (jnp.tanh(0.5 * z) + 1.0)).astype(o_ref.dtype)


def prepare_params(params, mxu_dtype=jnp.bfloat16):
    """Pad (and optionally pre-cast) the weights ONCE; reuse across calls.

    params: dict with w1,w2,w3 stored as (in_features, out_features) and
            b1,b2,b3 as (1, out_features) -- identical math to torch's
            x @ W^T + b.
    mxu_dtype: dtype for the matmul operands (default bf16; pass None to keep
               f32 operands). Biases stay f32 (added to the f32 accumulator).
    Returns a dict of padded arrays ready for fcn_classifier_forward.
    """
    def pad2(a, rows, cols):
        return jnp.pad(a, ((0, rows - a.shape[0]), (0, cols - a.shape[1])))

    w1, b1 = params["w1"], params["b1"]
    w2, b2 = params["w2"], params["b2"]
    w3, b3 = params["w3"], params["b3"]

    n_inp_p = _round_up(w1.shape[0], _LANE)
    h1_p = _round_up(w1.shape[1], _LANE)
    h2_p = _round_up(w2.shape[1], _LANE)
    n_out_p = _round_up(w3.shape[1], _LANE)

    w1p = pad2(w1, n_inp_p, h1_p)
    w2p = pad2(w2, h1_p, h2_p)
    w3p = pad2(w3, h2_p, n_out_p)
    if mxu_dtype is not None:
        w1p = w1p.astype(mxu_dtype)
        w2p = w2p.astype(mxu_dtype)
        w3p = w3p.astype(mxu_dtype)

    return {
        "w1": w1p, "b1": pad2(b1, 1, h1_p).astype(jnp.float32),
        "w2": w2p, "b2": pad2(b2, 1, h2_p).astype(jnp.float32),
        "w3": w3p, "b3": pad2(b3, 1, n_out_p).astype(jnp.float32),
    }


def _batch_tiling(B, block_b, min_steps):
    """Balanced batch tiling: even #steps >= min_steps, padding < 8 rows/step."""
    steps = max(min_steps, _cdiv(B, block_b))
    if steps > 1 and steps % 2:
        steps += 1                      # even grid -> no 2:1 v7x TC imbalance
    bb = _round_up(_cdiv(B, steps), _SUBLANE)
    return bb, steps * bb, steps


@functools.partial(
    jax.jit,
    static_argnames=("n_out", "block_b", "min_grid_steps", "out_dtype"))
def fcn_classifier_forward(x, padded_params, *, n_out, block_b=1024,
                           min_grid_steps=2, out_dtype=jnp.float32):
    """x: (B, n_inp); padded_params from prepare_params(). Returns (B, n_out)."""
    w1p, b1p = padded_params["w1"], padded_params["b1"]
    w2p, b2p = padded_params["w2"], padded_params["b2"]
    w3p, b3p = padded_params["w3"], padded_params["b3"]

    B, n_inp = x.shape
    n_inp_p = w1p.shape[0]
    h1_p = w1p.shape[1]
    h2_p = w2p.shape[1]
    n_out_p = w3p.shape[1]

    # Balanced batch tiling (>= min_grid_steps, even step count).
    bb, B_p, steps = _batch_tiling(B, block_b, min_grid_steps)

    # Only x is padded per call; cast to the MXU operand dtype of the weights.
    xp = jnp.pad(x, ((0, B_p - B), (0, n_inp_p - n_inp))).astype(w1p.dtype)

    # Dtype-aware advisory cost estimate (post-padding shapes).
    w_item = jnp.dtype(w1p.dtype).itemsize
    x_item = jnp.dtype(xp.dtype).itemsize
    o_item = jnp.dtype(out_dtype).itemsize
    flops = 2 * B_p * (n_inp_p * h1_p + h1_p * h2_p + h2_p * n_out_p)
    transcendentals = B_p * (h1_p + h2_p + n_out_p)
    bytes_accessed = (
        x_item * B_p * n_inp_p + o_item * B_p * n_out_p
        + w_item * (n_inp_p * h1_p + h1_p * h2_p + h2_p * n_out_p)
        + 4 * (h1_p + h2_p + n_out_p))

    def rep(shape):
        # Full-array block, constant index_map (DMA'd once); single-buffered
        # since the block never changes -> no double-buffer VMEM waste.
        return pl.BlockSpec(shape, lambda i: (0, 0),
                            pipeline_mode=pl.Buffered(buffer_count=1))

    yp = pl.pallas_call(
        _fcn_kernel,
        out_shape=jax.ShapeDtypeStruct((B_p, n_out_p), out_dtype),
        grid_spec=pltpu.PrefetchScalarGridSpec(
            num_scalar_prefetch=0,
            grid=(steps,),
            in_specs=[
                pl.BlockSpec((bb, n_inp_p), lambda i: (i, 0)),   # x tile
                rep((n_inp_p, h1_p)), rep((1, h1_p)),            # layer 1
                rep((h1_p, h2_p)), rep((1, h2_p)),               # layer 2
                rep((h2_p, n_out_p)), rep((1, n_out_p)),         # output layer
            ],
            out_specs=pl.BlockSpec((bb, n_out_p), lambda i: (i, 0)),
        ),
        compiler_params=pltpu.CompilerParams(
            dimension_semantics=("parallel",)),
        cost_estimate=pl.CostEstimate(
            flops=flops,
            transcendentals=transcendentals,
            bytes_accessed=bytes_accessed),
    )(xp, w1p, b1p, w2p, b2p, w3p, b3p)

    # Strip batch / output-feature padding (callers that accept the padded
    # slab can skip this and fold the slice into the consumer).
    return yp[:B, :n_out]


def init_params(key, n_inp, layer_sizes, n_out):
    """Deterministic nn.Linear-style init; weights stored as (in, out)."""
    sizes = [n_inp] + list(layer_sizes) + [n_out]
    names = ["w1", "b1", "w2", "b2", "w3", "b3"]
    params = {}
    for li in range(3):
        fan_in, fan_out = sizes[li], sizes[li + 1]
        key, kw, kb = jax.random.split(key, 3)
        bound = 1.0 / jnp.sqrt(jnp.float32(fan_in))
        params[names[2 * li]] = jax.random.uniform(
            kw, (fan_in, fan_out), jnp.float32, -bound, bound)
        params[names[2 * li + 1]] = jax.random.uniform(
            kb, (1, fan_out), jnp.float32, -bound, bound)
    return params


def reference_forward(x, params):
    h = jnp.sin(x @ params["w1"] + params["b1"])
    h = jnp.sin(h @ params["w2"] + params["b2"])
    return jax.nn.sigmoid(h @ params["w3"] + params["b3"])


if __name__ == "__main__":
    # Shapes consistent with the module defaults:
    # FCNClassifier(n_inp_features=32, n_output_features=16,
    #               layer_sizes=[500, 700]); ragged batches exercise the
    # batch/feature padding and balanced multi-step grid paths.
    key = jax.random.PRNGKey(0)
    k_x, k_x2, k_p = jax.random.split(key, 3)

    B, n_inp, n_out = 10, 32, 16
    layer_sizes = [500, 700]

    x = jax.random.normal(k_x, (B, n_inp), jnp.float32)
    params = init_params(k_p, n_inp, layer_sizes, n_out)
    y_ref = reference_forward(x, params)

    # 1) f32 MXU-operand path: exact match vs. the JAX reference.
    padded_f32 = prepare_params(params, mxu_dtype=None)
    y32 = jax.block_until_ready(
        fcn_classifier_forward(x, padded_f32, n_out=n_out))
    assert y32.shape == (B, n_out)
    assert jnp.allclose(y32, y_ref, atol=1e-5, rtol=1e-5), "f32 path mismatch"

    # 2) Default bf16 MXU-operand path (f32 accumulation): looser tolerance,
    #    expected precision trade-off of truncating operands to bf16.
    padded_bf16 = prepare_params(params)                   # bf16 default
    y16 = jax.block_until_ready(
        fcn_classifier_forward(x, padded_bf16, n_out=n_out))
    assert y16.shape == (B, n_out)
    assert jnp.allclose(y16, y_ref, atol=3e-2, rtol=3e-2), "bf16 path mismatch"

    # 3) Larger ragged batch: balanced even grid (2 steps of 304 rows).
    B2 = 600
    x2 = jax.random.normal(k_x2, (B2, n_inp), jnp.float32)
    y2 = jax.block_until_ready(
        fcn_classifier_forward(x2, padded_bf16, n_out=n_out))
    assert y2.shape == (B2, n_out)
    assert jnp.allclose(y2, reference_forward(x2, params),
                        atol=3e-2, rtol=3e-2), "multi-tile mismatch"

    print("KERNEL_OK")
</pallas_src>

<mosaic_0001>
module attributes {stable_mosaic.version = 11 : i64} {
  func.func @_fcn_kernel(%arg0: i32, %arg1: memref<8x128xf32, #tpu.memory_space<vmem>>, %arg2: memref<128x512xf32, #tpu.memory_space<vmem>>, %arg3: memref<1x512xf32, #tpu.memory_space<vmem>>, %arg4: memref<512x768xf32, #tpu.memory_space<vmem>>, %arg5: memref<1x768xf32, #tpu.memory_space<vmem>>, %arg6: memref<768x128xf32, #tpu.memory_space<vmem>>, %arg7: memref<1x128xf32, #tpu.memory_space<vmem>>, %arg8: memref<8x128xf32, #tpu.memory_space<vmem>>) attributes {dimension_semantics = [#tpu.dimension_semantics<parallel>], iteration_bounds = array<i64: 2>, scalar_prefetch = 0 : i64, scratch_operands = 0 : i64, tpu.core_type = #tpu.core_type<tc>, window_params = [{transform_indices = @transform_0, window_bounds = array<i64: 8, 128>}, {pipeline_mode = #tpu.pipeline_mode<synchronous>, transform_indices = @transform_1, window_bounds = array<i64: 128, 512>}, {pipeline_mode = #tpu.pipeline_mode<synchronous>, transform_indices = @transform_2, window_bounds = array<i64: 1, 512>}, {pipeline_mode = #tpu.pipeline_mode<synchronous>, transform_indices = @transform_3, window_bounds = array<i64: 512, 768>}, {pipeline_mode = #tpu.pipeline_mode<synchronous>, transform_indices = @transform_4, window_bounds = array<i64: 1, 768>}, {pipeline_mode = #tpu.pipeline_mode<synchronous>, transform_indices = @transform_5, window_bounds = array<i64: 768, 128>}, {pipeline_mode = #tpu.pipeline_mode<synchronous>, transform_indices = @transform_6, window_bounds = array<i64: 1, 128>}, {transform_indices = @transform_7, window_bounds = array<i64: 8, 128>}]} {
    %c0 = arith.constant 0 : index
    %c0_0 = arith.constant 0 : index
    %0 = vector.load %arg1[%c0, %c0_0] : memref<8x128xf32, #tpu.memory_space<vmem>>, vector<8x128xf32>
    %c0_1 = arith.constant 0 : index
    %c0_2 = arith.constant 0 : index
    %1 = vector.load %arg2[%c0_1, %c0_2] : memref<128x512xf32, #tpu.memory_space<vmem>>, vector<128x512xf32>
    %cst = arith.constant dense<0.000000e+00> : vector<8x512xf32>
    %2 = tpu.matmul %0, %1, %cst {dimension_numbers = #tpu.dot_dimension_numbers<[1], [0], [0], [1], [0, 0, 1, 1], [], []>} : vector<8x128xf32>, vector<128x512xf32>, vector<8x512xf32> -> vector<8x512xf32>
    %c0_3 = arith.constant 0 : index
    %c0_4 = arith.constant 0 : index
    %3 = vector.load %arg3[%c0_3, %c0_4] : memref<1x512xf32, #tpu.memory_space<vmem>>, vector<1x512xf32>
    %4 = vector.broadcast %3 : vector<1x512xf32> to vector<8x512xf32>
    %5 = arith.addf %2, %4 : vector<8x512xf32>
    %6 = math.sin %5 : vector<8x512xf32>
    %c0_5 = arith.constant 0 : index
    %c0_6 = arith.constant 0 : index
    %7 = vector.load %arg4[%c0_5, %c0_6] : memref<512x768xf32, #tpu.memory_space<vmem>>, vector<512x768xf32>
    %cst_7 = arith.constant dense<0.000000e+00> : vector<8x768xf32>
    %8 = tpu.matmul %6, %7, %cst_7 {dimension_numbers = #tpu.dot_dimension_numbers<[1], [0], [0], [1], [0, 0, 1, 1], [], []>} : vector<8x512xf32>, vector<512x768xf32>, vector<8x768xf32> -> vector<8x768xf32>
    %c0_8 = arith.constant 0 : index
    %c0_9 = arith.constant 0 : index
    %9 = vector.load %arg5[%c0_8, %c0_9] : memref<1x768xf32, #tpu.memory_space<vmem>>, vector<1x768xf32>
    %10 = vector.broadcast %9 : vector<1x768xf32> to vector<8x768xf32>
    %11 = arith.addf %8, %10 : vector<8x768xf32>
    %12 = math.sin %11 : vector<8x768xf32>
    %c0_10 = arith.constant 0 : index
    %c0_11 = arith.constant 0 : index
    %13 = vector.load %arg6[%c0_10, %c0_11] : memref<768x128xf32, #tpu.memory_space<vmem>>, vector<768x128xf32>
    %cst_12 = arith.constant dense<0.000000e+00> : vector<8x128xf32>
    %14 = tpu.matmul %12, %13, %cst_12 {dimension_numbers = #tpu.dot_dimension_numbers<[1], [0], [0], [1], [0, 0, 1, 1], [], []>} : vector<8x768xf32>, vector<768x128xf32>, vector<8x128xf32> -> vector<8x128xf32>
    %c0_13 = arith.constant 0 : index
    %c0_14 = arith.constant 0 : index
    %15 = vector.load %arg7[%c0_13, %c0_14] : memref<1x128xf32, #tpu.memory_space<vmem>>, vector<1x128xf32>
    %16 = vector.broadcast %15 : vector<1x128xf32> to vector<8x128xf32>
    %17 = arith.addf %14, %16 : vector<8x128xf32>
    %cst_15 = arith.constant 5.000000e-01 : f32
    %18 = vector.broadcast %cst_15 : f32 to vector<8x128xf32>
    %19 = arith.mulf %18, %17 : vector<8x128xf32>
    %20 = math.tanh %19 : vector<8x128xf32>
    %cst_16 = arith.constant 1.000000e+00 : f32
    %21 = vector.broadcast %cst_16 : f32 to vector<8x128xf32>
    %22 = arith.addf %20, %21 : vector<8x128xf32>
    %cst_17 = arith.constant 5.000000e-01 : f32
    %23 = vector.broadcast %cst_17 : f32 to vector<8x128xf32>
    %24 = arith.mulf %23, %22 : vector<8x128xf32>
    %c0_18 = arith.constant 0 : index
    %c0_19 = arith.constant 0 : index
    %25 = vector.load %arg8[%c0_18, %c0_19] : memref<8x128xf32, #tpu.memory_space<vmem>>, vector<8x128xf32>
    tpu.vector_store %arg8[%c0_18, %c0_19], %24 {strides = array<i32>} : memref<8x128xf32, #tpu.memory_space<vmem>>, vector<8x128xf32>,
    return
  }
  func.func @transform_0(%arg0: i32) -> (i32, i32) {
    %c0_i32 = arith.constant 0 : i32
    %c0_i32_0 = arith.constant 0 : i32
    return %arg0, %c0_i32 : i32, i32
  }
  func.func @transform_1(%arg0: i32) -> (i32, i32) {
    %c0_i32 = arith.constant 0 : i32
    %c0_i32_0 = arith.constant 0 : i32
    %c0_i32_1 = arith.constant 0 : i32
    return %c0_i32, %c0_i32_0 : i32, i32
  }
  func.func @transform_2(%arg0: i32) -> (i32, i32) {
    %c0_i32 = arith.constant 0 : i32
    %c0_i32_0 = arith.constant 0 : i32
    %c0_i32_1 = arith.constant 0 : i32
    return %c0_i32, %c0_i32_0 : i32, i32
  }
  func.func @transform_3(%arg0: i32) -> (i32, i32) {
    %c0_i32 = arith.constant 0 : i32
    %c0_i32_0 = arith.constant 0 : i32
    %c0_i32_1 = arith.constant 0 : i32
    return %c0_i32, %c0_i32_0 : i32, i32
  }
  func.func @transform_4(%arg0: i32) -> (i32, i32) {
    %c0_i32 = arith.constant 0 : i32
    %c0_i32_0 = arith.constant 0 : i32
    %c0_i32_1 = arith.constant 0 : i32
    return %c0_i32, %c0_i32_0 : i32, i32
  }
  func.func @transform_5(%arg0: i32) -> (i32, i32) {
    %c0_i32 = arith.constant 0 : i32
    %c0_i32_0 = arith.constant 0 : i32
    %c0_i32_1 = arith.constant 0 : i32
    return %c0_i32, %c0_i32_0 : i32, i32
  }
  func.func @transform_6(%arg0: i32) -> (i32, i32) {
    %c0_i32 = arith.constant 0 : i32
    %c0_i32_0 = arith.constant 0 : i32
    %c0_i32_1 = arith.constant 0 : i32
    return %c0_i32, %c0_i32_0 : i32, i32
  }
  func.func @transform_7(%arg0: i32) -> (i32, i32) {
    %c0_i32 = arith.constant 0 : i32
    %c0_i32_0 = arith.constant 0 : i32
    return %arg0, %c0_i32 : i32, i32
  }
}

</mosaic_0001>

<bundles_post_ra>
// kernel: fcn_classifier_forward.1
= control target key start
LH: loop header
LB: loop body
LE: loop exit
PB: predicated region body
PF: predicated region fallthrough
CT: control target
= control target key end

     0   :  { %s5261_s0 = inlined_call_operand.vmem [shape: f32[16,128], index: 0, kind: input, shape index: {}]   ;;  %s5262_s1 = inlined_call_operand.hbm [shape: f32[128,512], index: 1, kind: input, shape index: {}]   ;;  %s5263_s2 = inlined_call_operand.hbm [shape: f32[1,512], index: 2, kind: input, shape index: {}]   ;;  %s5264_s3 = inlined_call_operand.hbm [shape: f32[512,768], index: 3, kind: input, shape index: {}]   ;;  %s5265_s4 = inlined_call_operand.hbm [shape: f32[1,768], index: 4, kind: input, shape index: {}]   ;;  %s5266_s5 = inlined_call_operand.hbm [shape: f32[768,128], index: 5, kind: input, shape index: {}]   ;;  %s5267_s6 = inlined_call_operand.hbm [shape: f32[1,128], index: 6, kind: input, shape index: {}]   ;;  %s5268_s7 = inlined_call_operand.hbm [shape: f32[16,128], index: 7, kind: output, shape index: {}]  }
   0x1   :  { %5273 = sst [smem:[#allocation20_spill]] %s5263_s2 }
   0x2   :  { %5274 = sst [smem:[#allocation21_spill]] %s5265_s4 }
   0x3   :  { %12 = vsyncpa [#allocation3], 0 }
   0x4   :  { %13 = vsyncpa [#allocation6], 0 }
   0x5   :  { %14 = vsyncpa [#allocation9], 0 }
   0x6   :  { %15 = vsyncpa [#allocation12], 0 }
   0x7   :  { %16 = vsyncpa [#allocation4], 0 }
   0x8   :  { %18 = vsyncpa [#allocation4 + $0x1], 0  ;;  %s4145_s24 = smov 0   ;;  %s4147_s25 = smov 0  }
   0x9   :  { %s4149_s26 = smov 0   ;;  %s4151_s27 = smov 0  }
   0xa LB: > { %s4166_s28 = sadd.s32 4294967295, %s4083_s27   ;;  %s2918_s29 = sadd.s32 4294967294, %s4083_s27   ;;  %s4083_s27 = sphi %s4151_s27, %s5315_s27   ;;  %s4079_s26 = sphi %s4149_s26, %s5314_s26   ;;  %s4075_s25 = sphi %s4147_s25, %s5313_s25   ;;  %s4071_s24 = sphi %s4145_s24, %s5312_s24  }
   0xb   : > { %s4170_s30 = sadd.s32 1, %s4083_s27   ;;  %s183_s8 = sadd.s32 1, %s4079_s26 }
   0xc   : > { %s180_s9 = ssub.s32 %s4083_s27, %s4170_s30  ;;  %p193_p0 = scmp.ne.s32.totalorder %s4079_s26, %s4075_s25 }
   0xd   : > { %p181_p1 = scmp.eq.s32.totalorder %s180_s9, 0  ;;  %p194_p2 = scmp.eq.s32.totalorder %s4166_s28, 1 }
   0xe   : > { %p199_p3 = scmp.ne.s32.totalorder %s4075_s25, %s4071_s24  ;;  %p200_p4 = scmp.eq.s32.totalorder %s2918_s29, 1 }
   0xf   : > { %s4181_s10 = scalar_select %p181_p1, %s4079_s26, %s183_s8  }
  0x10   : > { %p4183_p5 = por %p194_p2, %p193_p0  ;;  %p4187_p6 = por %p200_p4, %p199_p3 }
  0x11   : > { %5275 = sst [smem:[#allocation19_spill]] %s4181_s10  ;;  %p2919_p7 = scmp.ge.s32.totalorder %s4083_s27, 1 }
  0x12   : > { %s5276_s11 = scalar_select %p4183_p5, 1, 0 }
  0x13   : > { %s5277_s12 = scalar_select %p4187_p6, 1, 0 }
  0x14   : > { %p207_p8 = scmp.lt.s32.totalorder %s4083_s27, 3  ;;  %p5269_p9 = scmp.eq.s32.totalorder %s4166_s28, 0 }
  0x15   : > { %s4085_s14 = smov [#allocation5]   ;;  %s4086_s16 = smov [#allocation8]  }
  0x16   : > { %p4194_p10 = pnand %p2919_p7, %p207_p8  ;;  %s233_s15 = sshll.u32 %s4085_s14, 4  ;;  %s234_s15 = int_to_ptr.vmem [resolvable:$true] %s233_s15 }
  0x17   : > { %s257_s17 = sshll.u32 %s4086_s16, 4  ;;  %s4087_s19 = smov [#allocation2]   ;;  %s4206_s17 = int_to_ptr.vmem [resolvable:$true] %s257_s17 }
  0x18   : > { %s5278_s13 = scalar_select %p4194_p10, 1, 0 }
  0x19   : > { %p3708_p11 = pneg %p4194_p10  ;;  %s219_s20 = sshll.u32 %s4087_s19, 4  ;;  %s4208_s20 = int_to_ptr.vmem [resolvable:$true] %s219_s20 }
  0x1a   : > { %s5280_s2 = sld [smem:[#allocation20_spill]] }
  0x1b   : > { %p4202_p12 = pnand %p5269_p9, %p3708_p11 }
  0x1d   : > { %p4218_p0 = pneg %p4202_p12 }
  0x20   : > { %s3837_s23 = scalar_lea.hbm %s5280_s2, 64 }
  0x21   : > { %p3838_p13 = scmp.ne.s32.totalorder %s5280_s2, %s3837_s23  ;;  %p3844_p3 = scmp.lt.u32.totalorder %s3837_s23, %s5280_s2 }
  0x23   : > { %p3840_p1 = pnand %p4218_p0, %p3838_p13 }
  0x25   : > { %p3841_p2 = pneg %p3840_p1 }
  0x27   : > { %p3846_p4 = pnand %p3844_p3, %p3841_p2 }
  0x29   : > { %3849 = shalt.err (!%p3846_p4)
}
  0x2a   : > { %s3850_s19 = scalar_lea.vmem %s234_s15, 64  ;;  %p3858_p9 = scmp.lt.s32.totalorder %s234_s15, %s234_s15 }
  0x2b   : > { %p3851_p7 = scmp.ne.s32.totalorder %s234_s15, %s3850_s19  ;;  %p3859_p6 = scmp.lt.s32.totalorder %s3850_s19, %s3850_s19 }
  0x2d   : > { %p3853_p8 = pnand %p3851_p7, %p4218_p0  ;;  %p3860_p5 = por %p3859_p6, %p3858_p9 }
  0x2f   : > { %p3854_p11 = pneg %p3853_p8 }
  0x31   : > { %p3861_p10 = pnand %p3860_p5, %p3854_p11 }
  0x33   : > { %3864 = shalt.err (!%p3861_p10)
}
  0x34   : > { %3714 = dma.hbm_to_vmem [thread:$0]  (!%p4202_p12), %s5280_s2, 64, %s234_s15, [#allocation6]  }
  0x35   : > { %s5282_s4 = sld [smem:[#allocation21_spill]] }
  0x3b   : > { %s3865_s8 = scalar_lea.hbm %s5282_s4, 96 }
  0x3c   : > { %p3866_p13 = scmp.ne.s32.totalorder %s5282_s4, %s3865_s8  ;;  %p3872_p5 = scmp.lt.u32.totalorder %s3865_s8, %s5282_s4 }
  0x3e   : > { %p3868_p1 = pnand %p3866_p13, %p4218_p0 }
  0x40   : > { %p3869_p6 = pneg %p3868_p1 }
  0x42   : > { %p3874_p9 = pnand %p3872_p5, %p3869_p6 }
  0x44   : > { %3877 = shalt.err (!%p3874_p9)
}
  0x45   : > { %s3878_s15 = scalar_lea.vmem %s4206_s17, 96  ;;  %p3886_p4 = scmp.lt.s32.totalorder %s4206_s17, %s4206_s17 }
  0x46   : > { %p3879_p10 = scmp.ne.s32.totalorder %s4206_s17, %s3878_s15  ;;  %p3887_p7 = scmp.lt.s32.totalorder %s3878_s15, %s3878_s15 }
  0x48   : > { %p3881_p2 = pnand %p3879_p10, %p4218_p0  ;;  %p3888_p8 = por %p3887_p7, %p3886_p4 }
  0x4a   : > { %p3882_p3 = pneg %p3881_p2 }
  0x4c   : > { %p3889_p11 = pnand %p3888_p8, %p3882_p3 }
  0x4e   : > { %3892 = shalt.err (!%p3889_p11)
}
  0x4f   : > { %3720 = dma.hbm_to_vmem [thread:$0]  (!%p4202_p12), %s5282_s4, 96, %s4206_s17, [#allocation9]  }
  0x50   : > { %s3893_s29 = scalar_lea.hbm %s5262_s1, 8192 }
  0x51   : > { %p3894_p13 = scmp.ne.s32.totalorder %s5262_s1, %s3893_s29  ;;  %p3900_p5 = scmp.lt.u32.totalorder %s3893_s29, %s5262_s1 }
  0x53   : > { %p3896_p1 = pnand %p3894_p13, %p4218_p0 }
  0x55   : > { %p3897_p6 = pneg %p3896_p1 }
  0x57   : > { %p3902_p9 = pnand %p3900_p5, %p3897_p6 }
  0x59   : > { %3905 = shalt.err (!%p3902_p9)
}
  0x5a   : > { %s3906_s17 = scalar_lea.vmem %s4208_s20, 8192  ;;  %p3914_p4 = scmp.lt.s32.totalorder %s4208_s20, %s4208_s20 }
  0x5b   : > { %p3907_p10 = scmp.ne.s32.totalorder %s4208_s20, %s3906_s17  ;;  %p3915_p7 = scmp.lt.s32.totalorder %s3906_s17, %s3906_s17 }
  0x5d   : > { %p3909_p2 = pnand %p3907_p10, %p4218_p0  ;;  %p3916_p8 = por %p3915_p7, %p3914_p4 }
  0x5f   : > { %p3910_p3 = pneg %p3909_p2 }
  0x61   : > { %p3917_p11 = pnand %p3916_p8, %p3910_p3 }
  0x63   : > { %3920 = shalt.err (!%p3917_p11)
}
  0x64   : > { %s4088_s15 = smov 512   ;;  %s4089_s10 = smov 32  }
  0x65   : > { %3711 = dma.hbm_to_vmem [thread:$0]  (!%p4202_p12), %s5262_s1, 8192, %s4208_s20, [#allocation3], %s4088_s15, %s4088_s15, %s4089_s10  }
  0x66   : > { %s4090_s23 = smov [#allocation7]   ;;  %s3921_s16 = scalar_lea.hbm %s5264_s3, 49152 }
  0x67   : > { %s243_s29 = sshll.u32 %s4090_s23, 4  ;;  %p3922_p13 = scmp.ne.s32.totalorder %s5264_s3, %s3921_s16  ;;  %s244_s29 = int_to_ptr.vmem [resolvable:$true] %s243_s29 }
  0x68   : > { %p3928_p5 = scmp.lt.u32.totalorder %s3921_s16, %s5264_s3 }
  0x69   : > { %p3924_p1 = pnand %p3922_p13, %p4218_p0 }
  0x6b   : > { %p3925_p6 = pneg %p3924_p1 }
  0x6d   : > { %p3930_p9 = pnand %p3928_p5, %p3925_p6 }
  0x6f   : > { %3933 = shalt.err (!%p3930_p9)
}
  0x70   : > { %s3934_s20 = scalar_lea.vmem %s244_s29, 49152  ;;  %p3942_p4 = scmp.lt.s32.totalorder %s244_s29, %s244_s29 }
  0x71   : > { %p3935_p10 = scmp.ne.s32.totalorder %s244_s29, %s3934_s20  ;;  %p3943_p7 = scmp.lt.s32.totalorder %s3934_s20, %s3934_s20 }
  0x73   : > { %p3937_p2 = pnand %p3935_p10, %p4218_p0  ;;  %p3944_p8 = por %p3943_p7, %p3942_p4 }
  0x75   : > { %p3938_p3 = pneg %p3937_p2 }
  0x77   : > { %p3945_p11 = pnand %p3944_p8, %p3938_p3 }
  0x79   : > { %3948 = shalt.err (!%p3945_p11)
}
  0x7a   : > { %s4091_s15 = smov 768   ;;  %s4092_s10 = smov 48  }
  0x7b   : > { %3717 = dma.hbm_to_vmem [thread:$0]  (!%p4202_p12), %s5264_s3, 49152, %s244_s29, [#allocation6], %s4091_s15, %s4091_s15, %s4092_s10  }
  0x7c   : > { %s4093_s21 = smov [#allocation10]   ;;  %s3949_s14 = scalar_lea.hbm %s5266_s5, 12288 }
  0x7d   : > { %s267_s22 = sshll.u32 %s4093_s21, 4  ;;  %p3950_p13 = scmp.ne.s32.totalorder %s5266_s5, %s3949_s14  ;;  %s268_s22 = int_to_ptr.vmem [resolvable:$true] %s267_s22 }
  0x7e   : > { %p3956_p5 = scmp.lt.u32.totalorder %s3949_s14, %s5266_s5 }
  0x7f   : > { %p3952_p1 = pnand %p3950_p13, %p4218_p0 }
  0x81   : > { %p3953_p6 = pneg %p3952_p1 }
  0x83   : > { %p3958_p9 = pnand %p3956_p5, %p3953_p6 }
  0x85   : > { %3961 = shalt.err (!%p3958_p9)
}
  0x86   : > { %s3962_s29 = scalar_lea.vmem %s268_s22, 12288  ;;  %p3970_p4 = scmp.lt.s32.totalorder %s268_s22, %s268_s22 }
  0x87   : > { %p3963_p10 = scmp.ne.s32.totalorder %s268_s22, %s3962_s29  ;;  %p3971_p7 = scmp.lt.s32.totalorder %s3962_s29, %s3962_s29 }
  0x89   : > { %p3965_p2 = pnand %p3963_p10, %p4218_p0  ;;  %p3972_p8 = por %p3971_p7, %p3970_p4 }
  0x8b   : > { %p3966_p3 = pneg %p3965_p2 }
  0x8d   : > { %p3973_p11 = pnand %p3972_p8, %p3966_p3 }
  0x8f   : > { %3976 = shalt.err (!%p3973_p11)
}
  0x90   : > { %s4094_s15 = smov 128   ;;  %s4095_s10 = smov 8  }
  0x91   : > { %3723 = dma.hbm_to_vmem [thread:$0]  (!%p4202_p12), %s5266_s5, 12288, %s268_s22, [#allocation9], %s4094_s15, %s4094_s15, %s4095_s10  }
  0x92   : > { %s4096_s21 = smov [#allocation11]   ;;  %s3977_s16 = scalar_lea.hbm %s5267_s6, 16 }
  0x93   : > { %s281_s23 = sshll.u32 %s4096_s21, 4  ;;  %p3978_p13 = scmp.ne.s32.totalorder %s5267_s6, %s3977_s16  ;;  %s282_s23 = int_to_ptr.vmem [resolvable:$true] %s281_s23 }
  0x94   : > { %p3984_p5 = scmp.lt.u32.totalorder %s3977_s16, %s5267_s6 }
  0x95   : > { %p3980_p1 = pnand %p3978_p13, %p4218_p0 }
  0x97   : > { %p3981_p6 = pneg %p3980_p1 }
  0x99   : > { %p3986_p9 = pnand %p3984_p5, %p3981_p6 }
  0x9b   : > { %3989 = shalt.err (!%p3986_p9)
}
  0x9c   : > { %s3990_s22 = scalar_lea.vmem %s282_s23, 16  ;;  %s3997_s15 = scalar_lea.vmem %s282_s23, 32 }
  0x9d   : > { %p3991_p10 = scmp.ne.s32.totalorder %s282_s23, %s3990_s22  ;;  %p3998_p4 = scmp.lt.s32.totalorder %s282_s23, %s282_s23 }
  0x9e   : > { %p3999_p7 = scmp.lt.s32.totalorder %s3997_s15, %s3990_s22 }
  0x9f   : > { %p3993_p2 = pnand %p3991_p10, %p4218_p0 }
  0xa0   : > { %p4000_p8 = por %p3999_p7, %p3998_p4 }
  0xa1   : > { %p3994_p3 = pneg %p3993_p2 }
  0xa3   : > { %p4001_p11 = pnand %p4000_p8, %p3994_p3 }
  0xa5   : > { %4004 = shalt.err (!%p4001_p11)
}
  0xa6   : > { %3726 = dma.hbm_to_vmem [thread:$0]  (!%p4202_p12), %s5267_s6, 16, %s282_s23, [#allocation12]  }
  0xa7   : > { %p5283_p13 = scmp.ne.s32.totalorder %s5278_s13, 0 }
  0xa8   : > { %p5284_p1 = scmp.eq.s32.totalorder (!%p5283_p13), %s4166_s28, 0 }
  0xa9   : > { %301 = sbr.rel (%p5283_p13) target bundleno = 1285 (0x505), region = 48 }
  0xb0   : > { %4050 = dma.done.wait (%p5284_p1), [#allocation3], 8192   ;;  %p5285_p0 = pmov %p5284_p1 }
  0xb2   : > { %4052 = vsyncadd (%p5285_p0), [#allocation3], 4294959104  ;;  %p5286_p6 = pmov %p5285_p0 }
  0xb3   : > { %p5287_p5 = pmov %p5285_p0 }
  0xb4   : > { %4054 = dma.done.wait (%p5286_p6), [#allocation6], 49216  }
  0xb5   : > { %4056 = vsyncadd (%p5287_p5), [#allocation6], 4294918080  ;;  %p5288_p9 = pmov %p5285_p0 }
  0xb6   : > { %p5289_p12 = pmov %p5285_p0 }
  0xb7   : > { %4058 = dma.done.wait (%p5288_p9), [#allocation9], 12384  }
  0xb8   : > { %4060 = vsyncadd (%p5289_p12), [#allocation9], 4294954912  ;;  %p5290_p10 = pmov %p5285_p0 }
  0xb9   : > { %p5291_p2 = pmov %p5285_p0 }
  0xba   : > { %4062 = dma.done.wait (%p5290_p10), [#allocation12], 16  }
  0xbb   : > { %4064 = vsyncadd (%p5291_p2), [#allocation12], 4294967280  ;;  %v4097_v0 = vmov 0.0   ;;  %v358_v1 = vld [vmem:[#allocation2 + $0x8] sm:$0xff]  ;;  %v360_v3 = vld [vmem:[#allocation2 + $0x18] sm:$0xff]  ;;  %p352_p3 = scmp.lt.s32.totalorder %s4166_s28, 1 }
  0xbc   : > { %507 = vmatprep.mubr.f32.mxu0 %v4097_v0  ;;  %578 = vmatprep.mubr.f32.mxu1 %v4097_v0  ;;  %v362_v2 = vld [vmem:[#allocation2 + $0x28] sm:$0xff]  ;;  %v364_v5 = vld [vmem:[#allocation2 + $0x38] sm:$0xff]  ;;  %v357_v6 = vld [vmem:[#allocation2] sm:$0xff]  ;;  %s349_s23 = sand.u32 1, %s4075_s25   ;;  %s2978_s14 = sshll.u32 %s4166_s28, 7 }
  0xbd   : > { %v3086_v4 = vpack.c.bf16 %v362_v2, %v358_v1  ;;  %v361_v7 = vld [vmem:[#allocation2 + $0x20] sm:$0xff]  ;;  %v3118_v8 = vpack.c.bf16 %v364_v5, %v360_v3  ;;  %v359_v10 = vld [vmem:[#allocation2 + $0x10] sm:$0xff]  ;;  %v366_v12 = vld [vmem:[#allocation2 + $0x48] sm:$0xff]  ;;  %s353_s13 = scalar_select %p352_p3, %s4166_s28, 1 }
  0xbe   : > { %v3088_v9 = vpack.c.bf16 %v361_v7, %v357_v6  ;;  %v363_v11 = vld [vmem:[#allocation2 + $0x30] sm:$0xff]  ;;  %v370_v14 = vld [vmem:[#allocation2 + $0x68] sm:$0xff]  ;;  %v368_v15 = vld [vmem:[#allocation2 + $0x58] sm:$0xff]  ;;  %s2934_s8 = sshll.u32 %s349_s23, 3  ;;  %s5219_s29 = scalar_lea.hbm %s5268_s7, %s2978_s14 }
  0xbf   : > { %3087 = vmatprep.subr.bf16.mxu0 %v3086_v4  ;;  %v3120_v13 = vpack.c.bf16 %v363_v11, %v359_v10  ;;  %v372_v16 = vld [vmem:[#allocation2 + $0x78] sm:$0xff]  ;;  %3119 = vmatprep.subr.bf16.mxu1 %v3118_v8  ;;  %v3090_v17 = vpack.c.bf16 %v370_v14, %v366_v12  ;;  %v365_v19 = vld [vmem:[#allocation2 + $0x40] sm:$0xff]  ;;  %v367_v21 = vld [vmem:[#allocation2 + $0x50] sm:$0xff]  ;;  %s2935_s18 = sshll.u32 %s353_s13, 3  ;;  %s351_s16 = scalar_lea.vmem [#allocation13], %s2934_s8 }
  0xc0   : > { %3089 = vmatpush1.bf16.msra.mxu0 %v3088_v9  ;;  %v3122_v18 = vpack.c.bf16 %v372_v16, %v368_v15  ;;  %v369_v20 = vld [vmem:[#allocation2 + $0x60] sm:$0xff]  ;;  %v371_v23 = vld [vmem:[#allocation2 + $0x70] sm:$0xff]  ;;  %v374_v24 = vld [vmem:[#allocation2 + $0x88] sm:$0xff]  ;;  %s355_s21 = scalar_lea.vmem %s5261_s0, %s2935_s18  ;;  %s2799_s19 = sshll.u32 %s351_s16, 4  ;;  %s5221_s19 = int_to_ptr.vmem [resolvable:$true] %s2799_s19 }
  0xc1   : > { %3121 = vmatpush1.bf16.msra.mxu1 %v3120_v13  ;;  %v3092_v22 = vpack.c.bf16 %v369_v20, %v365_v19  ;;  %v378_v25 = vld [vmem:[#allocation2 + $0xa8] sm:$0xff]  ;;  %3091 = vmatprep.subr.bf16.mxu0 %v3090_v17  ;;  %v3124_v26 = vpack.c.bf16 %v371_v23, %v367_v21  ;;  %v376_v28 = vld [vmem:[#allocation2 + $0x98] sm:$0xff]  ;;  %v373_v30 = vld [vmem:[#allocation2 + $0x80] sm:$0xff]  ;;  %s2786_s22 = scalar_lea.sflag [#allocation4], %s349_s23  ;;  %s4005_s15 = scalar_lea.vmem %s5221_s19, 128 }
  0xc2   : > { %3123 = vmatprep.subr.bf16.mxu1 %v3122_v18  ;;  %v3094_v27 = vpack.c.bf16 %v378_v25, %v374_v24  ;;  %v380_v29 = vld [vmem:[#allocation2 + $0xb8] sm:$0xff]  ;;  %v377_v32 = vld [vmem:[#allocation2 + $0xa0] sm:$0xff]  ;;  %v375_v33 = vld [vmem:[#allocation2 + $0x90] sm:$0xff]  ;;  %p4006_p4 = scmp.ne.s32.totalorder %s5221_s19, %s4005_s15  ;;  %p5309_p7 = scmp.ne.s32.totalorder %s5276_s11, 0 }
  0xc3   : > { %v3126_v31 = vpack.c.bf16 %v380_v29, %v376_v28  ;;  %v379_v34 = vld [vmem:[#allocation2 + $0xb0] sm:$0xff]  ;;  %v3096_v35 = vpack.c.bf16 %v377_v32, %v373_v30  ;;  %v382_v36 = vld [vmem:[#allocation2 + $0xc8] sm:$0xff]  ;;  %v384_v38 = vld [vmem:[#allocation2 + $0xd8] sm:$0xff]  ;;  %s4104_s28 = smov [#allocation13]  }
  0xc4   : > { %3093 = vmatpush1.bf16.msra.mxu0 %v3092_v22  ;;  %v386_v37 = vld [vmem:[#allocation2 + $0xe8] sm:$0xff]  ;;  %v3128_v39 = vpack.c.bf16 %v379_v34, %v375_v33  ;;  %v388_v41 = vld [vmem:[#allocation2 + $0xf8] sm:$0xff]  ;;  %v381_v42 = vld [vmem:[#allocation2 + $0xc0] sm:$0xff]  ;;  %p4007_p8 = pnand %p4006_p4, %p5309_p7  ;;  %s4009_s10 = sshll.u32 %s4104_s28, 4  ;;  %s4010_s10 = int_to_ptr.vmem [resolvable:$false] %s4009_s10 }
  0xc5   : > { %3125 = vmatpush1.bf16.msra.mxu1 %v3124_v26  ;;  %3095 = vmatprep.subr.bf16.mxu0 %v3094_v27  ;;  %v3098_v40 = vpack.c.bf16 %v386_v37, %v382_v36  ;;  %v385_v43 = vld [vmem:[#allocation2 + $0xe0] sm:$0xff]  ;;  %v3130_v44 = vpack.c.bf16 %v388_v41, %v384_v38  ;;  %v383_v45 = vld [vmem:[#allocation2 + $0xd0] sm:$0xff]  ;;  %v390_v47 = vld [vmem:[#allocation2 + $0x108] sm:$0xff]  ;;  %s4011_s2 = scalar_lea.vmem %s4010_s10, 256  ;;  %p4012_p13 = scmp.lt.s32.totalorder %s5221_s19, %s4010_s10 }
  0xc6   : > { %3127 = vmatprep.subr.bf16.mxu1 %v3126_v31  ;;  %v387_v46 = vld [vmem:[#allocation2 + $0xf0] sm:$0xff]  ;;  %v394_v48 = vld [vmem:[#allocation2 + $0x128] sm:$0xff]  ;;  %v392_v49 = vld [vmem:[#allocation2 + $0x118] sm:$0xff]  ;;  %v3100_v51 = vpack.c.bf16 %v385_v43, %v381_v42  ;;  %p4008_p11 = pneg %p4007_p8  ;;  %p4013_p1 = scmp.lt.s32.totalorder %s4011_s2, %s4005_s15 }
  0xc7   : > { %v396_v50 = vld [vmem:[#allocation2 + $0x138] sm:$0xff]  ;;  %v3132_v52 = vpack.c.bf16 %v387_v46, %v383_v45  ;;  %v3102_v53 = vpack.c.bf16 %v394_v48, %v390_v47  ;;  %v389_v54 = vld [vmem:[#allocation2 + $0x100] sm:$0xff]  ;;  %v391_v56 = vld [vmem:[#allocation2 + $0x110] sm:$0xff] }
  0xc8   : > { %3097 = vmatpush1.bf16.msra.mxu0 %v3096_v35  ;;  %v393_v55 = vld [vmem:[#allocation2 + $0x120] sm:$0xff]  ;;  %v3134_v57 = vpack.c.bf16 %v396_v50, %v392_v49  ;;  %v395_v58 = vld [vmem:[#allocation2 + $0x130] sm:$0xff]  ;;  %v398_v59 = vld [vmem:[#allocation2 + $0x148] sm:$0xff]  ;;  %p4014_p0 = por %p4013_p1, %p4012_p13 }
  0xc9   : > { %3129 = vmatpush1.bf16.msra.mxu1 %v3128_v39  ;;  %3099 = vmatprep.subr.bf16.mxu0 %v3098_v40  ;;  %v402_v60 = vld [vmem:[#allocation2 + $0x168] sm:$0xff]  ;;  %v400_v61 = vld [vmem:[#allocation2 + $0x158] sm:$0xff]  ;;  %v3104_v63 = vpack.c.bf16 %v393_v55, %v389_v54  ;;  %v3136_v0 = vpack.c.bf16 %v395_v58, %v391_v56  ;;  %v397_v2 = vld [vmem:[#allocation2 + $0x140] sm:$0xff] }
  0xca   : > { %3131 = vmatprep.subr.bf16.mxu1 %v3130_v44  ;;  %v404_v62 = vld [vmem:[#allocation2 + $0x178] sm:$0xff]  ;;  %v3106_v1 = vpack.c.bf16 %v402_v60, %v398_v59  ;;  %v401_v3 = vld [vmem:[#allocation2 + $0x160] sm:$0xff]  ;;  %v399_v4 = vld [vmem:[#allocation2 + $0x150] sm:$0xff]  ;;  %p4015_p6 = pnand %p4014_p0, %p4008_p11 }
  0xcb   : > { %v3138_v5 = vpack.c.bf16 %v404_v62, %v400_v61  ;;  %v403_v6 = vld [vmem:[#allocation2 + $0x170] sm:$0xff]  ;;  %v406_v7 = vld [vmem:[#allocation2 + $0x188] sm:$0xff]  ;;  %v408_v9 = vld [vmem:[#allocation2 + $0x198] sm:$0xff]  ;;  %v3108_v11 = vpack.c.bf16 %v401_v3, %v397_v2 }
  0xcc   : > { %3101 = vmatpush1.bf16.msra.mxu0 %v3100_v51  ;;  %v410_v8 = vld [vmem:[#allocation2 + $0x1a8] sm:$0xff]  ;;  %v412_v10 = vld [vmem:[#allocation2 + $0x1b8] sm:$0xff]  ;;  %v3140_v12 = vpack.c.bf16 %v403_v6, %v399_v4  ;;  %v405_v14 = vld [vmem:[#allocation2 + $0x180] sm:$0xff] }
  0xcd   : > { %3133 = vmatpush1.bf16.msra.mxu1 %v3132_v52  ;;  %3103 = vmatprep.subr.bf16.mxu0 %v3102_v53  ;;  %v3110_v13 = vpack.c.bf16 %v410_v8, %v406_v7  ;;  %v409_v15 = vld [vmem:[#allocation2 + $0x1a0] sm:$0xff]  ;;  %v407_v16 = vld [vmem:[#allocation2 + $0x190] sm:$0xff]  ;;  %v3142_v17 = vpack.c.bf16 %v412_v10, %v408_v9  ;;  %v414_v19 = vld [vmem:[#allocation2 + $0x1c8] sm:$0xff] }
  0xce   : > { %3135 = vmatprep.subr.bf16.mxu1 %v3134_v57  ;;  %v411_v18 = vld [vmem:[#allocation2 + $0x1b0] sm:$0xff]  ;;  %v418_v20 = vld [vmem:[#allocation2 + $0x1e8] sm:$0xff]  ;;  %v416_v21 = vld [vmem:[#allocation2 + $0x1d8] sm:$0xff]  ;;  %v3112_v23 = vpack.c.bf16 %v409_v15, %v405_v14 }
  0xcf   : > { %v420_v22 = vld [vmem:[#allocation2 + $0x1f8] sm:$0xff]  ;;  %v3144_v24 = vpack.c.bf16 %v411_v18, %v407_v16  ;;  %v3114_v25 = vpack.c.bf16 %v418_v20, %v414_v19  ;;  %v413_v26 = vld [vmem:[#allocation2 + $0x1c0] sm:$0xff]  ;;  %v415_v29 = vld [vmem:[#allocation2 + $0x1d0] sm:$0xff] }
  0xd0   : > { %3105 = vmatpush1.bf16.msra.mxu0 %v3104_v63  ;;  %v417_v27 = vld [vmem:[#allocation2 + $0x1e0] sm:$0xff]  ;;  %v3146_v28 = vpack.c.bf16 %v420_v22, %v416_v21  ;;  %v419_v30 = vld [vmem:[#allocation2 + $0x1f0] sm:$0xff] }
  0xd1   : > { %3137 = vmatpush1.bf16.msra.mxu1 %v3136_v0  ;;  %3107 = vmatprep.subr.bf16.mxu0 %v3106_v1  ;;  %v3116_v31 = vpack.c.bf16 %v417_v27, %v413_v26  ;;  %v3148_v32 = vpack.c.bf16 %v419_v30, %v415_v29  ;;  %v356_v33 = vld [vmem:[%s355_s21] sm:$0xff]  ;;  %v1002_v34 = vld [vmem:[#allocation7 + $0x8] sm:$0xff]  ;;  %v1007_v40 = vld [vmem:[#allocation7 + $0x30] sm:$0xff] }
  0xd2   : > { %3139 = vmatprep.subr.bf16.mxu1 %v3138_v5  ;;  %v1008_v35 = vld [vmem:[#allocation7 + $0x38] sm:$0xff]  ;;  %v1010_v38 = vld [vmem:[#allocation7 + $0x48] sm:$0xff]  ;;  %v1001_v39 = vld [vmem:[#allocation7] sm:$0xff] }
  0xd3   : > { %v1004_v36 = vld [vmem:[#allocation7 + $0x18] sm:$0xff]  ;;  %v3150_v37 = vpack.c.bf16 %v1008_v35, %v1002_v34  ;;  %v3152_v42 = vpack.c.bf16 %v1007_v40, %v1001_v39  ;;  %v1003_v43 = vld [vmem:[#allocation7 + $0x10] sm:$0xff]  ;;  %v1009_v44 = vld [vmem:[#allocation7 + $0x40] sm:$0xff] }
  0xd4   : > { %3109 = vmatpush1.bf16.msra.mxu0 %v3108_v11  ;;  %v3278_v41 = vpack.c.bf16 %v1010_v38, %v1004_v36  ;;  %v3280_v45 = vpack.c.bf16 %v1009_v44, %v1003_v43  ;;  %v1014_v46 = vld [vmem:[#allocation7 + $0x68] sm:$0xff]  ;;  %v1020_v47 = vld [vmem:[#allocation7 + $0x98] sm:$0xff]  ;;  %v1013_v51 = vld [vmem:[#allocation7 + $0x60] sm:$0xff] }
  0xd5   : > { %3141 = vmatpush1.bf16.msra.mxu1 %v3140_v12  ;;  %3111 = vmatprep.subr.bf16.mxu0 %v3110_v13  ;;  %v1016_v48 = vld [vmem:[#allocation7 + $0x78] sm:$0xff]  ;;  %v3154_v49 = vpack.c.bf16 %v1020_v47, %v1014_v46  ;;  %v1022_v50 = vld [vmem:[#allocation7 + $0xa8] sm:$0xff]  ;;  %v1019_v52 = vld [vmem:[#allocation7 + $0x90] sm:$0xff] }
  0xd6   : > { %3143 = vmatprep.subr.bf16.mxu1 %v3142_v17  ;;  %v3282_v53 = vpack.c.bf16 %v1022_v50, %v1016_v48  ;;  %v3156_v54 = vpack.c.bf16 %v1019_v52, %v1013_v51  ;;  %v1015_v55 = vld [vmem:[#allocation7 + $0x70] sm:$0xff]  ;;  %v1021_v56 = vld [vmem:[#allocation7 + $0xa0] sm:$0xff]  ;;  %v1026_v58 = vld [vmem:[#allocation7 + $0xc8] sm:$0xff] }
  0xd7   : > { %v3284_v57 = vpack.c.bf16 %v1021_v56, %v1015_v55  ;;  %v1032_v59 = vld [vmem:[#allocation7 + $0xf8] sm:$0xff]  ;;  %v1034_v62 = vld [vmem:[#allocation7 + $0x108] sm:$0xff]  ;;  %v1025_v63 = vld [vmem:[#allocation7 + $0xc0] sm:$0xff] }
  0xd8   : > { %3113 = vmatpush1.bf16.msra.mxu0 %v3112_v23  ;;  %v1028_v60 = vld [vmem:[#allocation7 + $0xd8] sm:$0xff]  ;;  %v3158_v61 = vpack.c.bf16 %v1032_v59, %v1026_v58  ;;  %v1031_v0 = vld [vmem:[#allocation7 + $0xf0] sm:$0xff]  ;;  %v1033_v4 = vld [vmem:[#allocation7 + $0x100] sm:$0xff] }
  0xd9   : > { %3145 = vmatpush1.bf16.msra.mxu1 %v3144_v24  ;;  %3115 = vmatprep.subr.bf16.mxu0 %v3114_v25  ;;  %v3286_v1 = vpack.c.bf16 %v1034_v62, %v1028_v60  ;;  %v3160_v2 = vpack.c.bf16 %v1031_v0, %v1025_v63  ;;  %v1027_v3 = vld [vmem:[#allocation7 + $0xd0] sm:$0xff]  ;;  %v1038_v6 = vld [vmem:[#allocation7 + $0x128] sm:$0xff]  ;;  %v1044_v7 = vld [vmem:[#allocation7 + $0x158] sm:$0xff] }
  0xda   : > { %3147 = vmatprep.subr.bf16.mxu1 %v3146_v28  ;;  %v3288_v5 = vpack.c.bf16 %v1033_v4, %v1027_v3  ;;  %v1040_v8 = vld [vmem:[#allocation7 + $0x138] sm:$0xff]  ;;  %v3162_v9 = vpack.c.bf16 %v1044_v7, %v1038_v6  ;;  %v1046_v10 = vld [vmem:[#allocation7 + $0x168] sm:$0xff]  ;;  %v1037_v11 = vld [vmem:[#allocation7 + $0x120] sm:$0xff] }
  0xdb   : > { %v1043_v12 = vld [vmem:[#allocation7 + $0x150] sm:$0xff]  ;;  %v3290_v13 = vpack.c.bf16 %v1046_v10, %v1040_v8  ;;  %v1045_v16 = vld [vmem:[#allocation7 + $0x160] sm:$0xff]  ;;  %v1050_v18 = vld [vmem:[#allocation7 + $0x188] sm:$0xff] }
  0xdc   : > { %3117 = vmatpush1.bf16.msra.mxu0 %v3116_v31  ;;  %v3164_v14 = vpack.c.bf16 %v1043_v12, %v1037_v11  ;;  %v1039_v15 = vld [vmem:[#allocation7 + $0x130] sm:$0xff]  ;;  %v1056_v19 = vld [vmem:[#allocation7 + $0x1b8] sm:$0xff]  ;;  %v1058_v22 = vld [vmem:[#allocation7 + $0x1c8] sm:$0xff] }
  0xdd   : > { %3149 = vmatpush1.bf16.msra.mxu1 %v3148_v32  ;;  %3151 = vmatprep.subr.bf16.mxu0 %v3150_v37  ;;  %v3292_v17 = vpack.c.bf16 %v1045_v16, %v1039_v15  ;;  %v1052_v20 = vld [vmem:[#allocation7 + $0x198] sm:$0xff]  ;;  %v3166_v21 = vpack.c.bf16 %v1056_v19, %v1050_v18  ;;  %v1049_v23 = vld [vmem:[#allocation7 + $0x180] sm:$0xff]  ;;  %v1055_v24 = vld [vmem:[#allocation7 + $0x1b0] sm:$0xff] }
  0xde   : > { %3279 = vmatprep.subr.bf16.mxu1 %v3278_v41  ;;  %v3294_v25 = vpack.c.bf16 %v1058_v22, %v1052_v20  ;;  %v3168_v26 = vpack.c.bf16 %v1055_v24, %v1049_v23  ;;  %v1051_v27 = vld [vmem:[#allocation7 + $0x190] sm:$0xff]  ;;  %v1057_v28 = vld [vmem:[#allocation7 + $0x1c0] sm:$0xff]  ;;  %v1062_v30 = vld [vmem:[#allocation7 + $0x1e8] sm:$0xff] }
  0xdf   : > { %508 = vmatmul.mubr.f32.vlgmr.msra.gmra.mrb[0].mxu0 %v356_v33  ;;  %v3296_v29 = vpack.c.bf16 %v1057_v28, %v1051_v27  ;;  %v1068_v31 = vld [vmem:[#allocation7 + $0x218] sm:$0xff]  ;;  %v1070_v34 = vld [vmem:[#allocation7 + $0x228] sm:$0xff]  ;;  %v1061_v35 = vld [vmem:[#allocation7 + $0x1e0] sm:$0xff] }
  0xe0   : > { %579 = vmatmul.mubr.f32.vlgmr.msra.gmra.mrb[0].mxu1 %v356_v33  ;;  %3153 = vmatpush1.bf16.msra.mxu0 %v3152_v42  ;;  %v1064_v32 = vld [vmem:[#allocation7 + $0x1f8] sm:$0xff]  ;;  %v3170_v33 = vpack.c.bf16 %v1068_v31, %v1062_v30  ;;  %v1067_v36 = vld [vmem:[#allocation7 + $0x210] sm:$0xff]  ;;  %v1069_v40 = vld [vmem:[#allocation7 + $0x220] sm:$0xff] }
  0xe1   : > { %3281 = vmatpush1.bf16.msra.mxu1 %v3280_v45  ;;  %3155 = vmatprep.subr.bf16.mxu0 %v3154_v49  ;;  %v3298_v37 = vpack.c.bf16 %v1070_v34, %v1064_v32  ;;  %v3172_v38 = vpack.c.bf16 %v1067_v36, %v1061_v35  ;;  %v1063_v39 = vld [vmem:[#allocation7 + $0x1f0] sm:$0xff]  ;;  %v1074_v42 = vld [vmem:[#allocation7 + $0x248] sm:$0xff]  ;;  %v1080_v43 = vld [vmem:[#allocation7 + $0x278] sm:$0xff] }
  0xe2   : > { %3283 = vmatprep.subr.bf16.mxu1 %v3282_v53  ;;  %v3300_v41 = vpack.c.bf16 %v1069_v40, %v1063_v39  ;;  %v1076_v44 = vld [vmem:[#allocation7 + $0x258] sm:$0xff]  ;;  %v3174_v45 = vpack.c.bf16 %v1080_v43, %v1074_v42  ;;  %v1082_v46 = vld [vmem:[#allocation7 + $0x288] sm:$0xff]  ;;  %v1073_v47 = vld [vmem:[#allocation7 + $0x240] sm:$0xff] }
  0xe3   : > { %v1079_v48 = vld [vmem:[#allocation7 + $0x270] sm:$0xff]  ;;  %v3302_v49 = vpack.c.bf16 %v1082_v46, %v1076_v44  ;;  %v1081_v52 = vld [vmem:[#allocation7 + $0x280] sm:$0xff]  ;;  %v1092_v55 = vld [vmem:[#allocation7 + $0x2d8] sm:$0xff] }
  0xe4   : > { %3157 = vmatpush1.bf16.msra.mxu0 %v3156_v54  ;;  %v3176_v50 = vpack.c.bf16 %v1079_v48, %v1073_v47  ;;  %v1075_v51 = vld [vmem:[#allocation7 + $0x250] sm:$0xff]  ;;  %v1086_v54 = vld [vmem:[#allocation7 + $0x2a8] sm:$0xff]  ;;  %v1088_v56 = vld [vmem:[#allocation7 + $0x2b8] sm:$0xff] }
  0xe5   : > { %3285 = vmatpush1.bf16.msra.mxu1 %v3284_v57  ;;  %3159 = vmatprep.subr.bf16.mxu0 %v3158_v61  ;;  %v3304_v53 = vpack.c.bf16 %v1081_v52, %v1075_v51  ;;  %v3178_v57 = vpack.c.bf16 %v1092_v55, %v1086_v54  ;;  %v1094_v58 = vld [vmem:[#allocation7 + $0x2e8] sm:$0xff]  ;;  %v1085_v59 = vld [vmem:[#allocation7 + $0x2a0] sm:$0xff]  ;;  %v1091_v60 = vld [vmem:[#allocation7 + $0x2d0] sm:$0xff] }
  0xe6   : > { %3287 = vmatprep.subr.bf16.mxu1 %v3286_v1  ;;  %v3306_v61 = vpack.c.bf16 %v1094_v58, %v1088_v56  ;;  %v3180_v62 = vpack.c.bf16 %v1091_v60, %v1085_v59  ;;  %v1087_v63 = vld [vmem:[#allocation7 + $0x2b0] sm:$0xff]  ;;  %v1093_v0 = vld [vmem:[#allocation7 + $0x2e0] sm:$0xff]  ;;  %v1104_v3 = vld [vmem:[#allocation7 + $0x338] sm:$0xff] }
  0xe7   : > { %v3308_v1 = vpack.c.bf16 %v1093_v0, %v1087_v63  ;;  %v1100_v4 = vld [vmem:[#allocation7 + $0x318] sm:$0xff]  ;;  %v1106_v6 = vld [vmem:[#allocation7 + $0x348] sm:$0xff]  ;;  %v1097_v7 = vld [vmem:[#allocation7 + $0x300] sm:$0xff] }
  0xe8   : > { %3161 = vmatpush1.bf16.msra.mxu0 %v3160_v2  ;;  %v1098_v2 = vld [vmem:[#allocation7 + $0x308] sm:$0xff]  ;;  %v1103_v8 = vld [vmem:[#allocation7 + $0x330] sm:$0xff]  ;;  %v1105_v12 = vld [vmem:[#allocation7 + $0x340] sm:$0xff] }
  0xe9   : > { %3289 = vmatpush1.bf16.msra.mxu1 %v3288_v5  ;;  %3163 = vmatprep.subr.bf16.mxu0 %v3162_v9  ;;  %v3182_v5 = vpack.c.bf16 %v1104_v3, %v1098_v2  ;;  %v3310_v9 = vpack.c.bf16 %v1106_v6, %v1100_v4  ;;  %v3184_v10 = vpack.c.bf16 %v1103_v8, %v1097_v7  ;;  %v1099_v11 = vld [vmem:[#allocation7 + $0x310] sm:$0xff]  ;;  %v1116_v15 = vld [vmem:[#allocation7 + $0x398] sm:$0xff]  ;;  %v1118_v18 = vld [vmem:[#allocation7 + $0x3a8] sm:$0xff] }
  0xea   : > { %3291 = vmatprep.subr.bf16.mxu1 %v3290_v13  ;;  %v3312_v13 = vpack.c.bf16 %v1105_v12, %v1099_v11  ;;  %v1112_v16 = vld [vmem:[#allocation7 + $0x378] sm:$0xff]  ;;  %v1109_v19 = vld [vmem:[#allocation7 + $0x360] sm:$0xff]  ;;  %v1115_v20 = vld [vmem:[#allocation7 + $0x390] sm:$0xff] }
  0xeb   : > { %v3188_v22 = vpack.c.bf16 %v1115_v20, %v1109_v19  ;;  %v1111_v23 = vld [vmem:[#allocation7 + $0x370] sm:$0xff]  ;;  %v1117_v24 = vld [vmem:[#allocation7 + $0x3a0] sm:$0xff]  ;;  %v1128_v27 = vld [vmem:[#allocation7 + $0x3f8] sm:$0xff] }
  0xec   : > { %3165 = vmatpush1.bf16.msra.mxu0 %v3164_v14  ;;  %v1110_v14 = vld [vmem:[#allocation7 + $0x368] sm:$0xff]  ;;  %v1124_v28 = vld [vmem:[#allocation7 + $0x3d8] sm:$0xff]  ;;  %v1121_v31 = vld [vmem:[#allocation7 + $0x3c0] sm:$0xff] }
  0xed   : > { %3293 = vmatpush1.bf16.msra.mxu1 %v3292_v17  ;;  %3167 = vmatprep.subr.bf16.mxu0 %v3166_v21  ;;  %v3186_v17 = vpack.c.bf16 %v1116_v15, %v1110_v14  ;;  %v3314_v21 = vpack.c.bf16 %v1118_v18, %v1112_v16  ;;  %v1130_v30 = vld [vmem:[#allocation7 + $0x408] sm:$0xff]  ;;  %v1127_v32 = vld [vmem:[#allocation7 + $0x3f0] sm:$0xff]  ;;  %v1129_v36 = vld [vmem:[#allocation7 + $0x400] sm:$0xff] }
  0xee   : > { %3295 = vmatprep.subr.bf16.mxu1 %v3294_v25  ;;  %v3316_v25 = vpack.c.bf16 %v1117_v24, %v1111_v23  ;;  %v3192_v34 = vpack.c.bf16 %v1127_v32, %v1121_v31  ;;  %v1123_v35 = vld [vmem:[#allocation7 + $0x3d0] sm:$0xff]  ;;  %v1140_v39 = vld [vmem:[#allocation7 + $0x458] sm:$0xff]  ;;  %v1142_v42 = vld [vmem:[#allocation7 + $0x468] sm:$0xff] }
  0xef   : > { %v1136_v40 = vld [vmem:[#allocation7 + $0x438] sm:$0xff]  ;;  %v1133_v43 = vld [vmem:[#allocation7 + $0x420] sm:$0xff]  ;;  %v1139_v44 = vld [vmem:[#allocation7 + $0x450] sm:$0xff] }
  0xf0   : > { %3169 = vmatpush1.bf16.msra.mxu0 %v3168_v26  ;;  %v1122_v26 = vld [vmem:[#allocation7 + $0x3c8] sm:$0xff]  ;;  %v3196_v46 = vpack.c.bf16 %v1139_v44, %v1133_v43  ;;  %v1135_v47 = vld [vmem:[#allocation7 + $0x430] sm:$0xff]  ;;  %v1141_v48 = vld [vmem:[#allocation7 + $0x460] sm:$0xff] }
  0xf1   : > { %3297 = vmatpush1.bf16.msra.mxu1 %v3296_v29  ;;  %3171 = vmatprep.subr.bf16.mxu0 %v3170_v33  ;;  %v3190_v29 = vpack.c.bf16 %v1128_v27, %v1122_v26  ;;  %v3318_v33 = vpack.c.bf16 %v1130_v30, %v1124_v28  ;;  %v1152_v51 = vld [vmem:[#allocation7 + $0x4b8] sm:$0xff]  ;;  %v1154_v55 = vld [vmem:[#allocation7 + $0x4c8] sm:$0xff]  ;;  %v1145_v56 = vld [vmem:[#allocation7 + $0x480] sm:$0xff] }
  0xf2   : > { %3299 = vmatprep.subr.bf16.mxu1 %v3298_v37  ;;  %v3320_v37 = vpack.c.bf16 %v1129_v36, %v1123_v35  ;;  %v1148_v52 = vld [vmem:[#allocation7 + $0x498] sm:$0xff]  ;;  %v1147_v60 = vld [vmem:[#allocation7 + $0x490] sm:$0xff]  ;;  %v1166_v2 = vld [vmem:[#allocation7 + $0x528] sm:$0xff] }
  0xf3   : > { %v3326_v58 = vpack.c.bf16 %v1154_v55, %v1148_v52  ;;  %v1164_v0 = vld [vmem:[#allocation7 + $0x518] sm:$0xff]  ;;  %v1163_v6 = vld [vmem:[#allocation7 + $0x510] sm:$0xff]  ;;  %v1170_v11 = vld [vmem:[#allocation7 + $0x548] sm:$0xff] }
  0xf4   : > { %3173 = vmatpush1.bf16.msra.mxu0 %v3172_v38  ;;  %v1134_v38 = vld [vmem:[#allocation7 + $0x428] sm:$0xff]  ;;  %v1159_v7 = vld [vmem:[#allocation7 + $0x4f0] sm:$0xff]  ;;  %v1176_v12 = vld [vmem:[#allocation7 + $0x578] sm:$0xff] }
  0xf5   : > { %3301 = vmatpush1.bf16.msra.mxu1 %v3300_v41  ;;  %3175 = vmatprep.subr.bf16.mxu0 %v3174_v45  ;;  %v3194_v41 = vpack.c.bf16 %v1140_v39, %v1134_v38  ;;  %v3322_v45 = vpack.c.bf16 %v1142_v42, %v1136_v40  ;;  %v3206_v14 = vpack.c.bf16 %v1176_v12, %v1170_v11  ;;  %v1172_v15 = vld [vmem:[#allocation7 + $0x558] sm:$0xff]  ;;  %v1178_v16 = vld [vmem:[#allocation7 + $0x588] sm:$0xff]  ;;  %v1175_v19 = vld [vmem:[#allocation7 + $0x570] sm:$0xff] }
  0xf6   : > { %3303 = vmatprep.subr.bf16.mxu1 %v3302_v49  ;;  %v3324_v49 = vpack.c.bf16 %v1141_v48, %v1135_v47  ;;  %v3334_v18 = vpack.c.bf16 %v1178_v16, %v1172_v15  ;;  %v1171_v20 = vld [vmem:[#allocation7 + $0x550] sm:$0xff]  ;;  %v1182_v24 = vld [vmem:[#allocation7 + $0x5a8] sm:$0xff]  ;;  %v1184_v26 = vld [vmem:[#allocation7 + $0x5b8] sm:$0xff] }
  0xf7   : > { %v1190_v30 = vld [vmem:[#allocation7 + $0x5e8] sm:$0xff]  ;;  %v1181_v31 = vld [vmem:[#allocation7 + $0x5a0] sm:$0xff]  ;;  %v1187_v32 = vld [vmem:[#allocation7 + $0x5d0] sm:$0xff] }
  0xf8   : > { %3177 = vmatpush1.bf16.msra.mxu0 %v3176_v50  ;;  %v1146_v50 = vld [vmem:[#allocation7 + $0x488] sm:$0xff]  ;;  %v3338_v35 = vpack.c.bf16 %v1190_v30, %v1184_v26  ;;  %v1183_v36 = vld [vmem:[#allocation7 + $0x5b0] sm:$0xff]  ;;  %v1200_v39 = vld [vmem:[#allocation7 + $0x638] sm:$0xff]  ;;  %v3212_v42 = vpack.c.bf16 %v1187_v32, %v1181_v31  ;;  %v4100_v26 = vmov 2131351028  }
  0xf9   : > { %3305 = vmatpush1.bf16.msra.mxu1 %v3304_v53  ;;  %3179 = vmatprep.subr.bf16.mxu0 %v3178_v57  ;;  %v423_v53 = vlaneseq  ;;  %v3198_v54 = vpack.c.bf16 %v1152_v51, %v1146_v50  ;;  %v1151_v57 = vld [vmem:[#allocation7 + $0x4b0] sm:$0xff]  ;;  %v1194_v38 = vld [vmem:[#allocation7 + $0x608] sm:$0xff]  ;;  %v1196_v40 = vld [vmem:[#allocation7 + $0x618] sm:$0xff]  ;;  %v4101_v30 = vmov 2102212464  }
  0xfa   : > { %3307 = vmatprep.subr.bf16.mxu1 %v3306_v61  ;;  %v3200_v59 = vpack.c.bf16 %v1151_v57, %v1145_v56  ;;  %v1153_v61 = vld [vmem:[#allocation7 + $0x4c0] sm:$0xff] }
  0xfb   : > { %v3328_v63 = vpack.c.bf16 %v1153_v61, %v1147_v60  ;;  %v4359_v8 = vshrl.u32 %v423_v53, 7 }
  0xfc   : > { %3181 = vmatpush1.bf16.msra.mxu0 %v3180_v62  ;;  %v1158_v62 = vld [vmem:[#allocation7 + $0x4e8] sm:$0xff] }
  0xfd   : > { %3309 = vmatpush1.bf16.msra.mxu1 %v3308_v1  ;;  %3183 = vmatprep.subr.bf16.mxu0 %v3182_v5  ;;  %v1160_v1 = vld [vmem:[#allocation7 + $0x4f8] sm:$0xff]  ;;  %v3202_v3 = vpack.c.bf16 %v1164_v0, %v1158_v62  ;;  %v1157_v5 = vld [vmem:[#allocation7 + $0x4e0] sm:$0xff]  ;;  %v425_v27 = vsub.s32 0, %v4359_v8 }
  0xfe   : > { %3311 = vmatprep.subr.bf16.mxu1 %v3310_v9  ;;  %v3330_v4 = vpack.c.bf16 %v1166_v2, %v1160_v1  ;;  %v3204_v9 = vpack.c.bf16 %v1163_v6, %v1157_v5 }
 0x100   : > { %3185 = vmatpush1.bf16.msra.mxu0 %v3184_v10  ;;  %v1165_v10 = vld [vmem:[#allocation7 + $0x520] sm:$0xff] }
 0x101   : > { %3313 = vmatpush1.bf16.msra.mxu1 %v3312_v13  ;;  %3187 = vmatprep.subr.bf16.mxu0 %v3186_v17  ;;  %v3332_v13 = vpack.c.bf16 %v1165_v10, %v1159_v7  ;;  %v1169_v17 = vld [vmem:[#allocation7 + $0x540] sm:$0xff] }
 0x102   : > { %3315 = vmatprep.subr.bf16.mxu1 %v3314_v21  ;;  %v1177_v21 = vld [vmem:[#allocation7 + $0x580] sm:$0xff]  ;;  %v3208_v23 = vpack.c.bf16 %v1175_v19, %v1169_v17  ;;  %v4098_v19 = vmov 683565275  }
 0x103   : > { %v3336_v28 = vpack.c.bf16 %v1177_v21, %v1171_v20  ;;  %v4099_v21 = vmov 2475754826  }
 0x104   : > { %3189 = vmatpush1.bf16.msra.mxu0 %v3188_v22  ;;  %v421_v22 = vld [vmem:[#allocation5] sm:$0xf] }
 0x105   : > { %3317 = vmatpush1.bf16.msra.mxu1 %v3316_v25  ;;  %3191 = vmatprep.subr.bf16.mxu0 %v3190_v29  ;;  %v1188_v25 = vld [vmem:[#allocation7 + $0x5d8] sm:$0xff]  ;;  %v426_v43 = vrot.slane %v421_v22, %v425_v27 }
 0x106   : > { %3319 = vmatprep.subr.bf16.mxu1 %v3318_v33  ;;  %v3210_v29 = vpack.c.bf16 %v1188_v25, %v1182_v24  ;;  %v433_v33 = vsub.s32 2, %v4359_v8 }
 0x108   : > { %3193 = vmatpush1.bf16.msra.mxu0 %v3192_v34  ;;  %v429_v34 = vsub.s32 1, %v4359_v8 }
 0x109   : > { %3321 = vmatpush1.bf16.msra.mxu1 %v3320_v37  ;;  %3195 = vmatprep.subr.bf16.mxu0 %v3194_v41  ;;  %v1189_v37 = vld [vmem:[#allocation7 + $0x5e0] sm:$0xff]  ;;  %v1202_v41 = vld [vmem:[#allocation7 + $0x648] sm:$0xff] }
 0x10a   : > { %3323 = vmatprep.subr.bf16.mxu1 %v3322_v45  ;;  %v3340_v44 = vpack.c.bf16 %v1189_v37, %v1183_v36  ;;  %v3214_v45 = vpack.c.bf16 %v1200_v39, %v1194_v38  ;;  %v430_v47 = vrot.slane %v421_v22, %v429_v34  ;;  %v3342_v48 = vpack.c.bf16 %v1202_v41, %v1196_v40 }
 0x10b   : > { %v4103_v38 = vmov 1326507024  }
 0x10c   : > { %3197 = vmatpush1.bf16.msra.mxu0 %v3196_v46  ;;  %v434_v46 = vrot.slane %v421_v22, %v433_v33 }
 0x10d   : > { %3325 = vmatpush1.bf16.msra.mxu1 %v3324_v49  ;;  %3199 = vmatprep.subr.bf16.mxu0 %v3198_v54 }
 0x10e   : > { %3327 = vmatprep.subr.bf16.mxu1 %v3326_v58  ;;  %v437_v58 = vsub.s32 3, %v4359_v8 }
 0x110   : > { %3201 = vmatpush1.bf16.msra.mxu0 %v3200_v59  ;;  %v438_v1 = vrot.slane %v421_v22, %v437_v58 }
 0x111   : > { %3329 = vmatpush1.bf16.msra.mxu1 %v3328_v63  ;;  %3203 = vmatprep.subr.bf16.mxu0 %v3202_v3 }
 0x112   : > { %3331 = vmatprep.subr.bf16.mxu1 %v3330_v4 }
 0x114   : > { %3205 = vmatpush1.bf16.msra.mxu0 %v3204_v9 }
 0x115   : > { %3333 = vmatpush1.bf16.msra.mxu1 %v3332_v13  ;;  %3207 = vmatprep.subr.bf16.mxu0 %v3206_v14 }
 0x116   : > { %3335 = vmatprep.subr.bf16.mxu1 %v3334_v18 }
 0x118   : > { %3209 = vmatpush1.bf16.msra.mxu0 %v3208_v23 }
 0x119   : > { %3337 = vmatpush1.bf16.msra.mxu1 %v3336_v28  ;;  %3211 = vmatprep.subr.bf16.mxu0 %v3210_v29 }
 0x11a   : > { %3339 = vmatprep.subr.bf16.mxu1 %v3338_v35  ;;  %v4102_v35 = vmov 920167782  }
 0x11c   : > { %3213 = vmatpush1.bf16.msra.mxu0 %v3212_v42 }
 0x11d   : > { %3341 = vmatpush1.bf16.msra.mxu1 %v3340_v44  ;;  %3215 = vmatprep.subr.bf16.mxu0 %v3214_v45 }
 0x11e   : > { %3343 = vmatprep.subr.bf16.mxu1 %v3342_v48 }
 0x1b2   : > { %v509_v49 = vpop.f32.mrb[0].mxu0 }
 0x1b3   : > { %v4370_v50 = vadd.f32 %v509_v49, %v426_v43  ;;  %v580_v51 = vpop.f32.mrb[0].mxu1  ;;  %v511_v52 = vpop.f32.mrb[1].mxu0 }
 0x1b4   : > { %v4372_v53 = vadd.f32 %v580_v51, %v434_v46  ;;  %v4374_v54 = vadd.f32 %v511_v52, %v430_v47  ;;  %v582_v55 = vpop.f32.mrb[1].mxu1 }
 0x1b5   : > { %v585_v56 = vand.u32 2147483647, %v4370_v50  ;;  %v588_v57 = vand.u32 2139095040, %v4370_v50  ;;  %v4385_v7 = vadd.f32 %v582_v55, %v438_v1 }
 0x1b6   : > { %v796_v59 = vand.u32 2139095040, %v4372_v53  ;;  %v692_v62 = vand.u32 2139095040, %v4374_v54  ;;  %v793_v13 = vand.u32 2147483647, %v4372_v53  ;;  %v689_v14 = vand.u32 2147483647, %v4374_v54 }
 0x1b7   : > { %v589_v60 = vshrl.u32 %v588_v57, 23  ;;  %v592_v0 = vand.u32 8388607, %v585_v56  ;;  %v900_v18 = vand.u32 2139095040, %v4385_v7 }
 0x1b8   : > { %v797_v61 = vshrl.u32 %v796_v59, 23  ;;  %v693_v3 = vshrl.u32 %v692_v62, 23 }
 0x1b9   : > { %v2936_v63 = vadd.s32 4294967169, %v589_v60  ;;  %v593_v6 = vor.u32 8388608, %v592_v0 }
 0x1ba   : > { %v2944_v2 = vadd.s32 4294967169, %v797_v61  ;;  %v2940_v10 = vadd.s32 4294967169, %v693_v3 }
 0x1bb   : > { %v595_v4 = vadd.s32 1, %v2936_v63  ;;  %v4389_v17 = vshll.u32 %v593_v6, 8 }
 0x1bc   : > { %v803_v5 = vadd.s32 1, %v2944_v2  ;;  %v4394_v24 = vadd.s32 1, %v2940_v10 }
 0x1bd   : > { %vm596_vm0 = vcmp.gt.s32.totalorder %v595_v4, 0 }
 0x1be   : > { %v597_v9 = vsel %vm596_vm0, %v595_v4, 0  ;;  %vm804_vm1 = vcmp.gt.s32.totalorder %v803_v5, 0  ;;  %vm700_vm8 = vcmp.gt.s32.totalorder %v4394_v24, 0 }
 0x1bf   : > { %v599_v11 = vand.u32 31, %v597_v9  ;;  %v805_v12 = vsel %vm804_vm1, %v803_v5, 0  ;;  %v598_v15 = vshrl.u32 %v597_v9, 5 }
 0x1c0   : > { %v807_v23 = vand.u32 31, %v805_v12  ;;  %v4407_v63 = vshrl.u32 %v805_v12, 5 }
 0x1c1   : > { %v600_v16 = vsub.s32 32, %v599_v11  ;;  %v602_v20 = vshll.u32 %v4098_v19, %v599_v11  ;;  %v605_v22 = vshll.u32 %v4099_v21, %v599_v11  ;;  %v608_v29 = vshll.u32 %v4100_v26, %v599_v11 }
 0x1c2   : > { %v611_v32 = vshll.u32 %v4101_v30, %v599_v11  ;;  %v614_v37 = vshll.u32 %v4102_v35, %v599_v11  ;;  %vm617_vm2 = vcmp.lt.s32.totalorder %v598_v15, 1  ;;  %vm618_vm3 = vcmp.lt.s32.totalorder %v598_v15, 2 }
 0x1c3   : > { %v603_v25 = vshrl.u32 %v4099_v21, %v600_v16  ;;  %v606_v28 = vshrl.u32 %v4100_v26, %v600_v16  ;;  %v609_v31 = vshrl.u32 %v4101_v30, %v600_v16  ;;  %v612_v36 = vshrl.u32 %v4102_v35, %v600_v16 }
 0x1c4   : > { %v615_v39 = vshrl.u32 %v4103_v38, %v600_v16  ;;  %vm620_vm4 = vcmp.lt.s32.totalorder %v598_v15, 4  ;;  %v601_v45 = vshrl.u32 %v4098_v19, %v600_v16  ;;  %vm619_vm5 = vcmp.lt.s32.totalorder %v598_v15, 3 }
 0x1c5   : > { %v604_v40 = vor.u32 %v603_v25, %v602_v20  ;;  %v607_v41 = vor.u32 %v606_v28, %v605_v22  ;;  %v610_v42 = vor.u32 %v609_v31, %v608_v29  ;;  %v613_v43 = vor.u32 %v612_v36, %v611_v32 }
 0x1c6   : > { %v616_v44 = vor.u32 %v615_v39, %v614_v37  ;;  %v808_v52 = vsub.s32 32, %v807_v23  ;;  %v810_v0 = vshll.u32 %v4098_v19, %v807_v23  ;;  %v813_v9 = vshll.u32 %v4099_v21, %v807_v23 }
 0x1c7   : > { %v622_v46 = vsel %vm620_vm4, %v610_v42, 2102212464  ;;  %v625_v47 = vsel %vm617_vm2, %v604_v40, %v607_v41  ;;  %v629_v48 = vsel %vm617_vm2, %v607_v41, %v610_v42  ;;  %v626_v49 = vsel %vm620_vm4, %v613_v43, 920167782 }
 0x1c8   : > { %v630_v51 = vsel %vm620_vm4, %v616_v44, 1326507024  ;;  %v621_v55 = vsel %vm617_vm2, %v601_v45, %v604_v40  ;;  %v623_v57 = vsel %vm619_vm5, %v607_v41, %v622_v46  ;;  %v627_v59 = vsel %vm619_vm5, %v610_v42, %v626_v49 }
 0x1c9   : > { %v631_v60 = vsel %vm619_vm5, %v613_v43, %v630_v51  ;;  %v628_v61 = vsel %vm618_vm3, %v625_v47, %v627_v59  ;;  %v624_v5 = vsel %vm618_vm3, %v621_v55, %v623_v57  ;;  %v811_v6 = vshrl.u32 %v4099_v21, %v808_v52 }
 0x1ca   : > { %v632_v62 = vsel %vm618_vm3, %v629_v48, %v631_v60  ;;  %v4415_v3 = vmul.u32.u64.low %v4389_v17, %v628_v61  ;;  %v4416_v4 = vmul.u32.u64.high %v4389_v17, %v628_v61, %v4415_v3  ;;  %v814_v10 = vshrl.u32 %v4100_v26, %v808_v52 }
 0x1cb   : > { %v4411_v1 = vmul.u32.u64.low %v4389_v17, %v632_v62  ;;  %v4412_v2 = vmul.u32.u64.high %v4389_v17, %v632_v62, %v4411_v1  ;;  %v816_v11 = vshll.u32 %v4100_v26, %v807_v23  ;;  %v817_v12 = vshrl.u32 %v4101_v30, %v808_v52 }
 0x1cc   : > { %v819_v16 = vshll.u32 %v4101_v30, %v807_v23  ;;  %v820_v20 = vshrl.u32 %v4102_v35, %v808_v52  ;;  %v800_v22 = vand.u32 8388607, %v793_v13  ;;  %v822_v15 = vshll.u32 %v4102_v35, %v807_v23 }
 0x1cd   : > { %v823_v25 = vshrl.u32 %v4103_v38, %v808_v52  ;;  %v696_v28 = vand.u32 8388607, %v689_v14  ;;  %vm642_vm6 = vc.u32 %v4412_v2, %v4415_v3  ;;  %v643_v29 = vadd.s32 1, %v4416_v4 }
 0x1ce   : > { %v821_v31 = vor.u32 %v820_v20, %v819_v16  ;;  %v901_v32 = vshrl.u32 %v900_v18, 23  ;;  %v640_v36 = vmul.u32 %v4389_v17, %v624_v5  ;;  %v4437_v37 = vor.u32 %v811_v6, %v810_v0 }
 0x1cf   : > { %vm828_vm7 = vcmp.lt.s32.totalorder %v4407_v63, 4  ;;  %v644_v23 = vsel %vm642_vm6, %v643_v29, %v4416_v4  ;;  %v4442_v39 = vor.u32 %v814_v10, %v813_v9  ;;  %v818_v40 = vor.u32 %v817_v12, %v816_v11 }
 0x1d0   : > { %vm825_vm9 = vcmp.lt.s32.totalorder %v4407_v63, 1  ;;  %v645_v41 = vadd.s32 %v644_v23, %v640_v36  ;;  %v824_v42 = vor.u32 %v823_v25, %v822_v15  ;;  %vm827_vm10 = vcmp.lt.s32.totalorder %v4407_v63, 3 }
 0x1d1   : > { %v834_v17 = vsel %vm828_vm7, %v821_v31, 920167782  ;;  %v801_v18 = vor.u32 8388608, %v800_v22  ;;  %v697_v43 = vor.u32 8388608, %v696_v28  ;;  %v701_v44 = vsel %vm700_vm8, %v4394_v24, 0 }
 0x1d2   : > { %v646_v45 = vadd.s32 536870912, %v645_v41  ;;  %vm826_vm11 = vcmp.lt.s32.totalorder %v4407_v63, 2  ;;  %v833_v46 = vsel %vm825_vm9, %v4437_v37, %v4442_v39  ;;  %v835_v47 = vsel %vm827_vm10, %v818_v40, %v834_v17 }
 0x1d3   : > { %v2948_v48 = vadd.s32 4294967169, %v901_v32  ;;  %v838_v51 = vsel %vm828_vm7, %v824_v42, 1326507024  ;;  %v702_v55 = vshrl.u32 %v701_v44, 5  ;;  %v703_v57 = vand.u32 31, %v701_v44 }
 0x1d4   : > { %v4456_v49 = vshrl.u32 %v646_v45, 30  ;;  %v4460_v24 = vshll.u32 %v801_v18, 8  ;;  %v4462_v59 = vshll.u32 %v697_v43, 8  ;;  %v809_v61 = vshrl.u32 %v4098_v19, %v808_v52 }
 0x1d5   : > { %v830_v62 = vsel %vm828_vm7, %v818_v40, 2102212464  ;;  %v704_v0 = vsub.s32 32, %v703_v57  ;;  %v4470_v1 = vsel %vm826_vm11, %v833_v46, %v835_v47  ;;  %v837_v4 = vsel %vm825_vm9, %v4442_v39, %v818_v40 }
 0x1d6   : > { %v648_v60 = vshll.u32 %v4456_v49, 30  ;;  %v839_v5 = vsel %vm827_vm10, %v821_v31, %v838_v51  ;;  %v907_v6 = vadd.s32 1, %v2948_v48  ;;  %v706_v52 = vshll.u32 %v4098_v19, %v703_v57 }
 0x1d7   : > { %v707_v10 = vshrl.u32 %v4099_v21, %v704_v0  ;;  %vm721_vm12 = vcmp.lt.s32.totalorder %v702_v55, 1  ;;  %v709_v11 = vshll.u32 %v4099_v21, %v703_v57  ;;  %v710_v12 = vshrl.u32 %v4100_v26, %v704_v0 }
 0x1d8   : > { %v4477_v9 = vsub.s32 %v645_v41, %v648_v60  ;;  %v712_v16 = vshll.u32 %v4100_v26, %v703_v57  ;;  %v713_v20 = vshrl.u32 %v4101_v30, %v704_v0  ;;  %v715_v25 = vshll.u32 %v4101_v30, %v703_v57 }
 0x1d9   : > { %v708_v15 = vor.u32 %v707_v10, %v706_v52  ;;  %v716_v28 = vshrl.u32 %v4102_v35, %v704_v0  ;;  %v711_v29 = vor.u32 %v710_v12, %v709_v11  ;;  %v718_v32 = vshll.u32 %v4102_v35, %v703_v57 }
 0x1da   : > { %v651_v22 = vsub.s32 0, %v4477_v9  ;;  %v714_v31 = vor.u32 %v713_v20, %v712_v16  ;;  %v719_v36 = vshrl.u32 %v4103_v38, %v704_v0  ;;  %vm722_vm13 = vcmp.lt.s32.totalorder %v702_v55, 2 }
 0x1db   : > { %v717_v40 = vor.u32 %v716_v28, %v715_v25  ;;  %vm724_vm14 = vcmp.lt.s32.totalorder %v702_v55, 4  ;;  %v705_v41 = vshrl.u32 %v4098_v19, %v704_v0  ;;  %v729_v18 = vsel %vm721_vm12, %v708_v15, %v711_v29 }
 0x1dc   : > { %v2937_v23 = vmin.u32 %v651_v22, %v4477_v9  ;;  %v720_v42 = vor.u32 %v719_v36, %v718_v32  ;;  %v726_v17 = vsel %vm724_vm14, %v714_v31, 2102212464  ;;  %vm723_vm15 = vcmp.lt.s32.totalorder %v702_v55, 3 }
 0x1dd   : > { %v730_v44 = vsel %vm724_vm14, %v717_v40, 920167782  ;;  %v733_v45 = vsel %vm721_vm12, %v711_v29, %v714_v31  ;;  %v725_v46 = vsel %vm721_vm12, %v705_v41, %v708_v15  ;;  %vm908_vm0 = vcmp.gt.s32.totalorder %v907_v6, 0 }
 0x1de   : > { %v653_v43 = vclz %v2937_v23  ;;  %v731_v47 = vsel %vm723_vm15, %v714_v31, %v730_v44  ;;  %v734_v48 = vsel %vm724_vm14, %v720_v42, 1326507024  ;;  %v727_v57 = vsel %vm723_vm15, %v711_v29, %v726_v17 }
 0x1df   : > { %v732_v60 = vsel %vm722_vm13, %v729_v18, %v731_v47  ;;  %v735_v52 = vsel %vm723_vm15, %v717_v40, %v734_v48  ;;  %v840_v0 = vsel %vm826_vm11, %v837_v4, %v839_v5  ;;  %v909_v22 = vsel %vm908_vm0, %v907_v6, 0 }
 0x1e0   : > { %v2938_v51 = vadd.s32 4294967294, %v653_v43  ;;  %v736_v10 = vsel %vm722_vm13, %v733_v45, %v735_v52  ;;  %v4500_v11 = vmul.u32.u64.low %v4462_v59, %v732_v60  ;;  %v4501_v12 = vmul.u32.u64.high %v4462_v59, %v732_v60, %v4500_v11 }
 0x1e1   : > { %v4505_v16 = vmul.u32.u64.low %v4462_v59, %v736_v10  ;;  %v4506_v20 = vmul.u32.u64.high %v4462_v59, %v736_v10, %v4505_v16  ;;  %v728_v25 = vsel %vm722_vm13, %v725_v46, %v727_v57  ;;  %v897_v28 = vand.u32 2147483647, %v4385_v7 }
 0x1e2   : > { %vm2939_vm1 = vcmp.lt.s32.totalorder %v2938_v51, 0  ;;  %v911_v29 = vand.u32 31, %v909_v22  ;;  %v829_v5 = vsel %vm825_vm9, %v809_v61, %v4437_v37  ;;  %v831_v6 = vsel %vm827_vm10, %v4442_v39, %v830_v62 }
 0x1e3   : > { %v656_v15 = vsel %vm2939_vm1, 0, %v2938_v51  ;;  %v4515_v31 = vmul.u32.u64.low %v4460_v24, %v4470_v1  ;;  %v4516_v32 = vmul.u32.u64.high %v4460_v24, %v4470_v1, %v4515_v31  ;;  %v747_v23 = vadd.s32 1, %v4501_v12 }
 0x1e4   : > { %v661_v4 = vsub.s32 4294967266, %v656_v15  ;;  %v4523_v55 = vmul.u32.u64.low %v4460_v24, %v840_v0  ;;  %v4524_v36 = vmul.u32.u64.high %v4460_v24, %v840_v0, %v4523_v55  ;;  %v657_v40 = vsub.s32 32, %v656_v15 }
 0x1e5   : > { %v744_v41 = vmul.u32 %v4462_v59, %v728_v25  ;;  %vm746_vm2 = vc.u32 %v4506_v20, %v4500_v11  ;;  %v912_v37 = vsub.s32 32, %v911_v29  ;;  %v641_v42 = vadd.s32 %v4415_v3, %v4412_v2 }
 0x1e6   : > { %v662_v61 = vadd.s32 127, %v661_v4  ;;  %v748_v1 = vsel %vm746_vm2, %v747_v23, %v4501_v12  ;;  %v832_v62 = vsel %vm826_vm11, %v829_v5, %v831_v6  ;;  %v904_v17 = vand.u32 8388607, %v897_v28 }
 0x1e7   : > { %v749_v39 = vadd.s32 %v748_v1, %v744_v41  ;;  %v910_v18 = vshrl.u32 %v909_v22, 5  ;;  %v659_v43 = vshrl.u32 %v641_v42, %v657_v40  ;;  %v914_v44 = vshll.u32 %v4098_v19, %v911_v29 }
 0x1e8   : > { %v915_v45 = vshrl.u32 %v4099_v21, %v912_v37  ;;  %v663_v46 = vshll.u32 %v662_v61, 23  ;;  %v917_v47 = vshll.u32 %v4099_v21, %v911_v29  ;;  %v918_v48 = vshrl.u32 %v4100_v26, %v912_v37 }
 0x1e9   : > { %v750_v59 = vadd.s32 536870912, %v749_v39  ;;  %v920_v2 = vshll.u32 %v4100_v26, %v911_v29  ;;  %v921_v63 = vshrl.u32 %v4101_v30, %v912_v37  ;;  %v923_v51 = vshll.u32 %v4101_v30, %v911_v29 }
 0x1ea   : > { %v924_v57 = vshrl.u32 %v4102_v35, %v912_v37  ;;  %v658_v60 = vshll.u32 %v4477_v9, %v656_v15  ;;  %v848_v52 = vmul.u32 %v4460_v24, %v832_v62  ;;  %v851_v0 = vadd.s32 1, %v4516_v32 }
 0x1eb   : > { %v4542_v3 = vshrl.u32 %v750_v59, 30  ;;  %v905_v10 = vor.u32 8388608, %v904_v17  ;;  %vm850_vm3 = vc.u32 %v4524_v36, %v4515_v31  ;;  %v926_v16 = vshll.u32 %v4102_v35, %v911_v29 }
 0x1ec   : > { %v927_v22 = vshrl.u32 %v4103_v38, %v912_v37  ;;  %v660_v25 = vor.u32 %v659_v43, %v658_v60  ;;  %v664_v4 = vor.u32 4788187, %v663_v46  ;;  %v916_v5 = vor.u32 %v915_v45, %v914_v44 }
 0x1ed   : > { %v752_v12 = vshll.u32 %v4542_v3, 30  ;;  %v919_v6 = vor.u32 %v918_v48, %v917_v47  ;;  %v922_v9 = vor.u32 %v921_v63, %v920_v2  ;;  %v925_v15 = vor.u32 %v924_v57, %v923_v51 }
 0x1ee   : > { %vm929_vm4 = vcmp.lt.s32.totalorder %v910_v18, 1  ;;  %v852_v24 = vsel %vm850_vm3, %v851_v0, %v4516_v32  ;;  %v913_v23 = vshrl.u32 %v4098_v19, %v912_v37  ;;  %vm932_vm5 = vcmp.lt.s32.totalorder %v910_v18, 4 }
 0x1ef   : > { %v753_v55 = vsub.s32 %v749_v39, %v752_v12  ;;  %v928_v41 = vor.u32 %v927_v22, %v926_v16  ;;  %vm931_vm6 = vcmp.lt.s32.totalorder %v910_v18, 3  ;;  %v934_v29 = vsel %vm932_vm5, %v922_v9, 2102212464 }
 0x1f0   : > { %v665_v61 = vand.u32 2147483647, %v664_v4  ;;  %vm930_vm7 = vcmp.lt.s32.totalorder %v910_v18, 2  ;;  %v937_v1 = vsel %vm929_vm4, %v916_v5, %v919_v6  ;;  %v945_v42 = vshll.u32 %v905_v10, 8 }
 0x1f1   : > { %v755_v40 = vsub.s32 0, %v753_v55  ;;  %v667_v62 = vcvt.s32.f32 %v660_v25  ;;  %v853_v39 = vadd.s32 %v852_v24, %v848_v52  ;;  %v938_v43 = vsel %vm932_vm5, %v925_v15, 920167782 }
 0x1f2   : > { %v933_v32 = vsel %vm929_vm4, %v913_v23, %v916_v5  ;;  %v935_v37 = vsel %vm931_vm6, %v919_v6, %v934_v29  ;;  %v939_v59 = vsel %vm931_vm6, %v922_v9, %v938_v43  ;;  %v941_v44 = vsel %vm929_vm4, %v919_v6, %v922_v9 }
 0x1f3   : > { %v2941_v17 = vmin.u32 %v755_v40, %v753_v55  ;;  %v940_v46 = vsel %vm930_vm7, %v937_v1, %v939_v59  ;;  %v942_v47 = vsel %vm932_vm5, %v928_v41, 1326507024  ;;  %v668_v48 = vmul.f32 %v667_v62, %v665_v61 }
 0x1f4   : > { %v943_v2 = vsel %vm931_vm6, %v925_v15, %v942_v47  ;;  %v4567_v63 = vmul.u32.u64.low %v945_v42, %v940_v46  ;;  %v4568_v51 = vmul.u32.u64.high %v945_v42, %v940_v46, %v4567_v63  ;;  %v936_v60 = vsel %vm930_vm7, %v933_v32, %v935_v37 }
 0x1f5   : > { %v757_v45 = vclz %v2941_v17  ;;  %v944_v52 = vsel %vm930_vm7, %v941_v44, %v943_v2  ;;  %v854_v0 = vadd.s32 536870912, %v853_v39  ;;  %v669_v16 = vxor.u32 2147483648, %v668_v48 }
 0x1f6   : > { %v4573_v10 = vmul.u32.u64.low %v945_v42, %v944_v52  ;;  %v4574_v12 = vmul.u32.u64.high %v945_v42, %v944_v52, %v4573_v10  ;;  %v952_v25 = vmul.u32 %v945_v42, %v936_v60  ;;  %v955_v4 = vadd.s32 1, %v4568_v51 }
 0x1f7   : > { %v2942_v57 = vadd.s32 4294967294, %v757_v45  ;;  %v745_v5 = vadd.s32 %v4500_v11, %v4506_v20  ;;  %vm587_vm9 = vcmp.lt.s32.totalorder %v4370_v50, 0  ;;  %v4580_v15 = vshrl.u32 %v854_v0, 30 }
 0x1f8   : > { %vm954_vm10 = vc.u32 %v4574_v12, %v4567_v63  ;;  %v670_v41 = vsel %vm587_vm9, %v669_v16, %v668_v48  ;;  %vm4589_vm11 = vcmp.le.f32.partialorder %v585_v56, 0.7853982  ;;  %v671_v43 = vsub.s32 4, %v4456_v49 }
 0x1f9   : > { %vm2943_vm8 = vcmp.lt.s32.totalorder %v2942_v57, 0  ;;  %v956_v40 = vsel %vm954_vm10, %v955_v4, %v4568_v51  ;;  %v856_v42 = vshll.u32 %v4580_v15, 30  ;;  %v775_v45 = vsub.s32 4, %v4542_v3 }
 0x1fa   : > { %v760_v22 = vsel %vm2943_vm8, 0, %v2942_v57  ;;  %v957_v29 = vadd.s32 %v956_v40, %v952_v25  ;;  %v672_v47 = vsel %vm587_vm9, %v671_v43, %v4456_v49  ;;  %vm691_vm12 = vcmp.lt.s32.totalorder %v4374_v54, 0 }
 0x1fb   : > { %v761_v6 = vsub.s32 32, %v760_v22  ;;  %v765_v9 = vsub.s32 4294967266, %v760_v22  ;;  %v762_v18 = vshll.u32 %v753_v55, %v760_v22  ;;  %v673_v55 = vsel %vm4589_vm11, %v4370_v50, %v670_v41 }
 0x1fc   : > { %v958_v1 = vadd.s32 536870912, %v957_v29  ;;  %3795 = vsinq.f32 %v673_v55  ;;  %v4601_v59 = vsub.s32 %v853_v39, %v856_v42  ;;  %vm4610_vm13 = vcmp.le.f32.partialorder %v689_v14, 0.7853982  ;;  %v1199_v42 = vld [vmem:[#allocation7 + $0x630] sm:$0xff] }
 0x1fd   : > { %v763_v24 = vshrl.u32 %v745_v5, %v761_v6  ;;  %v766_v23 = vadd.s32 127, %v765_v9  ;;  %3797 = vcosq.f32 %v673_v55  ;;  %v776_v60 = vsel %vm691_vm12, %v775_v45, %v4542_v3  ;;  %v1193_v55 = vld [vmem:[#allocation7 + $0x600] sm:$0xff]  ;;  %v1195_v45 = vld [vmem:[#allocation7 + $0x610] sm:$0xff] }
 0x1fe   : > { %v4597_v17 = vshrl.u32 %v958_v1, 30  ;;  %v859_v39 = vsub.s32 0, %v4601_v59  ;;  %v674_v52 = vsel %vm4589_vm11, 0, %v672_v47  ;;  %v778_v14 = vsel %vm4610_vm13, 0, %v776_v60  ;;  %v1201_v47 = vld [vmem:[#allocation7 + $0x640] sm:$0xff]  ;;  %v1212_v60 = vld [vmem:[#allocation7 + $0x698] sm:$0xff] }
 0x1ff   : > { %v764_v61 = vor.u32 %v763_v24, %v762_v18  ;;  %v767_v11 = vshll.u32 %v766_v23, 23  ;;  %v678_v16 = vadd.s32 3, %v674_v52  ;;  %v782_v5 = vadd.s32 3, %v778_v14  ;;  %v1208_v52 = vld [vmem:[#allocation7 + $0x678] sm:$0xff] }
 0x200   : > { %v960_v56 = vshll.u32 %v4597_v17, 30  ;;  %v2945_v22 = vmin.u32 %v859_v39, %v4601_v59  ;;  %v953_v6 = vadd.s32 %v4567_v63, %v4574_v12  ;;  %v3344_v14 = vpack.c.bf16 %v1201_v47, %v1195_v45  ;;  %v1232_v45 = vld [vmem:[#allocation7 + $0x738] sm:$0xff]  ;;  %v1238_v47 = vld [vmem:[#allocation7 + $0x768] sm:$0xff] }
 0x201   : > { %v768_v62 = vor.u32 4788187, %v767_v11  ;;  %v771_v37 = vcvt.s32.f32 %v764_v61  ;;  %v679_v9 = vand.u32 3, %v678_v16  ;;  %v783_v11 = vand.u32 3, %v782_v5 }
 0x202   : > { %v961_v46 = vsub.s32 %v957_v29, %v960_v56  ;;  %v861_v18 = vclz %v2945_v22  ;;  %vm781_vm6 = vweird.f32 %v4374_v54  ;;  %vm677_vm7 = vweird.f32 %v4370_v50 }
 0x203   : > { %v769_v32 = vand.u32 2147483647, %v768_v62  ;;  %vm681_vm15 = vcmp.eq.s32.totalorder %v679_v9, 0  ;;  %vm684_vm0 = vcmp.eq.s32.totalorder %v679_v9, 2  ;;  %vm785_vm1 = vcmp.eq.s32.totalorder %v783_v11, 0 }
 0x204   : > { %v963_v2 = vsub.s32 0, %v961_v46  ;;  %v2946_v43 = vadd.s32 4294967294, %v861_v18  ;;  %vm788_vm2 = vcmp.eq.s32.totalorder %v783_v11, 2  ;;  %vm680_vm3 = vcmp.lt.s32.totalorder %v679_v9, 2  ;;  %v1207_v9 = vld [vmem:[#allocation7 + $0x670] sm:$0xff]  ;;  %v1213_v18 = vld [vmem:[#allocation7 + $0x6a0] sm:$0xff] }
 0x205   : > { %v772_v44 = vmul.f32 %v771_v37, %v769_v32  ;;  %vm784_vm4 = vcmp.lt.s32.totalorder %v783_v11, 2  ;;  %vm899_vm8 = vcmp.lt.s32.totalorder %v4385_v7, 0  ;;  %vm4643_vm9 = vcmp.le.f32.partialorder %v897_v28, 0.7853982 }
 0x206   : > { %v2949_v0 = vmin.u32 %v963_v2, %v961_v46  ;;  %v3796_v25 = vpop.eup %3795  ;;  %v1206_v2 = vld [vmem:[#allocation7 + $0x668] sm:$0xff]  ;;  %vm2947_vm5 = vcmp.lt.s32.totalorder %v2946_v43, 0 }
 0x207   : > { %v773_v48 = vxor.u32 2147483648, %v772_v44  ;;  %v3798_v3 = vpop.eup %3797  ;;  %v682_v23 = vxor.u32 2147483648, %v3796_v25  ;;  %v3218_v5 = vpack.c.bf16 %v1212_v60, %v1206_v2  ;;  %v4636_v11 = vsel %vm2947_vm5, 0, %v2946_v43 }
 0x208   : > { %v965_v10 = vclz %v2949_v0  ;;  %v685_v61 = vxor.u32 2147483648, %v3798_v3  ;;  %v1214_v0 = vld [vmem:[#allocation7 + $0x6a8] sm:$0xff] }
 0x209   : > { %v774_v57 = vsel %vm691_vm12, %v773_v48, %v772_v44  ;;  %v683_v32 = vsel %vm681_vm15, %v3798_v3, %v682_v23  ;;  %v3216_v48 = vpack.c.bf16 %v1199_v42, %v1193_v55  ;;  %v3348_v55 = vpack.c.bf16 %v1213_v18, %v1207_v9  ;;  %v1217_v42 = vld [vmem:[#allocation7 + $0x6c0] sm:$0xff] }
 0x20a   : > { %v777_v49 = vsel %vm4610_vm13, %v4374_v54, %v774_v57  ;;  %v2950_v4 = vadd.s32 4294967294, %v965_v10  ;;  %v686_v44 = vsel %vm684_vm0, %v685_v61, %v3796_v25  ;;  %v1205_v25 = vld [vmem:[#allocation7 + $0x660] sm:$0xff]  ;;  %v983_v54 = vsub.s32 4, %v4597_v17  ;;  %v1226_v61 = vld [vmem:[#allocation7 + $0x708] sm:$0xff] }
 0x20b   : > { %3799 = vcosq.f32 %v777_v49  ;;  %v687_v10 = vsel %vm680_vm3, %v683_v32, %v686_v44  ;;  %v1236_v44 = vld [vmem:[#allocation7 + $0x758] sm:$0xff]  ;;  %vm989_vm13 = vweird.f32 %v4385_v7  ;;  %vm4671_vm15 = vcmp.le.f32.partialorder %v793_v13, 0.7853982 }
 0x20c   : > { %3801 = vsinq.f32 %v777_v49  ;;  %vm2951_vm14 = vcmp.lt.s32.totalorder %v2950_v4, 0  ;;  %v984_v28 = vsel %vm899_vm8, %v983_v54, %v4597_v17  ;;  %v1332_v13 = vld [vmem:[#allocation7 + $0xa58] sm:$0xff]  ;;  %vm885_vm3 = vweird.f32 %v4372_v53 }
 0x20d   : > { %v968_v24 = vsel %vm2951_vm14, 0, %v2950_v4  ;;  %v1211_v4 = vld [vmem:[#allocation7 + $0x690] sm:$0xff]  ;;  %v986_v60 = vsel %vm4643_vm9, 0, %v984_v28  ;;  %vm795_vm14 = vcmp.lt.s32.totalorder %v4372_v53, 0 }
 0x20e   : > { %v969_v40 = vsub.s32 32, %v968_v24  ;;  %v970_v41 = vshll.u32 %v961_v46, %v968_v24  ;;  %v973_v29 = vsub.s32 4294967266, %v968_v24  ;;  %v1218_v24 = vld [vmem:[#allocation7 + $0x6c8] sm:$0xff]  ;;  %v1255_v28 = vld [vmem:[#allocation7 + $0x7f0] sm:$0xff] }
 0x210   : > { %v971_v20 = vshrl.u32 %v953_v6, %v969_v40  ;;  %v974_v1 = vadd.s32 127, %v973_v29  ;;  %v3346_v6 = vpack.c.bf16 %v1214_v0, %v1208_v52  ;;  %v4632_v40 = vsel %vm677_vm7, nan, %v687_v10  ;;  %v1220_v29 = vld [vmem:[#allocation7 + $0x6d8] sm:$0xff]  ;;  %v1231_v0 = vld [vmem:[#allocation7 + $0x730] sm:$0xff]  ;;  %v1242_v10 = vld [vmem:[#allocation7 + $0x788] sm:$0xff] }
 0x211   : > { %v3350_v32 = vpack.c.bf16 %v1226_v61, %v1220_v29  ;;  %v3354_v52 = vpack.c.bf16 %v1238_v47, %v1232_v45  ;;  %v1243_v29 = vld [vmem:[#allocation7 + $0x790] sm:$0xff]  ;;  %v1249_v61 = vld [vmem:[#allocation7 + $0x7c0] sm:$0xff]  ;;  %v1266_v47 = vld [vmem:[#allocation7 + $0x848] sm:$0xff] }
 0x212   : > { %v972_v12 = vor.u32 %v971_v20, %v970_v41  ;;  %v975_v37 = vshll.u32 %v974_v1, 23  ;;  %v1224_v41 = vld [vmem:[#allocation7 + $0x6f8] sm:$0xff]  ;;  %v3220_v1 = vpack.c.bf16 %v1211_v4, %v1205_v25  ;;  %v849_v25 = vadd.s32 %v4515_v31, %v4524_v36  ;;  %v1262_v31 = vld [vmem:[#allocation7 + $0x828] sm:$0xff] }
 0x213   : > { %v3222_v43 = vpack.c.bf16 %v1224_v41, %v1218_v24  ;;  %v865_v4 = vsub.s32 32, %v4636_v11  ;;  %v1241_v24 = vld [vmem:[#allocation7 + $0x780] sm:$0xff]  ;;  %v1260_v20 = vld [vmem:[#allocation7 + $0x818] sm:$0xff]  ;;  %v866_v36 = vshll.u32 %v4601_v59, %v4636_v11 }
 0x214   : > { %v976_v51 = vor.u32 4788187, %v975_v37  ;;  %v979_v39 = vcvt.s32.f32 %v972_v12  ;;  %v1225_v12 = vld [vmem:[#allocation7 + $0x700] sm:$0xff]  ;;  %v1230_v37 = vld [vmem:[#allocation7 + $0x728] sm:$0xff] }
 0x215   : > { %v3800_v62 = vpop.eup %3799  ;;  %v3226_v17 = vpack.c.bf16 %v1236_v44, %v1230_v37  ;;  %v1261_v44 = vld [vmem:[#allocation7 + $0x820] sm:$0xff] }
 0x216   : > { %v3802_v63 = vpop.eup %3801  ;;  %v789_v56 = vxor.u32 2147483648, %v3800_v62  ;;  %v977_v16 = vand.u32 2147483647, %v976_v51 }
 0x217   : > { %v786_v46 = vxor.u32 2147483648, %v3802_v63 }
 0x218   : > { %v790_v57 = vsel %vm788_vm2, %v789_v56, %v3802_v63  ;;  %v980_v23 = vmul.f32 %v979_v39, %v977_v16  ;;  %v1219_v63 = vld [vmem:[#allocation7 + $0x6d0] sm:$0xff]  ;;  %v1229_v39 = vld [vmem:[#allocation7 + $0x720] sm:$0xff]  ;;  %v1244_v16 = vld [vmem:[#allocation7 + $0x798] sm:$0xff] }
 0x219   : > { %v787_v49 = vsel %vm785_vm1, %v3800_v62, %v786_v46  ;;  %v1223_v62 = vld [vmem:[#allocation7 + $0x6f0] sm:$0xff]  ;;  %v869_v46 = vsub.s32 4294967266, %v4636_v11  ;;  %v3352_v51 = vpack.c.bf16 %v1225_v12, %v1219_v63  ;;  %v1253_v63 = vld [vmem:[#allocation7 + $0x7e0] sm:$0xff] }
 0x21a   : > { %v791_v22 = vsel %vm784_vm4, %v787_v49, %v790_v57  ;;  %v981_v50 = vxor.u32 2147483648, %v980_v23  ;;  %v3224_v2 = vpack.c.bf16 %v1223_v62, %v1217_v42  ;;  %v1235_v57 = vld [vmem:[#allocation7 + $0x750] sm:$0xff]  ;;  %v1237_v49 = vld [vmem:[#allocation7 + $0x760] sm:$0xff] }
 0x21b   : > { %v4627_v3 = vsel %vm781_vm6, nan, %v791_v22  ;;  %v1250_v22 = vld [vmem:[#allocation7 + $0x7c8] sm:$0xff]  ;;  %v3228_v9 = vpack.c.bf16 %v1235_v57, %v1229_v39  ;;  %v3356_v18 = vpack.c.bf16 %v1237_v49, %v1231_v0  ;;  %v1271_v0 = vld [vmem:[#allocation7 + $0x870] sm:$0xff] }
 0x21c   : > { %1481 = vmatprep.mubr.f32.mxu0 %v4627_v3  ;;  %1623 = vmatprep.mubr.f32.mxu1 %v4627_v3  ;;  %v982_v56 = vsel %vm899_vm8, %v981_v50, %v980_v23  ;;  %v1247_v23 = vld [vmem:[#allocation7 + $0x7b0] sm:$0xff]  ;;  %v3358_v41 = vpack.c.bf16 %v1250_v22, %v1244_v16  ;;  %v1254_v50 = vld [vmem:[#allocation7 + $0x7e8] sm:$0xff] }
 0x21d   : > { %1482 = vmatmul.mubr.f32.vlgmr.msra.gmra.mrb[2].mxu0 %v4632_v40  ;;  %1624 = vmatmul.mubr.f32.vlgmr.msra.gmra.mrb[2].mxu1 %v4632_v40  ;;  %v3234_v12 = vpack.c.bf16 %v1260_v20, %v1254_v50  ;;  %v1274_v39 = vld [vmem:[#allocation7 + $0x888] sm:$0xff]  ;;  %v1283_v50 = vld [vmem:[#allocation7 + $0x8d0] sm:$0xff] }
 0x21e   : > { %3217 = vmatpush1.bf16.msra.mxu0 %v3216_v48  ;;  %3345 = vmatpush1.bf16.msra.mxu1 %v3344_v14  ;;  %v985_v48 = vsel %vm4643_vm9, %v4385_v7, %v982_v56  ;;  %v1248_v14 = vld [vmem:[#allocation7 + $0x7b8] sm:$0xff]  ;;  %v1259_v56 = vld [vmem:[#allocation7 + $0x810] sm:$0xff]  ;;  %v1278_v16 = vld [vmem:[#allocation7 + $0x8a8] sm:$0xff] }
 0x21f   : > { %3219 = vmatprep.subr.bf16.mxu0 %v3218_v5  ;;  %3347 = vmatprep.subr.bf16.mxu1 %v3346_v6  ;;  %3803 = vcosq.f32 %v985_v48  ;;  %v870_v5 = vadd.s32 127, %v869_v46  ;;  %v990_v6 = vadd.s32 3, %v986_v60  ;;  %v3230_v54 = vpack.c.bf16 %v1248_v14, %v1242_v10  ;;  %v1267_v10 = vld [vmem:[#allocation7 + $0x850] sm:$0xff]  ;;  %v1273_v14 = vld [vmem:[#allocation7 + $0x880] sm:$0xff]  ;;  %v1296_v7 = vld [vmem:[#allocation7 + $0x938] sm:$0xff] }
 0x220   : > { %3805 = vsinq.f32 %v985_v48  ;;  %v3236_v60 = vpack.c.bf16 %v1259_v56, %v1253_v63 }
 0x221   : > { %v871_v42 = vshll.u32 %v870_v5, 23  ;;  %v991_v62 = vand.u32 3, %v990_v6  ;;  %v1284_v5 = vld [vmem:[#allocation7 + $0x8d8] sm:$0xff] }
 0x222   : > { %3221 = vmatpush1.bf16.msra.mxu0 %v3220_v1  ;;  %3349 = vmatpush1.bf16.msra.mxu1 %v3348_v55  ;;  %v1256_v1 = vld [vmem:[#allocation7 + $0x7f8] sm:$0xff]  ;;  %v867_v55 = vshrl.u32 %v849_v25, %v865_v4  ;;  %v3242_v20 = vpack.c.bf16 %v1284_v5, %v1278_v16  ;;  %v1322_v16 = vld [vmem:[#allocation7 + $0xa08] sm:$0xff] }
 0x223   : > { %3223 = vmatprep.subr.bf16.mxu0 %v3222_v43  ;;  %3351 = vmatprep.subr.bf16.mxu1 %v3350_v32  ;;  %v3232_v43 = vpack.c.bf16 %v1247_v23, %v1241_v24  ;;  %v3360_v32 = vpack.c.bf16 %v1249_v61, %v1243_v29  ;;  %v3362_v37 = vpack.c.bf16 %v1262_v31, %v1256_v1  ;;  %v872_v59 = vor.u32 4788187, %v871_v42  ;;  %v1280_v6 = vld [vmem:[#allocation7 + $0x8b8] sm:$0xff]  ;;  %v1277_v61 = vld [vmem:[#allocation7 + $0x8a0] sm:$0xff]  ;;  %v1279_v31 = vld [vmem:[#allocation7 + $0x8b0] sm:$0xff] }
 0x224   : > { %v868_v48 = vor.u32 %v867_v55, %v866_v36  ;;  %vm996_vm10 = vcmp.eq.s32.totalorder %v991_v62, 2  ;;  %vm993_vm11 = vcmp.eq.s32.totalorder %v991_v62, 0  ;;  %vm992_vm12 = vcmp.lt.s32.totalorder %v991_v62, 2  ;;  %v1285_v36 = vld [vmem:[#allocation7 + $0x8e0] sm:$0xff]  ;;  %v1290_v55 = vld [vmem:[#allocation7 + $0x908] sm:$0xff]  ;;  %v1292_v42 = vld [vmem:[#allocation7 + $0x918] sm:$0xff] }
 0x225   : > { %v873_v23 = vand.u32 2147483647, %v872_v59  ;;  %v3368_v29 = vpack.c.bf16 %v1273_v14, %v1267_v10  ;;  %v1298_v62 = vld [vmem:[#allocation7 + $0x948] sm:$0xff]  ;;  %v3372_v63 = vpack.c.bf16 %v1285_v36, %v1279_v31  ;;  %v3246_v56 = vpack.c.bf16 %v1296_v7, %v1290_v55  ;;  %v1320_v10 = vld [vmem:[#allocation7 + $0x9f8] sm:$0xff]  ;;  %v1325_v36 = vld [vmem:[#allocation7 + $0xa20] sm:$0xff] }
 0x226   : > { %3225 = vmatpush1.bf16.msra.mxu0 %v3224_v2  ;;  %3353 = vmatpush1.bf16.msra.mxu1 %v3352_v51  ;;  %v1272_v2 = vld [vmem:[#allocation7 + $0x878] sm:$0xff]  ;;  %v1310_v59 = vld [vmem:[#allocation7 + $0x9a8] sm:$0xff]  ;;  %v1331_v55 = vld [vmem:[#allocation7 + $0xa50] sm:$0xff] }
 0x227   : > { %3227 = vmatprep.subr.bf16.mxu0 %v3226_v17  ;;  %3355 = vmatprep.subr.bf16.mxu1 %v3354_v52  ;;  %v1268_v51 = vld [vmem:[#allocation7 + $0x858] sm:$0xff]  ;;  %v3364_v17 = vpack.c.bf16 %v1261_v44, %v1255_v28  ;;  %v1265_v52 = vld [vmem:[#allocation7 + $0x840] sm:$0xff]  ;;  %v3238_v25 = vpack.c.bf16 %v1272_v2, %v1266_v47  ;;  %v3374_v28 = vpack.c.bf16 %v1298_v62, %v1292_v42  ;;  %v1291_v44 = vld [vmem:[#allocation7 + $0x910] sm:$0xff] }
 0x228   : > { %v3366_v4 = vpack.c.bf16 %v1274_v39, %v1268_v51  ;;  %v1302_v47 = vld [vmem:[#allocation7 + $0x968] sm:$0xff]  ;;  %v1301_v39 = vld [vmem:[#allocation7 + $0x960] sm:$0xff]  ;;  %v1316_v14 = vld [vmem:[#allocation7 + $0x9d8] sm:$0xff] }
 0x229   : > { %v3804_v45 = vpop.eup %3803  ;;  %v1327_v62 = vld [vmem:[#allocation7 + $0xa30] sm:$0xff] }
 0x22a   : > { %3229 = vmatpush1.bf16.msra.mxu0 %v3228_v9  ;;  %3357 = vmatpush1.bf16.msra.mxu1 %v3356_v18  ;;  %v3806_v46 = vpop.eup %3805  ;;  %v997_v11 = vxor.u32 2147483648, %v3804_v45  ;;  %v1286_v9 = vld [vmem:[#allocation7 + $0x8e8] sm:$0xff]  ;;  %v875_v18 = vcvt.s32.f32 %v868_v48  ;;  %v1304_v48 = vld [vmem:[#allocation7 + $0x978] sm:$0xff] }
 0x22b   : > { %3231 = vmatprep.subr.bf16.mxu0 %v3230_v54  ;;  %3359 = vmatprep.subr.bf16.mxu1 %v3358_v41  ;;  %v994_v57 = vxor.u32 2147483648, %v3806_v46  ;;  %v3240_v41 = vpack.c.bf16 %v1271_v0, %v1265_v52  ;;  %v3370_v1 = vpack.c.bf16 %v1286_v9, %v1280_v6  ;;  %v1303_v52 = vld [vmem:[#allocation7 + $0x970] sm:$0xff]  ;;  %v1309_v0 = vld [vmem:[#allocation7 + $0x9a0] sm:$0xff] }
 0x22c   : > { %v998_v49 = vsel %vm996_vm10, %v997_v11, %v3806_v46  ;;  %v1308_v46 = vld [vmem:[#allocation7 + $0x998] sm:$0xff]  ;;  %v3380_v5 = vpack.c.bf16 %v1309_v0, %v1303_v52  ;;  %v1313_v6 = vld [vmem:[#allocation7 + $0x9c0] sm:$0xff]  ;;  %v1319_v9 = vld [vmem:[#allocation7 + $0x9f0] sm:$0xff] }
 0x22d   : > { %v995_v22 = vsel %vm993_vm11, %v3804_v45, %v994_v57  ;;  %v1297_v45 = vld [vmem:[#allocation7 + $0x940] sm:$0xff]  ;;  %v1307_v57 = vld [vmem:[#allocation7 + $0x990] sm:$0xff] }
 0x22e   : > { %3233 = vmatpush1.bf16.msra.mxu0 %v3232_v43  ;;  %3361 = vmatpush1.bf16.msra.mxu1 %v3360_v32  ;;  %v999_v24 = vsel %vm992_vm12, %v995_v22, %v998_v49  ;;  %v876_v43 = vmul.f32 %v875_v18, %v873_v23  ;;  %v3244_v32 = vpack.c.bf16 %v1283_v50, %v1277_v61  ;;  %v1314_v49 = vld [vmem:[#allocation7 + $0x9c8] sm:$0xff]  ;;  %v1315_v23 = vld [vmem:[#allocation7 + $0x9d0] sm:$0xff]  ;;  %v1328_v61 = vld [vmem:[#allocation7 + $0xa38] sm:$0xff] }
 0x22f   : > { %3235 = vmatprep.subr.bf16.mxu0 %v3234_v12  ;;  %3363 = vmatprep.subr.bf16.mxu1 %v3362_v37  ;;  %v4664_v54 = vsel %vm989_vm13, nan, %v999_v24  ;;  %v1289_v12 = vld [vmem:[#allocation7 + $0x900] sm:$0xff]  ;;  %v1295_v37 = vld [vmem:[#allocation7 + $0x930] sm:$0xff]  ;;  %v3376_v51 = vpack.c.bf16 %v1297_v45, %v1291_v44  ;;  %v3254_v18 = vpack.c.bf16 %v1320_v10, %v1314_v49  ;;  %v3382_v24 = vpack.c.bf16 %v1322_v16, %v1316_v14  ;;  %v1334_v50 = vld [vmem:[#allocation7 + $0xa68] sm:$0xff] }
 0x230   : > { %1552 = vmatprep.mubr.f32.mxu0 %v4664_v54  ;;  %1694 = vmatprep.mubr.f32.mxu1 %v4664_v54  ;;  %v877_v11 = vxor.u32 2147483648, %v876_v43  ;;  %v3248_v2 = vpack.c.bf16 %v1295_v37, %v1289_v12  ;;  %v3386_v42 = vpack.c.bf16 %v1334_v50, %v1328_v61  ;;  %v1344_v12 = vld [vmem:[#allocation7 + $0xab8] sm:$0xff]  ;;  %v1337_v45 = vld [vmem:[#allocation7 + $0xa80] sm:$0xff]  ;;  %v1355_v49 = vld [vmem:[#allocation7 + $0xb10] sm:$0xff] }
 0x231   : > { %v1340_v37 = vld [vmem:[#allocation7 + $0xa98] sm:$0xff]  ;;  %v1349_v0 = vld [vmem:[#allocation7 + $0xae0] sm:$0xff] }
 0x232   : > { %3237 = vmatpush1.bf16.msra.mxu0 %v3236_v60  ;;  %3365 = vmatpush1.bf16.msra.mxu1 %v3364_v17  ;;  %v3250_v60 = vpack.c.bf16 %v1308_v46, %v1302_v47  ;;  %v3378_v17 = vpack.c.bf16 %v1310_v59, %v1304_v48  ;;  %v1343_v47 = vld [vmem:[#allocation7 + $0xab0] sm:$0xff] }
 0x233   : > { %3239 = vmatprep.subr.bf16.mxu0 %v3238_v25  ;;  %3367 = vmatprep.subr.bf16.mxu1 %v3366_v4  ;;  %v878_v25 = vsel %vm795_vm14, %v877_v11, %v876_v43  ;;  %v3252_v4 = vpack.c.bf16 %v1307_v57, %v1301_v39  ;;  %v1333_v43 = vld [vmem:[#allocation7 + $0xa60] sm:$0xff]  ;;  %v1339_v59 = vld [vmem:[#allocation7 + $0xa90] sm:$0xff]  ;;  %v1356_v39 = vld [vmem:[#allocation7 + $0xb18] sm:$0xff] }
 0x234   : > { %v3388_v44 = vpack.c.bf16 %v1333_v43, %v1327_v62  ;;  %v1345_v11 = vld [vmem:[#allocation7 + $0xac0] sm:$0xff]  ;;  %v1352_v57 = vld [vmem:[#allocation7 + $0xaf8] sm:$0xff] }
 0x235   : > { %v3392_v52 = vpack.c.bf16 %v1345_v11, %v1339_v59 }
 0x236   : > { %3241 = vmatpush1.bf16.msra.mxu0 %v3240_v41  ;;  %3369 = vmatpush1.bf16.msra.mxu1 %v3368_v29  ;;  %v1321_v41 = vld [vmem:[#allocation7 + $0xa00] sm:$0xff]  ;;  %v1326_v29 = vld [vmem:[#allocation7 + $0xa28] sm:$0xff] }
 0x237   : > { %3243 = vmatprep.subr.bf16.mxu0 %v3242_v20  ;;  %3371 = vmatprep.subr.bf16.mxu1 %v3370_v1  ;;  %v881_v20 = vsel %vm4671_vm15, %v4372_v53, %v878_v25  ;;  %v3256_v1 = vpack.c.bf16 %v1319_v9, %v1313_v6  ;;  %v3384_v31 = vpack.c.bf16 %v1321_v41, %v1315_v23  ;;  %v1351_v25 = vld [vmem:[#allocation7 + $0xaf0] sm:$0xff]  ;;  %v1364_v6 = vld [vmem:[#allocation7 + $0xb58] sm:$0xff]  ;;  %v1370_v9 = vld [vmem:[#allocation7 + $0xb88] sm:$0xff] }
 0x238   : > { %v3258_v7 = vpack.c.bf16 %v1332_v13, %v1326_v29  ;;  %3807 = vcosq.f32 %v881_v20  ;;  %v3268_v23 = vpack.c.bf16 %v1355_v49, %v1349_v0  ;;  %v1361_v29 = vld [vmem:[#allocation7 + $0xb40] sm:$0xff]  ;;  %v1367_v13 = vld [vmem:[#allocation7 + $0xb70] sm:$0xff]  ;;  %v3398_v50 = vpack.c.bf16 %v1370_v9, %v1364_v6  ;;  %v1042_v9 = vld [vmem:[#allocation7 + $0x148] sm:$0xff] }
 0x239   : > { %3809 = vsinq.f32 %v881_v20  ;;  %v1363_v20 = vld [vmem:[#allocation7 + $0xb50] sm:$0xff]  ;;  %v3272_v62 = vpack.c.bf16 %v1367_v13, %v1361_v29  ;;  %v1029_v6 = vld [vmem:[#allocation7 + $0xe0] sm:$0xff]  ;;  %v1054_v13 = vld [vmem:[#allocation7 + $0x1a8] sm:$0xff] }
 0x23a   : > { %3245 = vmatpush1.bf16.msra.mxu0 %v3244_v32  ;;  %3373 = vmatpush1.bf16.msra.mxu1 %v3372_v63  ;;  %v1338_v32 = vld [vmem:[#allocation7 + $0xa88] sm:$0xff]  ;;  %v879_v63 = vsub.s32 4, %v4580_v15  ;;  %v1035_v53 = vld [vmem:[#allocation7 + $0x110] sm:$0xff] }
 0x23b   : > { %3247 = vmatprep.subr.bf16.mxu0 %v3246_v56  ;;  %3375 = vmatprep.subr.bf16.mxu1 %v3374_v28  ;;  %v1346_v56 = vld [vmem:[#allocation7 + $0xac8] sm:$0xff]  ;;  %v3260_v28 = vpack.c.bf16 %v1331_v55, %v1325_v36  ;;  %v3262_v46 = vpack.c.bf16 %v1344_v12, %v1338_v32  ;;  %v1380_v36 = vld [vmem:[#allocation7 + $0xbd8] sm:$0xff]  ;;  %v1373_v32 = vld [vmem:[#allocation7 + $0xba0] sm:$0xff] }
 0x23c   : > { %v3390_v48 = vpack.c.bf16 %v1346_v56, %v1340_v37  ;;  %v1376_v55 = vld [vmem:[#allocation7 + $0xbb8] sm:$0xff]  ;;  %v1047_v29 = vld [vmem:[#allocation7 + $0x170] sm:$0xff] }
 0x23e   : > { %3249 = vmatpush1.bf16.msra.mxu0 %v3248_v2  ;;  %3377 = vmatpush1.bf16.msra.mxu1 %v3376_v51  ;;  %v1350_v2 = vld [vmem:[#allocation7 + $0xae8] sm:$0xff]  ;;  %v880_v51 = vsel %vm795_vm14, %v879_v63, %v4580_v15  ;;  %v1368_v15 = vld [vmem:[#allocation7 + $0xb78] sm:$0xff]  ;;  %v1379_v63 = vld [vmem:[#allocation7 + $0xbd0] sm:$0xff] }
 0x23f   : > { %3251 = vmatprep.subr.bf16.mxu0 %v3250_v60  ;;  %3379 = vmatprep.subr.bf16.mxu1 %v3378_v17  ;;  %v1358_v60 = vld [vmem:[#allocation7 + $0xb28] sm:$0xff]  ;;  %v3264_v17 = vpack.c.bf16 %v1343_v47, %v1337_v45  ;;  %v882_v10 = vsel %vm4671_vm15, 0, %v880_v51  ;;  %v3266_v14 = vpack.c.bf16 %v1356_v39, %v1350_v2  ;;  %v1381_v45 = vld [vmem:[#allocation7 + $0xbe0] sm:$0xff] }
 0x240   : > { %v3394_v16 = vpack.c.bf16 %v1358_v60, %v1352_v57  ;;  %v1006_v47 = vld [vmem:[#allocation7 + $0x28] sm:$0xff]  ;;  %v1005_v39 = vld [vmem:[#allocation7 + $0x20] sm:$0xff]  ;;  %v1011_v57 = vld [vmem:[#allocation7 + $0x50] sm:$0xff] }
 0x241   : > { %v1018_v60 = vld [vmem:[#allocation7 + $0x88] sm:$0xff]  ;;  %v3408_v0 = vpack.c.bf16 %v1011_v57, %v1005_v39  ;;  %v1107_v39 = vld [vmem:[#allocation7 + $0x350] sm:$0xff] }
 0x242   : > { %3253 = vmatpush1.bf16.msra.mxu0 %v3252_v4  ;;  %3381 = vmatpush1.bf16.msra.mxu1 %v3380_v5  ;;  %v1357_v4 = vld [vmem:[#allocation7 + $0xb20] sm:$0xff]  ;;  %v1362_v5 = vld [vmem:[#allocation7 + $0xb48] sm:$0xff] }
 0x243   : > { %3255 = vmatprep.subr.bf16.mxu0 %v3254_v18  ;;  %3383 = vmatprep.subr.bf16.mxu1 %v3382_v24  ;;  %v886_v18 = vadd.s32 3, %v882_v10  ;;  %v3808_v24 = vpop.eup %3807  ;;  %v3396_v41 = vpack.c.bf16 %v1357_v4, %v1351_v25  ;;  %v3270_v61 = vpack.c.bf16 %v1368_v15, %v1362_v5  ;;  %v1017_v10 = vld [vmem:[#allocation7 + $0x80] sm:$0xff]  ;;  %v1030_v25 = vld [vmem:[#allocation7 + $0xe8] sm:$0xff]  ;;  %v1036_v4 = vld [vmem:[#allocation7 + $0x118] sm:$0xff] }
 0x244   : > { %v3810_v22 = vpop.eup %3809  ;;  %v893_v37 = vxor.u32 2147483648, %v3808_v24  ;;  %v3414_v15 = vpack.c.bf16 %v1036_v4, %v1030_v25  ;;  %v1114_v57 = vld [vmem:[#allocation7 + $0x388] sm:$0xff] }
 0x245   : > { %v890_v12 = vxor.u32 2147483648, %v3810_v22 }
 0x246   : > { %3257 = vmatpush1.bf16.msra.mxu0 %v3256_v1  ;;  %3385 = vmatpush1.bf16.msra.mxu1 %v3384_v31  ;;  %v1369_v1 = vld [vmem:[#allocation7 + $0xb80] sm:$0xff]  ;;  %v1374_v31 = vld [vmem:[#allocation7 + $0xba8] sm:$0xff] }
 0x247   : > { %3259 = vmatprep.subr.bf16.mxu0 %v3258_v7  ;;  %3387 = vmatprep.subr.bf16.mxu1 %v3386_v42  ;;  %v1382_v7 = vld [vmem:[#allocation7 + $0xbe8] sm:$0xff]  ;;  %v887_v42 = vand.u32 3, %v886_v18  ;;  %v3400_v43 = vpack.c.bf16 %v1369_v1, %v1363_v20  ;;  %v3274_v56 = vpack.c.bf16 %v1380_v36, %v1374_v31  ;;  %v1048_v18 = vld [vmem:[#allocation7 + $0x178] sm:$0xff]  ;;  %v1059_v20 = vld [vmem:[#allocation7 + $0x1d0] sm:$0xff] }
 0x248   : > { %v1066_v1 = vld [vmem:[#allocation7 + $0x208] sm:$0xff]  ;;  %v1072_v31 = vld [vmem:[#allocation7 + $0x238] sm:$0xff] }
 0x249   : > { %vm889_vm0 = vcmp.eq.s32.totalorder %v887_v42, 0  ;;  %vm892_vm1 = vcmp.eq.s32.totalorder %v887_v42, 2  ;;  %vm888_vm2 = vcmp.lt.s32.totalorder %v887_v42, 2  ;;  %v1071_v42 = vld [vmem:[#allocation7 + $0x230] sm:$0xff] }
 0x24a   : > { %3261 = vmatpush1.bf16.msra.mxu0 %v3260_v28  ;;  %3389 = vmatpush1.bf16.msra.mxu1 %v3388_v44  ;;  %v3402_v28 = vpack.c.bf16 %v1382_v7, %v1376_v55  ;;  %v1375_v44 = vld [vmem:[#allocation7 + $0xbb0] sm:$0xff]  ;;  %v891_v11 = vsel %vm889_vm0, %v3808_v24, %v890_v12  ;;  %v894_v2 = vsel %vm892_vm1, %v893_v37, %v3810_v22  ;;  %v1060_v22 = vld [vmem:[#allocation7 + $0x1d8] sm:$0xff]  ;;  %v1065_v7 = vld [vmem:[#allocation7 + $0x200] sm:$0xff] }
 0x24b   : > { %3263 = vmatprep.subr.bf16.mxu0 %v3262_v46  ;;  %3391 = vmatprep.subr.bf16.mxu1 %v3390_v48  ;;  %v1012_v46 = vld [vmem:[#allocation7 + $0x58] sm:$0xff]  ;;  %v3276_v48 = vpack.c.bf16 %v1379_v63, %v1373_v32  ;;  %v3404_v59 = vpack.c.bf16 %v1381_v45, %v1375_v44  ;;  %v3416_v24 = vpack.c.bf16 %v1035_v53, %v1029_v6  ;;  %v1077_v12 = vld [vmem:[#allocation7 + $0x260] sm:$0xff]  ;;  %v1083_v37 = vld [vmem:[#allocation7 + $0x290] sm:$0xff] }
 0x24c   : > { %v3406_v51 = vpack.c.bf16 %v1012_v46, %v1006_v47  ;;  %v3426_v55 = vpack.c.bf16 %v1072_v31, %v1066_v1  ;;  %v3428_v32 = vpack.c.bf16 %v1071_v42, %v1065_v7  ;;  %v3432_v44 = vpack.c.bf16 %v1083_v37, %v1077_v12  ;;  %v1089_v47 = vld [vmem:[#allocation7 + $0x2c0] sm:$0xff]  ;;  %v1095_v46 = vld [vmem:[#allocation7 + $0x2f0] sm:$0xff]  ;;  %v1138_v6 = vld [vmem:[#allocation7 + $0x448] sm:$0xff] }
 0x24d   : > { %v1144_v53 = vld [vmem:[#allocation7 + $0x478] sm:$0xff]  ;;  %v1174_v7 = vld [vmem:[#allocation7 + $0x568] sm:$0xff] }
 0x24e   : > { %3265 = vmatpush1.bf16.msra.mxu0 %v3264_v17  ;;  %3393 = vmatpush1.bf16.msra.mxu1 %v3392_v52  ;;  %v1024_v17 = vld [vmem:[#allocation7 + $0xb8] sm:$0xff]  ;;  %v895_v52 = vsel %vm888_vm2, %v891_v11, %v894_v2  ;;  %v3436_v11 = vpack.c.bf16 %v1095_v46, %v1089_v47  ;;  %v1186_v12 = vld [vmem:[#allocation7 + $0x5c8] sm:$0xff] }
 0x24f   : > { %3267 = vmatprep.subr.bf16.mxu0 %v3266_v14  ;;  %3395 = vmatprep.subr.bf16.mxu1 %v3394_v16  ;;  %v3410_v49 = vpack.c.bf16 %v1024_v17, %v1018_v60  ;;  %v1023_v14 = vld [vmem:[#allocation7 + $0xb0] sm:$0xff]  ;;  %v4687_v16 = vsel %vm885_vm3, nan, %v895_v52  ;;  %v1120_v60 = vld [vmem:[#allocation7 + $0x3b8] sm:$0xff]  ;;  %v1198_v47 = vld [vmem:[#allocation7 + $0x628] sm:$0xff] }
 0x250   : > { %v3412_v5 = vpack.c.bf16 %v1023_v14, %v1017_v10  ;;  %v3442_v52 = vpack.c.bf16 %v1120_v60, %v1114_v57  ;;  %v1126_v10 = vld [vmem:[#allocation7 + $0x3e8] sm:$0xff]  ;;  %v1132_v14 = vld [vmem:[#allocation7 + $0x418] sm:$0xff] }
 0x251   : > { %v3446_v4 = vpack.c.bf16 %v1132_v14, %v1126_v10  ;;  %v1180_v42 = vld [vmem:[#allocation7 + $0x598] sm:$0xff] }
 0x252   : > { %3269 = vmatpush1.bf16.msra.mxu0 %v3268_v23  ;;  %3397 = vmatpush1.bf16.msra.mxu1 %v3396_v41  ;;  %v3418_v23 = vpack.c.bf16 %v1048_v18, %v1042_v9  ;;  %v1041_v41 = vld [vmem:[#allocation7 + $0x140] sm:$0xff]  ;;  %v3450_v18 = vpack.c.bf16 %v1144_v53, %v1138_v6  ;;  %v1192_v37 = vld [vmem:[#allocation7 + $0x5f8] sm:$0xff] }
 0x253   : > { %3271 = vmatprep.subr.bf16.mxu0 %v3270_v61  ;;  %3399 = vmatprep.subr.bf16.mxu1 %v3398_v50  ;;  %v3420_v61 = vpack.c.bf16 %v1047_v29, %v1041_v41  ;;  %v3422_v50 = vpack.c.bf16 %v1060_v22, %v1054_v13  ;;  %v1150_v41 = vld [vmem:[#allocation7 + $0x4a8] sm:$0xff]  ;;  %v1156_v29 = vld [vmem:[#allocation7 + $0x4d8] sm:$0xff] }
 0x254   : > { %v3454_v22 = vpack.c.bf16 %v1156_v29, %v1150_v41  ;;  %v1204_v46 = vld [vmem:[#allocation7 + $0x658] sm:$0xff]  ;;  %v1251_v29 = vld [vmem:[#allocation7 + $0x7d0] sm:$0xff] }
 0x256   : > { %3273 = vmatpush1.bf16.msra.mxu0 %v3272_v62  ;;  %3401 = vmatpush1.bf16.msra.mxu1 %v3400_v43  ;;  %v1078_v62 = vld [vmem:[#allocation7 + $0x268] sm:$0xff]  ;;  %v1084_v43 = vld [vmem:[#allocation7 + $0x298] sm:$0xff] }
 0x257   : > { %3275 = vmatprep.subr.bf16.mxu0 %v3274_v56  ;;  %3403 = vmatprep.subr.bf16.mxu1 %v3402_v28  ;;  %v3430_v63 = vpack.c.bf16 %v1084_v43, %v1078_v62  ;;  %v1090_v56 = vld [vmem:[#allocation7 + $0x2c8] sm:$0xff]  ;;  %v1096_v28 = vld [vmem:[#allocation7 + $0x2f8] sm:$0xff]  ;;  %v3462_v43 = vpack.c.bf16 %v1180_v42, %v1174_v7  ;;  %v1269_v7 = vld [vmem:[#allocation7 + $0x860] sm:$0xff] }
 0x258   : > { %v3434_v45 = vpack.c.bf16 %v1096_v28, %v1090_v56  ;;  %v3466_v28 = vpack.c.bf16 %v1192_v37, %v1186_v12  ;;  %v1275_v42 = vld [vmem:[#allocation7 + $0x890] sm:$0xff]  ;;  %v1281_v12 = vld [vmem:[#allocation7 + $0x8c0] sm:$0xff] }
 0x259   : > { %v1287_v37 = vld [vmem:[#allocation7 + $0x8f0] sm:$0xff] }
 0x25a   : > { %3277 = vmatpush1.bf16.msra.mxu0 %v3276_v48  ;;  %3405 = vmatpush1.bf16.msra.mxu1 %v3404_v59  ;;  %v1102_v48 = vld [vmem:[#allocation7 + $0x328] sm:$0xff]  ;;  %v1108_v59 = vld [vmem:[#allocation7 + $0x358] sm:$0xff] }
 0x25b   : > { %3407 = vmatprep.subr.bf16.mxu0 %v3406_v51  ;;  %v3438_v2 = vpack.c.bf16 %v1108_v59, %v1102_v48  ;;  %v1101_v51 = vld [vmem:[#allocation7 + $0x320] sm:$0xff]  ;;  %v3470_v59 = vpack.c.bf16 %v1204_v46, %v1198_v47  ;;  %v1299_v46 = vld [vmem:[#allocation7 + $0x950] sm:$0xff] }
 0x25c   : > { %v3440_v17 = vpack.c.bf16 %v1107_v39, %v1101_v51  ;;  %v1210_v51 = vld [vmem:[#allocation7 + $0x688] sm:$0xff]  ;;  %v1216_v39 = vld [vmem:[#allocation7 + $0x6b8] sm:$0xff]  ;;  %v1293_v47 = vld [vmem:[#allocation7 + $0x920] sm:$0xff] }
 0x25d   : > { %1553 = vmatmul.mubr.f32.vlgmr.msra.gmra.mrb[2].mxu0 %v4687_v16  ;;  %1695 = vmatmul.mubr.f32.vlgmr.msra.gmra.mrb[2].mxu1 %v4687_v16  ;;  %v3474_v60 = vpack.c.bf16 %v1216_v39, %v1210_v51  ;;  %v1305_v51 = vld [vmem:[#allocation7 + $0x980] sm:$0xff]  ;;  %v1311_v39 = vld [vmem:[#allocation7 + $0x9b0] sm:$0xff] }
 0x25e   : > { %3409 = vmatpush1.bf16.msra.mxu0 %v3408_v0  ;;  %1765 = vmatprep.mubr.f32.mxu0 %v4627_v3  ;;  %v1053_v3 = vld [vmem:[#allocation7 + $0x1a0] sm:$0xff] }
 0x25f   : > { %3411 = vmatprep.subr.bf16.mxu0 %v3410_v49  ;;  %v3424_v36 = vpack.c.bf16 %v1059_v20, %v1053_v3  ;;  %v1113_v0 = vld [vmem:[#allocation7 + $0x380] sm:$0xff]  ;;  %v1119_v49 = vld [vmem:[#allocation7 + $0x3b0] sm:$0xff]  ;;  %v1162_v3 = vld [vmem:[#allocation7 + $0x508] sm:$0xff] }
 0x260   : > { %v3444_v25 = vpack.c.bf16 %v1119_v49, %v1113_v0  ;;  %v1168_v20 = vld [vmem:[#allocation7 + $0x538] sm:$0xff]  ;;  %v1222_v0 = vld [vmem:[#allocation7 + $0x6e8] sm:$0xff] }
 0x261   : > { %v3458_v31 = vpack.c.bf16 %v1168_v20, %v1162_v3  ;;  %v1228_v49 = vld [vmem:[#allocation7 + $0x718] sm:$0xff]  ;;  %v1257_v3 = vld [vmem:[#allocation7 + $0x800] sm:$0xff]  ;;  %v1263_v20 = vld [vmem:[#allocation7 + $0x830] sm:$0xff] }
 0x262   : > { %3413 = vmatpush1.bf16.msra.mxu0 %v3412_v5  ;;  %v1125_v5 = vld [vmem:[#allocation7 + $0x3e0] sm:$0xff]  ;;  %v3478_v14 = vpack.c.bf16 %v1228_v49, %v1222_v0  ;;  %v1323_v49 = vld [vmem:[#allocation7 + $0xa10] sm:$0xff] }
 0x263   : > { %3415 = vmatprep.subr.bf16.mxu0 %v3414_v15  ;;  %v1131_v15 = vld [vmem:[#allocation7 + $0x410] sm:$0xff]  ;;  %v1317_v0 = vld [vmem:[#allocation7 + $0x9e0] sm:$0xff] }
 0x264   : > { %v3448_v9 = vpack.c.bf16 %v1131_v15, %v1125_v5  ;;  %v1234_v5 = vld [vmem:[#allocation7 + $0x748] sm:$0xff]  ;;  %v1240_v15 = vld [vmem:[#allocation7 + $0x778] sm:$0xff] }
 0x265   : > { %v3482_v53 = vpack.c.bf16 %v1240_v15, %v1234_v5  ;;  %v1329_v5 = vld [vmem:[#allocation7 + $0xa40] sm:$0xff]  ;;  %v1335_v15 = vld [vmem:[#allocation7 + $0xa70] sm:$0xff] }
 0x266   : > { %3417 = vmatpush1.bf16.msra.mxu0 %v3416_v24  ;;  %v1137_v24 = vld [vmem:[#allocation7 + $0x440] sm:$0xff] }
 0x267   : > { %3419 = vmatprep.subr.bf16.mxu0 %v3418_v23  ;;  %v1143_v23 = vld [vmem:[#allocation7 + $0x470] sm:$0xff] }
 0x268   : > { %v3452_v13 = vpack.c.bf16 %v1143_v23, %v1137_v24  ;;  %v1246_v24 = vld [vmem:[#allocation7 + $0x7a8] sm:$0xff]  ;;  %v1252_v23 = vld [vmem:[#allocation7 + $0x7d8] sm:$0xff] }
 0x269   : > { %v3486_v41 = vpack.c.bf16 %v1252_v23, %v1246_v24  ;;  %v1341_v24 = vld [vmem:[#allocation7 + $0xaa0] sm:$0xff]  ;;  %v1347_v23 = vld [vmem:[#allocation7 + $0xad0] sm:$0xff] }
 0x26a   : > { %3421 = vmatpush1.bf16.msra.mxu0 %v3420_v61  ;;  %v1149_v61 = vld [vmem:[#allocation7 + $0x4a0] sm:$0xff] }
 0x26b   : > { %3423 = vmatprep.subr.bf16.mxu0 %v3422_v50  ;;  %v1155_v50 = vld [vmem:[#allocation7 + $0x4d0] sm:$0xff] }
 0x26c   : > { %v3456_v1 = vpack.c.bf16 %v1155_v50, %v1149_v61 }
 0x26e   : > { %3425 = vmatpush1.bf16.msra.mxu0 %v3424_v36  ;;  %v1161_v36 = vld [vmem:[#allocation7 + $0x500] sm:$0xff] }
 0x26f   : > { %3427 = vmatprep.subr.bf16.mxu0 %v3426_v55  ;;  %v1167_v55 = vld [vmem:[#allocation7 + $0x530] sm:$0xff] }
 0x270   : > { %v3460_v62 = vpack.c.bf16 %v1167_v55, %v1161_v36  ;;  %v3492_v36 = vpack.c.bf16 %v1263_v20, %v1257_v3 }
 0x272   : > { %3429 = vmatpush1.bf16.msra.mxu0 %v3428_v32  ;;  %v1173_v32 = vld [vmem:[#allocation7 + $0x560] sm:$0xff] }
 0x273   : > { %3431 = vmatprep.subr.bf16.mxu0 %v3430_v63  ;;  %v1179_v63 = vld [vmem:[#allocation7 + $0x590] sm:$0xff] }
 0x274   : > { %v3464_v56 = vpack.c.bf16 %v1179_v63, %v1173_v32  ;;  %v3496_v32 = vpack.c.bf16 %v1275_v42, %v1269_v7 }
 0x276   : > { %3433 = vmatpush1.bf16.msra.mxu0 %v3432_v44  ;;  %v1185_v44 = vld [vmem:[#allocation7 + $0x5c0] sm:$0xff] }
 0x277   : > { %3435 = vmatprep.subr.bf16.mxu0 %v3434_v45  ;;  %v1191_v45 = vld [vmem:[#allocation7 + $0x5f0] sm:$0xff] }
 0x278   : > { %v3468_v48 = vpack.c.bf16 %v1191_v45, %v1185_v44  ;;  %v3500_v44 = vpack.c.bf16 %v1287_v37, %v1281_v12  ;;  %v2484_v12 = vld [vmem:[#allocation10 + $0x88] sm:$0xff] }
 0x27a   : > { %3437 = vmatpush1.bf16.msra.mxu0 %v3436_v11  ;;  %v1197_v11 = vld [vmem:[#allocation7 + $0x620] sm:$0xff] }
 0x27b   : > { %3439 = vmatprep.subr.bf16.mxu0 %v3438_v2  ;;  %v1203_v2 = vld [vmem:[#allocation7 + $0x650] sm:$0xff] }
 0x27c   : > { %v3472_v57 = vpack.c.bf16 %v1203_v2, %v1197_v11  ;;  %v3504_v11 = vpack.c.bf16 %v1299_v46, %v1293_v47  ;;  %v2486_v47 = vld [vmem:[#allocation10 + $0x98] sm:$0xff] }
 0x27e   : > { %3441 = vmatpush1.bf16.msra.mxu0 %v3440_v17  ;;  %v1209_v17 = vld [vmem:[#allocation7 + $0x680] sm:$0xff] }
 0x27f   : > { %3443 = vmatprep.subr.bf16.mxu0 %v3442_v52  ;;  %v1215_v52 = vld [vmem:[#allocation7 + $0x6b0] sm:$0xff] }
 0x280   : > { %v3476_v10 = vpack.c.bf16 %v1215_v52, %v1209_v17  ;;  %v3508_v17 = vpack.c.bf16 %v1311_v39, %v1305_v51  ;;  %v2488_v51 = vld [vmem:[#allocation10 + $0xa8] sm:$0xff] }
 0x282   : > { %3445 = vmatpush1.bf16.msra.mxu0 %v3444_v25  ;;  %v1221_v25 = vld [vmem:[#allocation7 + $0x6e0] sm:$0xff] }
 0x283   : > { %3447 = vmatprep.subr.bf16.mxu0 %v3446_v4  ;;  %v1227_v4 = vld [vmem:[#allocation7 + $0x710] sm:$0xff] }
 0x284   : > { %v3480_v6 = vpack.c.bf16 %v1227_v4, %v1221_v25  ;;  %v3512_v25 = vpack.c.bf16 %v1323_v49, %v1317_v0  ;;  %v2473_v49 = vld [vmem:[#allocation10 + $0x30] sm:$0xff] }
 0x286   : > { %3449 = vmatpush1.bf16.msra.mxu0 %v3448_v9  ;;  %v1233_v9 = vld [vmem:[#allocation7 + $0x740] sm:$0xff] }
 0x287   : > { %3451 = vmatprep.subr.bf16.mxu0 %v3450_v18  ;;  %v1239_v18 = vld [vmem:[#allocation7 + $0x770] sm:$0xff] }
 0x28a   : > { %3453 = vmatpush1.bf16.msra.mxu0 %v3452_v13  ;;  %v1258_v13 = vld [vmem:[#allocation7 + $0x808] sm:$0xff] }
 0x28b   : > { %3455 = vmatprep.subr.bf16.mxu0 %v3454_v22  ;;  %v1264_v22 = vld [vmem:[#allocation7 + $0x838] sm:$0xff] }
 0x28c   : > { %v3490_v50 = vpack.c.bf16 %v1264_v22, %v1258_v13  ;;  %v1353_v13 = vld [vmem:[#allocation7 + $0xb00] sm:$0xff]  ;;  %v1359_v22 = vld [vmem:[#allocation7 + $0xb30] sm:$0xff] }
 0x28d   : > { %v3524_v3 = vpack.c.bf16 %v1359_v22, %v1353_v13  ;;  %v2479_v22 = vld [vmem:[#allocation10 + $0x60] sm:$0xff] }
 0x28e   : > { %3457 = vmatpush1.bf16.msra.mxu0 %v3456_v1  ;;  %v1270_v1 = vld [vmem:[#allocation7 + $0x868] sm:$0xff] }
 0x28f   : > { %3459 = vmatprep.subr.bf16.mxu0 %v3458_v31  ;;  %v1276_v31 = vld [vmem:[#allocation7 + $0x898] sm:$0xff] }
 0x290   : > { %v3494_v55 = vpack.c.bf16 %v1276_v31, %v1270_v1  ;;  %v1365_v1 = vld [vmem:[#allocation7 + $0xb60] sm:$0xff]  ;;  %v1371_v31 = vld [vmem:[#allocation7 + $0xb90] sm:$0xff] }
 0x291   : > { %v3528_v7 = vpack.c.bf16 %v1371_v31, %v1365_v1  ;;  %v4695_v1 = vld [vmem:[#allocation8] sm:$0x3f] }
 0x292   : > { %3461 = vmatpush1.bf16.msra.mxu0 %v3460_v62  ;;  %v1282_v62 = vld [vmem:[#allocation7 + $0x8c8] sm:$0xff] }
 0x293   : > { %3463 = vmatprep.subr.bf16.mxu0 %v3462_v43  ;;  %v1288_v43 = vld [vmem:[#allocation7 + $0x8f8] sm:$0xff] }
 0x294   : > { %v3498_v63 = vpack.c.bf16 %v1288_v43, %v1282_v62  ;;  %v1377_v62 = vld [vmem:[#allocation7 + $0xbc0] sm:$0xff]  ;;  %v1383_v43 = vld [vmem:[#allocation7 + $0xbf0] sm:$0xff] }
 0x296   : > { %3465 = vmatpush1.bf16.msra.mxu0 %v3464_v56  ;;  %v1294_v56 = vld [vmem:[#allocation7 + $0x928] sm:$0xff] }
 0x297   : > { %3467 = vmatprep.subr.bf16.mxu0 %v3466_v28  ;;  %v1300_v28 = vld [vmem:[#allocation7 + $0x958] sm:$0xff] }
 0x298   : > { %v3502_v45 = vpack.c.bf16 %v1300_v28, %v1294_v56  ;;  %v2467_v56 = vld [vmem:[#allocation10] sm:$0xff]  ;;  %v2468_v28 = vld [vmem:[#allocation10 + $0x8] sm:$0xff] }
 0x29a   : > { %3469 = vmatpush1.bf16.msra.mxu0 %v3468_v48  ;;  %v1306_v48 = vld [vmem:[#allocation7 + $0x988] sm:$0xff] }
 0x29b   : > { %3471 = vmatprep.subr.bf16.mxu0 %v3470_v59  ;;  %v1312_v59 = vld [vmem:[#allocation7 + $0x9b8] sm:$0xff] }
 0x29c   : > { %v3506_v2 = vpack.c.bf16 %v1312_v59, %v1306_v48  ;;  %v2469_v48 = vld [vmem:[#allocation10 + $0x10] sm:$0xff]  ;;  %v2470_v59 = vld [vmem:[#allocation10 + $0x18] sm:$0xff] }
 0x29d   : > { %1766 = vmatmul.mubr.f32.vlgmr.msra.gmra.mrb[4].mxu0 %v4632_v40  ;;  %v3484_v40 = vpack.c.bf16 %v1239_v18, %v1233_v9  ;;  %v3516_v9 = vpack.c.bf16 %v1335_v15, %v1329_v5  ;;  %v2475_v5 = vld [vmem:[#allocation10 + $0x40] sm:$0xff] }
 0x29e   : > { %3473 = vmatpush1.bf16.msra.mxu0 %v3472_v57  ;;  %1836 = vmatprep.mubr.f32.mxu0 %v4664_v54  ;;  %v1245_v54 = vld [vmem:[#allocation7 + $0x7a0] sm:$0xff]  ;;  %v1318_v57 = vld [vmem:[#allocation7 + $0x9e8] sm:$0xff] }
 0x29f   : > { %3475 = vmatprep.subr.bf16.mxu0 %v3474_v60  ;;  %v3488_v61 = vpack.c.bf16 %v1251_v29, %v1245_v54  ;;  %v1324_v60 = vld [vmem:[#allocation7 + $0xa18] sm:$0xff]  ;;  %v3520_v54 = vpack.c.bf16 %v1347_v23, %v1341_v24 }
 0x2a0   : > { %v3510_v52 = vpack.c.bf16 %v1324_v60, %v1318_v57  ;;  %v2472_v57 = vld [vmem:[#allocation10 + $0x28] sm:$0xff]  ;;  %v2477_v23 = vld [vmem:[#allocation10 + $0x50] sm:$0xff] }
 0x2a2   : > { %3477 = vmatpush1.bf16.msra.mxu0 %v3476_v10  ;;  %v1330_v10 = vld [vmem:[#allocation7 + $0xa48] sm:$0xff] }
 0x2a3   : > { %3479 = vmatprep.subr.bf16.mxu0 %v3478_v14  ;;  %v1336_v14 = vld [vmem:[#allocation7 + $0xa78] sm:$0xff] }
 0x2a4   : > { %v3514_v4 = vpack.c.bf16 %v1336_v14, %v1330_v10  ;;  %v2474_v10 = vld [vmem:[#allocation10 + $0x38] sm:$0xff] }
 0x2a5   : > { %v3548_v14 = vpack.c.bf16 %v2474_v10, %v2473_v49 }
 0x2a6   : > { %3481 = vmatpush1.bf16.msra.mxu0 %v3480_v6  ;;  %v1342_v6 = vld [vmem:[#allocation7 + $0xaa8] sm:$0xff] }
 0x2a7   : > { %3483 = vmatprep.subr.bf16.mxu0 %v3482_v53  ;;  %v1348_v53 = vld [vmem:[#allocation7 + $0xad8] sm:$0xff] }
 0x2a8   : > { %v3518_v18 = vpack.c.bf16 %v1348_v53, %v1342_v6  ;;  %v2476_v6 = vld [vmem:[#allocation10 + $0x48] sm:$0xff]  ;;  %v2493_v53 = vld [vmem:[#allocation10 + $0xd0] sm:$0xff] }
 0x2aa   : > { %3485 = vmatpush1.bf16.msra.mxu0 %v3484_v40  ;;  %v1354_v40 = vld [vmem:[#allocation7 + $0xb08] sm:$0xff] }
 0x2ab   : > { %3487 = vmatprep.subr.bf16.mxu0 %v3486_v41  ;;  %v1360_v41 = vld [vmem:[#allocation7 + $0xb38] sm:$0xff] }
 0x2ac   : > { %v3522_v29 = vpack.c.bf16 %v1360_v41, %v1354_v40  ;;  %v2478_v40 = vld [vmem:[#allocation10 + $0x58] sm:$0xff]  ;;  %v2495_v41 = vld [vmem:[#allocation10 + $0xe0] sm:$0xff] }
 0x2ae   : > { %3489 = vmatpush1.bf16.msra.mxu0 %v3488_v61  ;;  %v1366_v61 = vld [vmem:[#allocation7 + $0xb68] sm:$0xff] }
 0x2af   : > { %3491 = vmatprep.subr.bf16.mxu0 %v3490_v50  ;;  %v1372_v50 = vld [vmem:[#allocation7 + $0xb98] sm:$0xff] }
 0x2b0   : > { %v3526_v20 = vpack.c.bf16 %v1372_v50, %v1366_v61  ;;  %v2480_v61 = vld [vmem:[#allocation10 + $0x68] sm:$0xff]  ;;  %v2497_v50 = vld [vmem:[#allocation10 + $0xf0] sm:$0xff] }
 0x2b2   : > { %3493 = vmatpush1.bf16.msra.mxu0 %v3492_v36  ;;  %v1378_v36 = vld [vmem:[#allocation7 + $0xbc8] sm:$0xff] }
 0x2b3   : > { %3495 = vmatprep.subr.bf16.mxu0 %v3494_v55  ;;  %v1384_v55 = vld [vmem:[#allocation7 + $0xbf8] sm:$0xff] }
 0x2b4   : > { %v3530_v42 = vpack.c.bf16 %v1384_v55, %v1378_v36  ;;  %v2481_v36 = vld [vmem:[#allocation10 + $0x70] sm:$0xff]  ;;  %v2482_v55 = vld [vmem:[#allocation10 + $0x78] sm:$0xff] }
 0x2b6   : > { %3497 = vmatpush1.bf16.msra.mxu0 %v3496_v32  ;;  %v3532_v32 = vpack.c.bf16 %v1383_v43, %v1377_v62  ;;  %v1390_v62 = vrot.slane %v4695_v1, %v425_v27  ;;  %v1398_v43 = vrot.slane %v4695_v1, %v433_v33 }
 0x2b7   : > { %3499 = vmatprep.subr.bf16.mxu0 %v3498_v63  ;;  %v2483_v63 = vld [vmem:[#allocation10 + $0x80] sm:$0xff] }
 0x2b8   : > { %v3534_v37 = vpack.c.bf16 %v2484_v12, %v2483_v63  ;;  %v1394_v63 = vrot.slane %v4695_v1, %v429_v34 }
 0x2ba   : > { %3501 = vmatpush1.bf16.msra.mxu0 %v3500_v44  ;;  %v3536_v44 = vpack.c.bf16 %v2468_v28, %v2467_v56  ;;  %3535 = vmatprep.subr.bf16.mxu1 %v3534_v37  ;;  %v1402_v28 = vrot.slane %v4695_v1, %v437_v58 }
 0x2bb   : > { %3503 = vmatprep.subr.bf16.mxu0 %v3502_v45  ;;  %v2485_v45 = vld [vmem:[#allocation10 + $0x90] sm:$0xff] }
 0x2bc   : > { %3537 = vmatpush3.bf16.msra.mxu1 %v3536_v44  ;;  %v3538_v46 = vpack.c.bf16 %v2486_v47, %v2485_v45 }
 0x2be   : > { %3505 = vmatpush1.bf16.msra.mxu0 %v3504_v11  ;;  %v3540_v11 = vpack.c.bf16 %v2470_v59, %v2469_v48  ;;  %3539 = vmatprep.subr.bf16.mxu1 %v3538_v46 }
 0x2bf   : > { %3507 = vmatprep.subr.bf16.mxu0 %v3506_v2  ;;  %v2487_v2 = vld [vmem:[#allocation10 + $0xa0] sm:$0xff] }
 0x2c0   : > { %3541 = vmatpush3.bf16.msra.mxu1 %v3540_v11  ;;  %v3542_v39 = vpack.c.bf16 %v2488_v51, %v2487_v2 }
 0x2c2   : > { %3509 = vmatpush1.bf16.msra.mxu0 %v3508_v17  ;;  %3543 = vmatprep.subr.bf16.mxu1 %v3542_v39  ;;  %v2489_v17 = vld [vmem:[#allocation10 + $0xb0] sm:$0xff] }
 0x2c3   : > { %3511 = vmatprep.subr.bf16.mxu0 %v3510_v52  ;;  %v2490_v52 = vld [vmem:[#allocation10 + $0xb8] sm:$0xff] }
 0x2c4   : > { %v3546_v0 = vpack.c.bf16 %v2490_v52, %v2489_v17 }
 0x2c6   : > { %3513 = vmatpush1.bf16.msra.mxu0 %v3512_v25  ;;  %v2491_v25 = vld [vmem:[#allocation10 + $0xc0] sm:$0xff] }
 0x2c7   : > { %3515 = vmatprep.subr.bf16.mxu0 %v3514_v4  ;;  %v2492_v4 = vld [vmem:[#allocation10 + $0xc8] sm:$0xff] }
 0x2c8   : > { %v3550_v15 = vpack.c.bf16 %v2492_v4, %v2491_v25 }
 0x2ca   : > { %3517 = vmatpush1.bf16.msra.mxu0 %v3516_v9  ;;  %v2494_v9 = vld [vmem:[#allocation10 + $0xd8] sm:$0xff] }
 0x2cb   : > { %3519 = vmatprep.subr.bf16.mxu0 %v3518_v18  ;;  %v3552_v18 = vpack.c.bf16 %v2476_v6, %v2475_v5  ;;  %v3554_v24 = vpack.c.bf16 %v2494_v9, %v2493_v53 }
 0x2ce   : > { %3521 = vmatpush1.bf16.msra.mxu0 %v3520_v54  ;;  %v2496_v54 = vld [vmem:[#allocation10 + $0xe8] sm:$0xff] }
 0x2cf   : > { %3523 = vmatprep.subr.bf16.mxu0 %v3522_v29  ;;  %v3556_v29 = vpack.c.bf16 %v2478_v40, %v2477_v23  ;;  %v3558_v13 = vpack.c.bf16 %v2496_v54, %v2495_v41 }
 0x2d2   : > { %3525 = vmatpush1.bf16.msra.mxu0 %v3524_v3  ;;  %v2498_v3 = vld [vmem:[#allocation10 + $0xf8] sm:$0xff] }
 0x2d3   : > { %3527 = vmatprep.subr.bf16.mxu0 %v3526_v20  ;;  %v3560_v20 = vpack.c.bf16 %v2480_v61, %v2479_v22  ;;  %v3562_v31 = vpack.c.bf16 %v2498_v3, %v2497_v50 }
 0x2d6   : > { %3529 = vmatpush1.bf16.msra.mxu0 %v3528_v7  ;;  %v2515_v7 = vld [vmem:[#allocation10 + $0x180] sm:$0xff] }
 0x2d7   : > { %3531 = vmatprep.subr.bf16.mxu0 %v3530_v42  ;;  %v2516_v42 = vld [vmem:[#allocation10 + $0x188] sm:$0xff] }
 0x2d8   : > { %v3566_v12 = vpack.c.bf16 %v2516_v42, %v2515_v7 }
 0x2da   : > { %3533 = vmatpush1.bf16.msra.mxu0 %v3532_v32  ;;  %v3564_v32 = vpack.c.bf16 %v2482_v55, %v2481_v36 }
 0x2dd   : > { %1837 = vmatmul.mubr.f32.vlgmr.msra.gmra.mrb[4].mxu0 %v4687_v16  ;;  %v2471_v16 = vld [vmem:[#allocation10 + $0x20] sm:$0xff] }
 0x2de   : > { %v3544_v60 = vpack.c.bf16 %v2472_v57, %v2471_v16 }
 0x2e0   : > { %3545 = vmatpush3.bf16.msra.mxu1 %v3544_v60 }
 0x2e1   : > { %3547 = vmatprep.subr.bf16.mxu1 %v3546_v0 }
 0x2e4   : > { %3549 = vmatpush3.bf16.msra.mxu1 %v3548_v14 }
 0x2e5   : > { %3551 = vmatprep.subr.bf16.mxu1 %v3550_v15 }
 0x2e8   : > { %3553 = vmatpush3.bf16.msra.mxu1 %v3552_v18 }
 0x2e9   : > { %3555 = vmatprep.subr.bf16.mxu1 %v3554_v24 }
 0x2ec   : > { %3557 = vmatpush3.bf16.msra.mxu1 %v3556_v29 }
 0x2ed   : > { %3559 = vmatprep.subr.bf16.mxu1 %v3558_v13 }
 0x2f0   : > { %3561 = vmatpush3.bf16.msra.mxu1 %v3560_v20 }
 0x2f1   : > { %3563 = vmatprep.subr.bf16.mxu1 %v3562_v31 }
 0x2f4   : > { %3565 = vmatpush3.bf16.msra.mxu1 %v3564_v32 }
 0x2f5   : > { %3567 = vmatprep.subr.bf16.mxu1 %v3566_v12 }
 0x330   : > { %v1554_v37 = vpop.f32.mrb[2].mxu0  ;;  %v1696_v56 = vpop.f32.mrb[2].mxu1 }
 0x331   : > { %v4709_v44 = vadd.f32 %v1554_v37, %v1390_v62  ;;  %v4711_v27 = vadd.f32 %v1696_v56, %v1398_v43  ;;  %v1556_v45 = vpop.f32.mrb[3].mxu0  ;;  %v1698_v33 = vpop.f32.mrb[3].mxu1 }
 0x332   : > { %v4713_v47 = vadd.f32 %v1556_v45, %v1394_v63  ;;  %v4720_v11 = vadd.f32 %v1698_v33, %v1402_v28 }
 0x333   : > { %v1843_v34 = vand.u32 2147483647, %v4709_v44  ;;  %v1846_v46 = vand.u32 2139095040, %v4709_v44  ;;  %v2051_v48 = vand.u32 2147483647, %v4711_v27  ;;  %v2054_v59 = vand.u32 2139095040, %v4711_v27 }
 0x334   : > { %v1947_v58 = vand.u32 2147483647, %v4713_v47  ;;  %v1950_v39 = vand.u32 2139095040, %v4713_v47  ;;  %v2158_v10 = vand.u32 2139095040, %v4720_v11 }
 0x335   : > { %v1847_v2 = vshrl.u32 %v1846_v46, 23  ;;  %v1850_v51 = vand.u32 8388607, %v1843_v34  ;;  %v2055_v16 = vshrl.u32 %v2054_v59, 23  ;;  %v2058_v57 = vand.u32 8388607, %v2051_v48 }
 0x336   : > { %v1951_v17 = vshrl.u32 %v1950_v39, 23  ;;  %v4729_v49 = vand.u32 8388607, %v1947_v58  ;;  %v2159_v15 = vshrl.u32 %v2158_v10, 23 }
 0x337   : > { %v2952_v60 = vadd.s32 4294967169, %v1847_v2  ;;  %v1851_v52 = vor.u32 8388608, %v1850_v51  ;;  %v2960_v0 = vadd.s32 4294967169, %v2055_v16  ;;  %v2059_v4 = vor.u32 8388608, %v2058_v57 }
 0x338   : > { %v2956_v25 = vadd.s32 4294967169, %v1951_v17  ;;  %v1955_v18 = vor.u32 8388608, %v4729_v49  ;;  %v4739_v13 = vadd.s32 4294967169, %v2159_v15 }
 0x339   : > { %v1853_v14 = vadd.s32 1, %v2952_v60  ;;  %v2061_v5 = vadd.s32 1, %v2960_v0  ;;  %v4732_v9 = vshll.u32 %v1851_v52, 8  ;;  %v4737_v29 = vshll.u32 %v2059_v4, 8 }
 0x33a   : > { %v1957_v6 = vadd.s32 1, %v2956_v25 }
 0x33b   : > { %vm1854_vm4 = vcmp.gt.s32.totalorder %v1853_v14, 0  ;;  %vm2062_vm5 = vcmp.gt.s32.totalorder %v2061_v5, 0 }
 0x33c   : > { %v1855_v53 = vsel %vm1854_vm4, %v1853_v14, 0  ;;  %v2063_v40 = vsel %vm2062_vm5, %v2061_v5, 0  ;;  %vm1958_vm6 = vcmp.gt.s32.totalorder %v1957_v6, 0 }
 0x33d   : > { %v1856_v24 = vshrl.u32 %v1855_v53, 5  ;;  %v1857_v23 = vand.u32 31, %v1855_v53  ;;  %v4735_v41 = vshrl.u32 %v2063_v40, 5  ;;  %v2065_v54 = vand.u32 31, %v2063_v40 }
 0x33e   : > { %v4743_v3 = vsel %vm1958_vm6, %v1957_v6, 0 }
 0x33f   : > { %v1858_v22 = vsub.s32 32, %v1857_v23  ;;  %v1860_v61 = vshll.u32 %v4098_v19, %v1857_v23  ;;  %v1863_v50 = vshll.u32 %v4099_v21, %v1857_v23  ;;  %v1866_v20 = vshll.u32 %v4100_v26, %v1857_v23 }
 0x340   : > { %v1869_v31 = vshll.u32 %v4101_v30, %v1857_v23  ;;  %v1872_v36 = vshll.u32 %v4102_v35, %v1857_v23  ;;  %vm1875_vm7 = vcmp.lt.s32.totalorder %v1856_v24, 1  ;;  %vm1876_vm8 = vcmp.lt.s32.totalorder %v1856_v24, 2 }
 0x341   : > { %v1861_v55 = vshrl.u32 %v4099_v21, %v1858_v22  ;;  %v1864_v7 = vshrl.u32 %v4100_v26, %v1858_v22  ;;  %v1867_v42 = vshrl.u32 %v4101_v30, %v1858_v22  ;;  %v1859_v62 = vshrl.u32 %v4098_v19, %v1858_v22 }
 0x342   : > { %v1870_v43 = vshrl.u32 %v4102_v35, %v1858_v22  ;;  %v1873_v32 = vshrl.u32 %v4103_v38, %v1858_v22  ;;  %vm1877_vm9 = vcmp.lt.s32.totalorder %v1856_v24, 3  ;;  %v2066_v56 = vsub.s32 32, %v2065_v54 }
 0x343   : > { %v1862_v63 = vor.u32 %v1861_v55, %v1860_v61  ;;  %v1865_v12 = vor.u32 %v1864_v7, %v1863_v50  ;;  %v1868_v37 = vor.u32 %v1867_v42, %v1866_v20  ;;  %vm1878_vm10 = vcmp.lt.s32.totalorder %v1856_v24, 4 }
 0x344   : > { %v1871_v28 = vor.u32 %v1870_v43, %v1869_v31  ;;  %v1874_v45 = vor.u32 %v1873_v32, %v1872_v36  ;;  %v2068_v33 = vshll.u32 %v4098_v19, %v2065_v54  ;;  %v2071_v60 = vshll.u32 %v4099_v21, %v2065_v54 }
 0x345   : > { %v1879_v46 = vsel %vm1875_vm7, %v1859_v62, %v1862_v63  ;;  %v1880_v59 = vsel %vm1878_vm10, %v1868_v37, 2102212464  ;;  %v1883_v2 = vsel %vm1875_vm7, %v1862_v63, %v1865_v12  ;;  %v1887_v51 = vsel %vm1875_vm7, %v1865_v12, %v1868_v37 }
 0x346   : > { %v1881_v39 = vsel %vm1877_vm9, %v1865_v12, %v1880_v59  ;;  %v1884_v16 = vsel %vm1878_vm10, %v1871_v28, 920167782  ;;  %v1888_v57 = vsel %vm1878_vm10, %v1874_v45, 1326507024  ;;  %v2067_v0 = vshrl.u32 %v4098_v19, %v2066_v56 }
 0x347   : > { %v1885_v17 = vsel %vm1877_vm9, %v1868_v37, %v1884_v16  ;;  %v1889_v52 = vsel %vm1877_vm9, %v1871_v28, %v1888_v57  ;;  %v2069_v10 = vshrl.u32 %v4099_v21, %v2066_v56  ;;  %v1882_v14 = vsel %vm1876_vm8, %v1879_v46, %v1881_v39 }
 0x348   : > { %v1886_v25 = vsel %vm1876_vm8, %v1883_v2, %v1885_v17  ;;  %v1890_v4 = vsel %vm1876_vm8, %v1887_v51, %v1889_v52  ;;  %v2072_v5 = vshrl.u32 %v4100_v26, %v2066_v56  ;;  %v2074_v61 = vshll.u32 %v4100_v26, %v2065_v54 }
 0x349   : > { %v4769_v15 = vmul.u32.u64.low %v4732_v9, %v1890_v4  ;;  %v4770_v6 = vmul.u32.u64.high %v4732_v9, %v1890_v4, %v4769_v15  ;;  %v4773_v53 = vmul.u32.u64.low %v4732_v9, %v1886_v25  ;;  %v4774_v23 = vmul.u32.u64.high %v4732_v9, %v1886_v25, %v4773_v53 }
 0x34a   : > { %v2070_v40 = vor.u32 %v2069_v10, %v2068_v33  ;;  %v2073_v22 = vor.u32 %v2072_v5, %v2071_v60  ;;  %v2075_v50 = vshrl.u32 %v4101_v30, %v2066_v56  ;;  %v1898_v24 = vmul.u32 %v4732_v9, %v1882_v14 }
 0x34b   : > { %v2077_v20 = vshll.u32 %v4101_v30, %v2065_v54  ;;  %v2078_v31 = vshrl.u32 %v4102_v35, %v2066_v56  ;;  %v2081_v36 = vshrl.u32 %v4103_v38, %v2066_v56  ;;  %v2080_v7 = vshll.u32 %v4102_v35, %v2065_v54 }
 0x34c   : > { %v2076_v55 = vor.u32 %v2075_v50, %v2074_v61  ;;  %vm2083_vm11 = vcmp.lt.s32.totalorder %v4735_v41, 1  ;;  %vm2084_vm12 = vcmp.lt.s32.totalorder %v4735_v41, 2  ;;  %vm1900_vm13 = vc.u32 %v4770_v6, %v4773_v53 }
 0x34d   : > { %v1901_v42 = vadd.s32 1, %v4774_v23  ;;  %v2079_v62 = vor.u32 %v2078_v31, %v2077_v20  ;;  %vm2085_vm14 = vcmp.lt.s32.totalorder %v4735_v41, 3  ;;  %v2082_v9 = vor.u32 %v2081_v36, %v2080_v7 }
 0x34e   : > { %vm2086_vm15 = vcmp.lt.s32.totalorder %v4735_v41, 4  ;;  %v2087_v43 = vsel %vm2083_vm11, %v2067_v0, %v2070_v40  ;;  %v2091_v32 = vsel %vm2083_vm11, %v2070_v40, %v2073_v22  ;;  %v2095_v37 = vsel %vm2083_vm11, %v2073_v22, %v2076_v55 }
 0x34f   : > { %v1902_v63 = vsel %vm1900_vm13, %v1901_v42, %v4774_v23  ;;  %v2088_v54 = vsel %vm2086_vm15, %v2076_v55, 2102212464  ;;  %v2092_v12 = vsel %vm2086_vm15, %v2079_v62, 920167782  ;;  %v2096_v33 = vsel %vm2086_vm15, %v2082_v9, 1326507024 }
 0x350   : > { %v1903_v56 = vadd.s32 %v1902_v63, %v1898_v24  ;;  %v2089_v28 = vsel %vm2085_vm14, %v2073_v22, %v2088_v54  ;;  %v2093_v45 = vsel %vm2085_vm14, %v2076_v55, %v2092_v12  ;;  %v2097_v2 = vsel %vm2085_vm14, %v2079_v62, %v2096_v33 }
 0x351   : > { %v2090_v46 = vsel %vm2084_vm12, %v2087_v43, %v2089_v28  ;;  %v2094_v59 = vsel %vm2084_vm12, %v2091_v32, %v2093_v45  ;;  %v4797_v51 = vshrl.u32 %v4743_v3, 5  ;;  %v2098_v16 = vsel %vm2084_vm12, %v2095_v37, %v2097_v2 }
 0x352   : > { %v1904_v39 = vadd.s32 536870912, %v1903_v56  ;;  %v4802_v57 = vmul.u32.u64.low %v4737_v29, %v2094_v59  ;;  %v4803_v60 = vmul.u32.u64.high %v4737_v29, %v2094_v59, %v4802_v57  ;;  %v1961_v0 = vand.u32 31, %v4743_v3 }
 0x353   : > { %v4807_v17 = vmul.u32.u64.low %v4737_v29, %v2098_v16  ;;  %v4808_v52 = vmul.u32.u64.high %v4737_v29, %v2098_v16, %v4807_v17  ;;  %v4815_v14 = vshll.u32 %v1955_v18, 8  ;;  %v2165_v41 = vadd.s32 1, %v4739_v13 }
 0x354   : > { %v4811_v10 = vshrl.u32 %v1904_v39, 30  ;;  %v2106_v25 = vmul.u32 %v4737_v29, %v2090_v46  ;;  %v1962_v4 = vsub.s32 32, %v1961_v0  ;;  %v1964_v5 = vshll.u32 %v4098_v19, %v1961_v0 }
 0x355   : > { %vm1979_vm0 = vcmp.lt.s32.totalorder %v4797_v51, 1  ;;  %v2109_v23 = vadd.s32 1, %v4803_v60  ;;  %v1967_v3 = vshll.u32 %v4099_v21, %v1961_v0  ;;  %v1970_v40 = vshll.u32 %v4100_v26, %v1961_v0 }
 0x356   : > { %v1906_v15 = vshll.u32 %v4811_v10, 30  ;;  %vm2108_vm1 = vc.u32 %v4808_v52, %v4802_v57  ;;  %v1965_v49 = vshrl.u32 %v4099_v21, %v1962_v4  ;;  %v1973_v18 = vshll.u32 %v4101_v30, %v1961_v0 }
 0x357   : > { %v1976_v29 = vshll.u32 %v4102_v35, %v1961_v0  ;;  %v2110_v22 = vsel %vm2108_vm1, %v2109_v23, %v4803_v60  ;;  %v1968_v61 = vshrl.u32 %v4100_v26, %v1962_v4  ;;  %v1971_v50 = vshrl.u32 %v4101_v30, %v1962_v4 }
 0x358   : > { %v4830_v13 = vsub.s32 %v1903_v56, %v1906_v15  ;;  %v2111_v24 = vadd.s32 %v2110_v22, %v2106_v25  ;;  %v1966_v20 = vor.u32 %v1965_v49, %v1964_v5  ;;  %v1974_v31 = vshrl.u32 %v4102_v35, %v1962_v4 }
 0x359   : > { %v1977_v36 = vshrl.u32 %v4103_v38, %v1962_v4  ;;  %v1969_v7 = vor.u32 %v1968_v61, %v1967_v3  ;;  %v1972_v42 = vor.u32 %v1971_v50, %v1970_v40  ;;  %vm1981_vm2 = vcmp.lt.s32.totalorder %v4797_v51, 3 }
 0x35a   : > { %v1909_v55 = vsub.s32 0, %v4830_v13  ;;  %v2112_v62 = vadd.s32 536870912, %v2111_v24  ;;  %v1975_v9 = vor.u32 %v1974_v31, %v1973_v18  ;;  %vm1982_vm3 = vcmp.lt.s32.totalorder %v4797_v51, 4 }
 0x35b   : > { %v1978_v43 = vor.u32 %v1977_v36, %v1976_v29  ;;  %v1984_v63 = vsel %vm1982_vm3, %v1972_v42, 2102212464  ;;  %v1987_v54 = vsel %vm1979_vm0, %v1966_v20, %v1969_v7  ;;  %v1991_v12 = vsel %vm1979_vm0, %v1969_v7, %v1972_v42 }
 0x35c   : > { %v2953_v32 = vmin.u32 %v1909_v55, %v4830_v13  ;;  %v4845_v37 = vshrl.u32 %v2112_v62, 30  ;;  %v1963_v56 = vshrl.u32 %v4098_v19, %v1962_v4  ;;  %v1988_v28 = vsel %vm1982_vm3, %v1975_v9, 920167782 }
 0x35d   : > { %v1992_v45 = vsel %vm1982_vm3, %v1978_v43, 1326507024  ;;  %vm1980_vm4 = vcmp.lt.s32.totalorder %v4797_v51, 2  ;;  %v1989_v46 = vsel %vm1981_vm2, %v1972_v42, %v1988_v28  ;;  %v1985_v39 = vsel %vm1981_vm2, %v1969_v7, %v1984_v63 }
 0x35e   : > { %v1911_v33 = vclz %v2953_v32  ;;  %v1993_v59 = vsel %vm1981_vm2, %v1975_v9, %v1992_v45  ;;  %v1983_v2 = vsel %vm1979_vm0, %v1963_v56, %v1966_v20  ;;  %v1990_v16 = vsel %vm1980_vm4, %v1987_v54, %v1989_v46 }
 0x35f   : > { %v1994_v60 = vsel %vm1980_vm4, %v1991_v12, %v1993_v59  ;;  %vm2166_vm5 = vcmp.gt.s32.totalorder %v2165_v41, 0  ;;  %v2114_v4 = vshll.u32 %v4845_v37, 30  ;;  %v2155_v3 = vand.u32 2147483647, %v4720_v11 }
 0x360   : > { %v2954_v17 = vadd.s32 4294967294, %v1911_v33  ;;  %v4862_v0 = vmul.u32.u64.low %v4815_v14, %v1994_v60  ;;  %v4863_v25 = vmul.u32.u64.high %v4815_v14, %v1994_v60, %v4862_v0  ;;  %v2167_v23 = vsel %vm2166_vm5, %v2165_v41, 0 }
 0x361   : > { %v4867_v5 = vmul.u32.u64.low %v4815_v14, %v1990_v16  ;;  %v4868_v15 = vmul.u32.u64.high %v4815_v14, %v1990_v16, %v4867_v5  ;;  %v1986_v49 = vsel %vm1980_vm4, %v1983_v2, %v1985_v39  ;;  %v2169_v18 = vand.u32 31, %v2167_v23 }
 0x362   : > { %vm2955_vm6 = vcmp.lt.s32.totalorder %v2954_v17, 0  ;;  %v4874_v22 = vsub.s32 %v2111_v24, %v2114_v4  ;;  %v2002_v20 = vmul.u32 %v4815_v14, %v1986_v49  ;;  %v2162_v41 = vand.u32 8388607, %v2155_v3 }
 0x363   : > { %v1914_v40 = vsel %vm2955_vm6, 0, %v2954_v17  ;;  %vm2004_vm7 = vc.u32 %v4863_v25, %v4867_v5  ;;  %v2005_v61 = vadd.s32 1, %v4868_v15  ;;  %v2170_v51 = vsub.s32 32, %v2169_v18 }
 0x364   : > { %v1919_v29 = vsub.s32 4294967266, %v1914_v40  ;;  %v1915_v31 = vsub.s32 32, %v1914_v40  ;;  %v1899_v24 = vadd.s32 %v4773_v53, %v4770_v6  ;;  %v2117_v42 = vsub.s32 0, %v4874_v22 }
 0x365   : > { %v2006_v36 = vsel %vm2004_vm7, %v2005_v61, %v4868_v15  ;;  %v2163_v9 = vor.u32 8388608, %v2162_v41  ;;  %v2168_v32 = vshrl.u32 %v2167_v23, 5  ;;  %v2173_v14 = vshrl.u32 %v4099_v21, %v2170_v51 }
 0x366   : > { %v1920_v50 = vadd.s32 127, %v1919_v29  ;;  %v2007_v55 = vadd.s32 %v2006_v36, %v2002_v20  ;;  %v1917_v43 = vshrl.u32 %v1899_v24, %v1915_v31  ;;  %v2176_v63 = vshrl.u32 %v4100_v26, %v2170_v51 }
 0x367   : > { %v1916_v54 = vshll.u32 %v4830_v13, %v1914_v40  ;;  %v2179_v56 = vshrl.u32 %v4101_v30, %v2170_v51  ;;  %v2182_v28 = vshrl.u32 %v4102_v35, %v2170_v51  ;;  %v2961_v53 = vmin.u32 %v2117_v42, %v4874_v22 }
 0x368   : > { %v1921_v7 = vshll.u32 %v1920_v50, 23  ;;  %v2008_v62 = vadd.s32 536870912, %v2007_v55  ;;  %v2172_v45 = vshll.u32 %v4098_v19, %v2169_v18  ;;  %v2175_v33 = vshll.u32 %v4099_v21, %v2169_v18 }
 0x369   : > { %v2178_v59 = vshll.u32 %v4100_v26, %v2169_v18  ;;  %v2181_v2 = vshll.u32 %v4101_v30, %v2169_v18  ;;  %v2185_v13 = vshrl.u32 %v4103_v38, %v2170_v51  ;;  %v1918_v39 = vor.u32 %v1917_v43, %v1916_v54 }
 0x36a   : > { %v4889_v12 = vshrl.u32 %v2008_v62, 30  ;;  %v1922_v6 = vor.u32 4788187, %v1921_v7  ;;  %v2174_v16 = vor.u32 %v2173_v14, %v2172_v45  ;;  %v2177_v60 = vor.u32 %v2176_v63, %v2175_v33 }
 0x36b   : > { %v2184_v17 = vshll.u32 %v4102_v35, %v2169_v18  ;;  %v2180_v4 = vor.u32 %v2179_v56, %v2178_v59  ;;  %v2183_v15 = vor.u32 %v2182_v28, %v2181_v2  ;;  %v2203_v49 = vshll.u32 %v2163_v9, 8 }
 0x36c   : > { %v2010_v46 = vshll.u32 %v4889_v12, 30  ;;  %v1923_v23 = vand.u32 2147483647, %v1922_v6  ;;  %v2119_v29 = vclz %v2961_v53  ;;  %v2171_v50 = vshrl.u32 %v4098_v19, %v2170_v51 }
 0x36d   : > { %v2186_v40 = vor.u32 %v2185_v13, %v2184_v17  ;;  %vm2187_vm8 = vcmp.lt.s32.totalorder %v2168_v32, 1  ;;  %v1925_v20 = vcvt.s32.f32 %v1918_v39  ;;  %vm2189_vm9 = vcmp.lt.s32.totalorder %v2168_v32, 3 }
 0x36e   : > { %v2011_v0 = vsub.s32 %v2007_v55, %v2010_v46  ;;  %vm2190_vm10 = vcmp.lt.s32.totalorder %v2168_v32, 4  ;;  %v2195_v41 = vsel %vm2187_vm8, %v2174_v16, %v2177_v60  ;;  %v2199_v7 = vsel %vm2187_vm8, %v2177_v60, %v2180_v4 }
 0x36f   : > { %v2192_v36 = vsel %vm2190_vm10, %v2180_v4, 2102212464  ;;  %v2196_v24 = vsel %vm2190_vm10, %v2183_v15, 920167782  ;;  %v1926_v18 = vmul.f32 %v1925_v20, %v1923_v23  ;;  %vm2188_vm11 = vcmp.lt.s32.totalorder %v2168_v32, 2 }
 0x370   : > { %v2013_v61 = vsub.s32 0, %v2011_v0  ;;  %v2197_v55 = vsel %vm2189_vm9, %v2180_v4, %v2196_v24  ;;  %v2200_v42 = vsel %vm2190_vm10, %v2186_v40, 1326507024  ;;  %v2191_v43 = vsel %vm2187_vm8, %v2171_v50, %v2174_v16 }
 0x371   : > { %v2198_v9 = vsel %vm2188_vm11, %v2195_v41, %v2197_v55  ;;  %v2201_v14 = vsel %vm2189_vm9, %v2183_v15, %v2200_v42  ;;  %v2193_v63 = vsel %vm2189_vm9, %v2177_v60, %v2192_v36  ;;  %v2962_v28 = vadd.s32 4294967294, %v2119_v29 }
 0x372   : > { %v2957_v31 = vmin.u32 %v2013_v61, %v2011_v0  ;;  %v2202_v54 = vsel %vm2188_vm11, %v2199_v7, %v2201_v14  ;;  %v4902_v51 = vmul.u32.u64.low %v2203_v49, %v2198_v9  ;;  %v4903_v56 = vmul.u32.u64.high %v2203_v49, %v2198_v9, %v4902_v51 }
 0x373   : > { %v4906_v53 = vmul.u32.u64.low %v2203_v49, %v2202_v54  ;;  %v4907_v45 = vmul.u32.u64.high %v2203_v49, %v2202_v54, %v4906_v53  ;;  %v2194_v33 = vsel %vm2188_vm11, %v2191_v43, %v2193_v63  ;;  %v1927_v32 = vxor.u32 2147483648, %v1926_v18 }
 0x374   : > { %v2015_v62 = vclz %v2957_v31  ;;  %v2213_v59 = vadd.s32 1, %v4903_v56  ;;  %vm2963_vm13 = vcmp.lt.s32.totalorder %v2962_v28, 0  ;;  %v2003_v2 = vadd.s32 %v4867_v5, %v4863_v25 }
 0x375   : > { %vm1845_vm14 = vcmp.lt.s32.totalorder %v4709_v44, 0  ;;  %v2210_v16 = vmul.u32 %v2203_v49, %v2194_v33  ;;  %vm2212_vm15 = vc.u32 %v4907_v45, %v4902_v51  ;;  %v2122_v40 = vsel %vm2963_vm13, 0, %v2962_v28 }
 0x376   : > { %v2958_v6 = vadd.s32 4294967294, %v2015_v62  ;;  %v2214_v15 = vsel %vm2212_vm15, %v2213_v59, %v4903_v56  ;;  %v1928_v23 = vsel %vm1845_vm14, %v1927_v32, %v1926_v18  ;;  %vm4920_vm0 = vcmp.le.f32.partialorder %v1843_v34, 0.7853982 }
 0x377   : > { %v2215_v29 = vadd.s32 %v2214_v15, %v2210_v16  ;;  %v2127_v50 = vsub.s32 4294967266, %v2122_v40  ;;  %v1929_v31 = vsub.s32 4, %v4811_v10  ;;  %v2033_v55 = vsub.s32 4, %v4889_v12 }
 0x378   : > { %vm2959_vm12 = vcmp.lt.s32.totalorder %v2958_v6, 0  ;;  %v2123_v43 = vsub.s32 32, %v2122_v40  ;;  %v2107_v14 = vadd.s32 %v4802_v57, %v4808_v52  ;;  %vm1949_vm1 = vcmp.lt.s32.totalorder %v4713_v47, 0 }
 0x379   : > { %v2018_v46 = vsel %vm2959_vm12, 0, %v2958_v6  ;;  %v2216_v49 = vadd.s32 536870912, %v2215_v29  ;;  %v2128_v34 = vadd.s32 127, %v2127_v50  ;;  %v1930_v62 = vsel %vm1845_vm14, %v1929_v31, %v4811_v10  ;;  %v2499_v50 = vld [vmem:[#allocation10 + $0x100] sm:$0xff] }
 0x37a   : > { %v2019_v13 = vsub.s32 32, %v2018_v46  ;;  %v2023_v39 = vsub.s32 4294967266, %v2018_v46  ;;  %v2020_v60 = vshll.u32 %v2011_v0, %v2018_v46  ;;  %v1931_v0 = vsel %vm4920_vm0, %v4709_v44, %v1928_v23 }
 0x37b   : > { %v4927_v41 = vshrl.u32 %v2216_v49, 30  ;;  %3811 = vsinq.f32 %v1931_v0  ;;  %vm4940_vm2 = vcmp.le.f32.partialorder %v1947_v58, 0.7853982  ;;  %v2129_v56 = vshll.u32 %v2128_v34, 23 }
 0x37c   : > { %v2021_v17 = vshrl.u32 %v2003_v2, %v2019_v13  ;;  %v2024_v4 = vadd.s32 127, %v2023_v39  ;;  %3813 = vcosq.f32 %v1931_v0  ;;  %v2034_v6 = vsel %vm1949_vm1, %v2033_v55, %v4889_v12 }
 0x37d   : > { %v2218_v7 = vshll.u32 %v4927_v41, 30  ;;  %v1932_v10 = vsel %vm4920_vm0, 0, %v1930_v62  ;;  %v2125_v52 = vshrl.u32 %v2107_v14, %v2123_v43  ;;  %v2036_v58 = vsel %vm4940_vm2, 0, %v2034_v6  ;;  %v2518_v14 = vld [vmem:[#allocation10 + $0x198] sm:$0xff] }
 0x37e   : > { %v2022_v61 = vor.u32 %v2021_v17, %v2020_v60  ;;  %v2025_v25 = vshll.u32 %v2024_v4, 23  ;;  %v1936_v32 = vadd.s32 3, %v1932_v10  ;;  %v2124_v46 = vshll.u32 %v4874_v22, %v2122_v40 }
 0x37f   : > { %v2219_v42 = vsub.s32 %v2215_v29, %v2218_v7  ;;  %v2130_v59 = vor.u32 4788187, %v2129_v56  ;;  %v2040_v16 = vadd.s32 3, %v2036_v58  ;;  %v2211_v23 = vadd.s32 %v4902_v51, %v4907_v45 }
 0x380   : > { %v2026_v20 = vor.u32 4788187, %v2025_v25  ;;  %v2029_v24 = vcvt.s32.f32 %v2022_v61  ;;  %v2126_v39 = vor.u32 %v2125_v52, %v2124_v46  ;;  %v1937_v60 = vand.u32 3, %v1936_v32  ;;  %v2501_v52 = vld [vmem:[#allocation10 + $0x110] sm:$0xff] }
 0x381   : > { %v2221_v63 = vsub.s32 0, %v2219_v42  ;;  %v2131_v17 = vand.u32 2147483647, %v2130_v59  ;;  %v2041_v49 = vand.u32 3, %v2040_v16  ;;  %vm2039_vm9 = vweird.f32 %v4713_v47  ;;  %v2519_v59 = vld [vmem:[#allocation10 + $0x1a0] sm:$0xff]  ;;  %v2504_v16 = vld [vmem:[#allocation10 + $0x128] sm:$0xff] }
 0x382   : > { %v2027_v36 = vand.u32 2147483647, %v2026_v20  ;;  %v2133_v5 = vcvt.s32.f32 %v2126_v39  ;;  %vm1939_vm4 = vcmp.eq.s32.totalorder %v1937_v60, 0  ;;  %v2500_v20 = vld [vmem:[#allocation10 + $0x108] sm:$0xff]  ;;  %vm1942_vm5 = vcmp.eq.s32.totalorder %v1937_v60, 2  ;;  %v2503_v39 = vld [vmem:[#allocation10 + $0x120] sm:$0xff] }
 0x383   : > { %v2965_v53 = vmin.u32 %v2221_v63, %v2219_v42  ;;  %vm2046_vm6 = vcmp.eq.s32.totalorder %v2041_v49, 2  ;;  %v3568_v62 = vpack.c.bf16 %v2500_v20, %v2499_v50  ;;  %vm2043_vm7 = vcmp.eq.s32.totalorder %v2041_v49, 0 }
 0x384   : > { %v2030_v18 = vmul.f32 %v2029_v24, %v2027_v36  ;;  %v2134_v36 = vmul.f32 %v2133_v5, %v2131_v17  ;;  %vm1938_vm8 = vcmp.lt.s32.totalorder %v1937_v60, 2  ;;  %vm2042_vm10 = vcmp.lt.s32.totalorder %v2041_v49, 2  ;;  %v2505_v49 = vld [vmem:[#allocation10 + $0x130] sm:$0xff] }
 0x385   : > { %v2223_v33 = vclz %v2965_v53  ;;  %v3812_v12 = vpop.eup %3811  ;;  %vm1935_vm11 = vweird.f32 %v4709_v44  ;;  %v2241_v46 = vsub.s32 4, %v4927_v41  ;;  %vm2053_vm12 = vcmp.lt.s32.totalorder %v4711_v27, 0 }
 0x386   : > { %v2031_v9 = vxor.u32 2147483648, %v2030_v18  ;;  %v3814_v13 = vpop.eup %3813  ;;  %v1940_v15 = vxor.u32 2147483648, %v3812_v12  ;;  %v2135_v56 = vxor.u32 2147483648, %v2134_v36  ;;  %vm2157_vm13 = vcmp.lt.s32.totalorder %v4720_v11, 0 }
 0x387   : > { %v2966_v2 = vadd.s32 4294967294, %v2223_v33  ;;  %v1943_v25 = vxor.u32 2147483648, %v3814_v13  ;;  %v2502_v33 = vld [vmem:[#allocation10 + $0x118] sm:$0xff]  ;;  %vm4964_vm14 = vcmp.le.f32.partialorder %v2051_v48, 0.7853982 }
 0x388   : > { %v2032_v28 = vsel %vm1949_vm1, %v2031_v9, %v2030_v18  ;;  %v1941_v24 = vsel %vm1939_vm4, %v3814_v13, %v1940_v15  ;;  %v2517_v9 = vld [vmem:[#allocation10 + $0x190] sm:$0xff]  ;;  %v3572_v13 = vpack.c.bf16 %v2502_v33, %v2501_v52  ;;  %vm4970_vm15 = vcmp.le.f32.partialorder %v2155_v3, 0.7853982  ;;  %v2511_v33 = vld [vmem:[#allocation10 + $0x160] sm:$0xff] }
 0x389   : > { %v2035_v57 = vsel %vm4940_vm2, %v4713_v47, %v2032_v28  ;;  %vm2967_vm3 = vcmp.lt.s32.totalorder %v2966_v2, 0  ;;  %v1944_v51 = vsel %vm1942_vm5, %v1943_v25, %v3812_v12  ;;  %v2520_v47 = vld [vmem:[#allocation10 + $0x1a8] sm:$0xff]  ;;  %v2136_v12 = vsel %vm2053_vm12, %v2135_v56, %v2134_v36 }
 0x38a   : > { %3815 = vcosq.f32 %v2035_v57  ;;  %v2226_v4 = vsel %vm2967_vm3, 0, %v2966_v2  ;;  %v1945_v54 = vsel %vm1938_vm8, %v1941_v24, %v1944_v51  ;;  %v3574_v44 = vpack.c.bf16 %v2520_v47, %v2519_v59  ;;  %v2507_v24 = vld [vmem:[#allocation10 + $0x140] sm:$0xff] }
 0x38b   : > { %3817 = vsinq.f32 %v2035_v57  ;;  %v2227_v29 = vsub.s32 32, %v2226_v4  ;;  %v2231_v61 = vsub.s32 4294967266, %v2226_v4  ;;  %v2228_v22 = vshll.u32 %v2219_v42, %v2226_v4  ;;  %v2514_v4 = vld [vmem:[#allocation10 + $0x178] sm:$0xff] }
 0x38c   : > { %v3570_v57 = vpack.c.bf16 %v2518_v14, %v2517_v9  ;;  %v1946_v32 = vsel %vm1935_vm11, nan, %v1945_v54  ;;  %v2242_v15 = vsel %vm2157_vm13, %v2241_v46, %v4927_v41  ;;  %v3576_v25 = vpack.c.bf16 %v2504_v16, %v2503_v39  ;;  %v2509_v9 = vld [vmem:[#allocation10 + $0x150] sm:$0xff]  ;;  %v2528_v54 = vld [vmem:[#allocation10 + $0x1e8] sm:$0xff] }
 0x38d   : > { %v2229_v40 = vshrl.u32 %v2211_v23, %v2227_v29  ;;  %v2232_v0 = vadd.s32 127, %v2231_v61  ;;  %v2521_v23 = vld [vmem:[#allocation10 + $0x1b0] sm:$0xff]  ;;  %v2522_v29 = vld [vmem:[#allocation10 + $0x1b8] sm:$0xff]  ;;  %v2139_v61 = vsel %vm4964_vm14, %v4711_v27, %v2136_v12  ;;  %v2137_v3 = vsub.s32 4, %v4845_v37 }
 0x38e   : > { %v2244_v5 = vsel %vm4970_vm15, 0, %v2242_v15  ;;  %v3578_v41 = vpack.c.bf16 %v2522_v29, %v2521_v23  ;;  %vm2247_vm1 = vweird.f32 %v4720_v11  ;;  %v5002_v29 = vld [vmem:[#allocation10 + $0x280] sm:$0xff]  ;;  %vm2143_vm4 = vweird.f32 %v4711_v27 }
 0x38f   : > { %v2230_v34 = vor.u32 %v2229_v40, %v2228_v22  ;;  %v2233_v18 = vshll.u32 %v2232_v0, 23  ;;  %v2506_v22 = vld [vmem:[#allocation10 + $0x138] sm:$0xff]  ;;  %v2523_v40 = vld [vmem:[#allocation10 + $0x1c0] sm:$0xff]  ;;  %v2524_v0 = vld [vmem:[#allocation10 + $0x1c8] sm:$0xff]  ;;  %v2248_v50 = vadd.s32 3, %v2244_v5 }
 0x390   : > { %v3580_v20 = vpack.c.bf16 %v2506_v22, %v2505_v49  ;;  %v3582_v36 = vpack.c.bf16 %v2524_v0, %v2523_v40  ;;  %v5012_v49 = vld [vmem:[#allocation10 + $0x208] sm:$0xff]  ;;  %v5014_v22 = vld [vmem:[#allocation10 + $0x290] sm:$0xff]  ;;  %v5016_v40 = vld [vmem:[#allocation10 + $0x298] sm:$0xff] }
 0x391   : > { %v2234_v43 = vor.u32 4788187, %v2233_v18  ;;  %v2237_v6 = vcvt.s32.f32 %v2230_v34  ;;  %v2525_v34 = vld [vmem:[#allocation10 + $0x1d0] sm:$0xff]  ;;  %v2526_v18 = vld [vmem:[#allocation10 + $0x1d8] sm:$0xff] }
 0x393   : > { %v2235_v28 = vand.u32 2147483647, %v2234_v43 }
 0x394   : > { %v3816_v31 = vpop.eup %3815 }
 0x395   : > { %v3818_v7 = vpop.eup %3817  ;;  %v2047_v55 = vxor.u32 2147483648, %v3816_v31  ;;  %v2238_v58 = vmul.f32 %v2237_v6, %v2235_v28 }
 0x396   : > { %v2044_v45 = vxor.u32 2147483648, %v3818_v7 }
 0x397   : > { %v2048_v42 = vsel %vm2046_vm6, %v2047_v55, %v3818_v7  ;;  %v2239_v2 = vxor.u32 2147483648, %v2238_v58  ;;  %v2508_v7 = vld [vmem:[#allocation10 + $0x148] sm:$0xff]  ;;  %v1405_v55 = vsub.s32 4, %v4359_v8 }
 0x398   : > { %v2045_v63 = vsel %vm2043_vm7, %v3816_v31, %v2044_v45  ;;  %v2138_v31 = vsel %vm2053_vm12, %v2137_v3, %v4845_v37  ;;  %v1409_v45 = vsub.s32 5, %v4359_v8  ;;  %v3584_v43 = vpack.c.bf16 %v2508_v7, %v2507_v24  ;;  %v2510_v37 = vld [vmem:[#allocation10 + $0x158] sm:$0xff]  ;;  %v5028_v7 = vld [vmem:[#allocation10 + $0x2a8] sm:$0xff] }
 0x399   : > { %v2049_v10 = vsel %vm2042_vm10, %v2045_v63, %v2048_v42  ;;  %v2240_v17 = vsel %vm2157_vm13, %v2239_v2, %v2238_v58  ;;  %v2140_v51 = vsel %vm4964_vm14, 0, %v2138_v31  ;;  %v3586_v42 = vpack.c.bf16 %v2526_v18, %v2525_v34  ;;  %v2527_v63 = vld [vmem:[#allocation10 + $0x1e0] sm:$0xff]  ;;  %v2512_v58 = vld [vmem:[#allocation10 + $0x168] sm:$0xff]  ;;  %v2529_v2 = vld [vmem:[#allocation10 + $0x1f0] sm:$0xff] }
 0x39a   : > { %v2050_v53 = vsel %vm2039_vm9, nan, %v2049_v10  ;;  %v2243_v48 = vsel %vm4970_vm15, %v4720_v11, %v2240_v17  ;;  %v2144_v56 = vadd.s32 3, %v2140_v51  ;;  %v1406_v28 = vrot.slane %v4695_v1, %v1405_v55  ;;  %v5023_v31 = vld [vmem:[#allocation10 + $0x2a0] sm:$0xff]  ;;  %v5032_v18 = vld [vmem:[#allocation10 + $0x228] sm:$0xff] }
 0x39b   : > { %2634 = vmatprep.mubr.f32.mxu1 %v2050_v53  ;;  %3819 = vcosq.f32 %v2243_v48  ;;  %v1410_v53 = vrot.slane %v4695_v1, %v1409_v45  ;;  %v3588_v8 = vpack.c.bf16 %v2510_v37, %v2509_v9  ;;  %v3590_v59 = vpack.c.bf16 %v2528_v54, %v2527_v63  ;;  %v4994_v1 = vld [vmem:[#allocation10 + $0x170] sm:$0xff]  ;;  %v5030_v34 = vld [vmem:[#allocation10 + $0x220] sm:$0xff]  ;;  %v5046_v54 = vld [vmem:[#allocation10 + $0x238] sm:$0xff] }
 0x39c   : > { %2635 = vmatmul.mubr.f32.vlgmr.msra.gmra.mrb[4].mxu1 %v1946_v32  ;;  %3821 = vsinq.f32 %v2243_v48  ;;  %v3592_v17 = vpack.c.bf16 %v2512_v58, %v2511_v33  ;;  %v5044_v63 = vld [vmem:[#allocation10 + $0x230] sm:$0xff]  ;;  %v3606_v33 = vpack.c.bf16 %v5028_v7, %v5023_v31  ;;  %v3608_v58 = vpack.c.bf16 %v5032_v18, %v5030_v34 }
 0x39d   : > { %3569 = vmatpush3.bf16.msra.mxu1 %v3568_v62  ;;  %3823 = vsinq.f32 %v2139_v61  ;;  %v2249_v62 = vand.u32 3, %v2248_v50  ;;  %v5019_v50 = vld [vmem:[#allocation10 + $0x210] sm:$0xff] }
 0x39e   : > { %3571 = vmatprep.subr.bf16.mxu1 %v3570_v57  ;;  %3825 = vcosq.f32 %v2139_v61  ;;  %v5004_v61 = vld [vmem:[#allocation10 + $0x288] sm:$0xff] }
 0x39f   : > { %vm2254_vm0 = vcmp.eq.s32.totalorder %v2249_v62, 2  ;;  %vm2251_vm2 = vcmp.eq.s32.totalorder %v2249_v62, 0  ;;  %vm2250_vm3 = vcmp.lt.s32.totalorder %v2249_v62, 2  ;;  %v5038_v62 = vld [vmem:[#allocation10 + $0x2b0] sm:$0xff]  ;;  %v3598_v37 = vpack.c.bf16 %v5004_v61, %v5002_v29 }
 0x3a1   : > { %3573 = vmatpush3.bf16.msra.mxu1 %v3572_v13  ;;  %v2530_v13 = vld [vmem:[#allocation10 + $0x1f8] sm:$0xff] }
 0x3a2   : > { %3575 = vmatprep.subr.bf16.mxu1 %v3574_v44  ;;  %v4996_v44 = vand.u32 3, %v2144_v56  ;;  %v3594_v0 = vpack.c.bf16 %v2530_v13, %v2529_v2 }
 0x3a4   : > { %vm2147_vm5 = vcmp.eq.s32.totalorder %v4996_v44, 0  ;;  %vm2150_vm6 = vcmp.eq.s32.totalorder %v4996_v44, 2  ;;  %vm2146_vm7 = vcmp.lt.s32.totalorder %v4996_v44, 2 }
 0x3a5   : > { %3577 = vmatpush3.bf16.msra.mxu1 %v3576_v25  ;;  %v3820_v14 = vpop.eup %3819 }
 0x3a6   : > { %3579 = vmatprep.subr.bf16.mxu1 %v3578_v41  ;;  %v3822_v6 = vpop.eup %3821  ;;  %v2255_v10 = vxor.u32 2147483648, %v3820_v14  ;;  %v5010_v41 = vld [vmem:[#allocation10 + $0x200] sm:$0xff] }
 0x3a7   : > { %v3824_v57 = vpop.eup %3823  ;;  %v2252_v52 = vxor.u32 2147483648, %v3822_v6 }
 0x3a8   : > { %v3826_v32 = vpop.eup %3825  ;;  %v2256_v46 = vsel %vm2254_vm0, %v2255_v10, %v3822_v6  ;;  %v2148_v15 = vxor.u32 2147483648, %v3824_v57  ;;  %v3602_v6 = vpack.c.bf16 %v5016_v40, %v5014_v22 }
 0x3a9   : > { %3581 = vmatpush3.bf16.msra.mxu1 %v3580_v20  ;;  %v2253_v12 = vsel %vm2251_vm2, %v3820_v14, %v2252_v52  ;;  %v2151_v25 = vxor.u32 2147483648, %v3826_v32  ;;  %v5021_v20 = vld [vmem:[#allocation10 + $0x218] sm:$0xff]  ;;  %v5058_v52 = vld [vmem:[#allocation10 + $0x240] sm:$0xff] }
 0x3aa   : > { %3583 = vmatprep.subr.bf16.mxu1 %v3582_v36  ;;  %v2257_v60 = vsel %vm2250_vm3, %v2253_v12, %v2256_v46  ;;  %v3596_v36 = vpack.c.bf16 %v2514_v4, %v4994_v1  ;;  %v5042_v14 = vld [vmem:[#allocation10 + $0x2b8] sm:$0xff]  ;;  %v3604_v10 = vpack.c.bf16 %v5021_v20, %v5019_v50  ;;  %v5067_v46 = vld [vmem:[#allocation10 + $0x2d0] sm:$0xff]  ;;  %v5085_v4 = vld [vmem:[#allocation10 + $0x2e0] sm:$0xff] }
 0x3ab   : > { %v2258_v48 = vsel %vm2247_vm1, nan, %v2257_v60  ;;  %v5075_v1 = vld [vmem:[#allocation10 + $0x250] sm:$0xff]  ;;  %v3610_v44 = vpack.c.bf16 %v5042_v14, %v5038_v62 }
 0x3ac   : > { %2704 = vmatprep.mubr.f32.mxu1 %v2258_v48 }
 0x3ad   : > { %3585 = vmatpush3.bf16.msra.mxu1 %v3584_v43  ;;  %v2149_v43 = vsel %vm2147_vm5, %v3826_v32, %v2148_v15  ;;  %v5065_v32 = vld [vmem:[#allocation10 + $0x248] sm:$0xff] }
 0x3ae   : > { %3587 = vmatprep.subr.bf16.mxu1 %v3586_v42  ;;  %v2152_v42 = vsel %vm2150_vm6, %v2151_v25, %v3824_v57  ;;  %v5056_v57 = vld [vmem:[#allocation10 + $0x2c8] sm:$0xff]  ;;  %v3616_v61 = vpack.c.bf16 %v5065_v32, %v5058_v52 }
 0x3af   : > { %v5087_v15 = vld [vmem:[#allocation10 + $0x2e8] sm:$0xff] }
 0x3b0   : > { %v1838_v47 = vpop.f32.mrb[4].mxu0 }
 0x3b1   : > { %v4998_v39 = vadd.f32 %v1838_v47, %v1406_v28  ;;  %v1840_v16 = vpop.f32.mrb[5].mxu0  ;;  %3589 = vmatpush3.bf16.msra.mxu1 %v3588_v8  ;;  %v3600_v28 = vpack.c.bf16 %v5012_v49, %v5010_v41  ;;  %v2153_v47 = vsel %vm2146_vm7, %v2149_v43, %v2152_v42 }
 0x3b2   : > { %v5000_v23 = vadd.f32 %v1840_v16, %v1410_v53  ;;  %3591 = vmatprep.subr.bf16.mxu1 %v3590_v59  ;;  %v5054_v53 = vld [vmem:[#allocation10 + $0x2c0] sm:$0xff]  ;;  %v5069_v59 = vld [vmem:[#allocation10 + $0x2d8] sm:$0xff]  ;;  %v3612_v16 = vpack.c.bf16 %v5046_v54, %v5044_v63  ;;  %v2154_v25 = vsel %vm2143_vm4, nan, %v2153_v47 }
 0x3b3   : > { %v2259_v3 = vand.u32 2147483647, %v4998_v39  ;;  %v2262_v5 = vand.u32 2139095040, %v4998_v39  ;;  %v3614_v60 = vpack.c.bf16 %v5056_v57, %v5054_v53  ;;  %v3618_v48 = vpack.c.bf16 %v5069_v59, %v5067_v46 }
 0x3b4   : > { %v2366_v11 = vand.u32 2139095040, %v5000_v23  ;;  %v5272_v51 = vand.u32 2147483647, %v5000_v23  ;;  %vm2261_vm6 = vcmp.lt.s32.totalorder %v4998_v39, 0 }
 0x3b5   : > { %v2263_v24 = vshrl.u32 %v2262_v5, 23  ;;  %v2266_v55 = vand.u32 8388607, %v2259_v3  ;;  %3593 = vmatpush3.bf16.msra.mxu1 %v3592_v17  ;;  %v5083_v17 = vld [vmem:[#allocation10 + $0x258] sm:$0xff]  ;;  %vm2260_vm7 = vcmp.le.f32.partialorder %v2259_v3, 0.7853982 }
 0x3b6   : > { %v2367_v45 = vshrl.u32 %v2366_v11, 23  ;;  %3595 = vmatprep.subr.bf16.mxu1 %v3594_v0  ;;  %v5073_v2 = vand.u32 8388607, %v5272_v51  ;;  %v3620_v0 = vpack.c.bf16 %v5083_v17, %v5075_v1  ;;  %v3622_v11 = vpack.c.bf16 %v5087_v15, %v5085_v4 }
 0x3b7   : > { %v2968_v9 = vadd.s32 4294967169, %v2263_v24  ;;  %v2267_v12 = vor.u32 8388608, %v2266_v55 }
 0x3b8   : > { %v2972_v56 = vadd.s32 4294967169, %v2367_v45  ;;  %v2371_v40 = vor.u32 8388608, %v5073_v2 }
 0x3b9   : > { %v2269_v8 = vadd.s32 1, %v2968_v9  ;;  %3597 = vmatpush3.bf16.msra.mxu1 %v3596_v36  ;;  %v5095_v22 = vshll.u32 %v2267_v12, 8 }
 0x3ba   : > { %v2373_v13 = vadd.s32 1, %v2972_v56  ;;  %3599 = vmatprep.subr.bf16.mxu1 %v3598_v37 }
 0x3bb   : > { %vm2270_vm8 = vcmp.gt.s32.totalorder %v2269_v8, 0 }
 0x3bc   : > { %v2271_v29 = vsel %vm2270_vm8, %v2269_v8, 0  ;;  %vm2374_vm9 = vcmp.gt.s32.totalorder %v2373_v13, 0  ;;  %2705 = vmatmul.mubr.f32.vlgmr.msra.gmra.mrb[6].mxu1 %v2154_v25  ;;  %vm2365_vm8 = vcmp.lt.s32.totalorder %v5000_v23, 0 }
 0x3bd   : > { %v2272_v5 = vshrl.u32 %v2271_v29, 5  ;;  %v2273_v41 = vand.u32 31, %v2271_v29  ;;  %v2375_v49 = vsel %vm2374_vm9, %v2373_v13, 0  ;;  %3601 = vmatpush3.bf16.msra.mxu1 %v3600_v28 }
 0x3be   : > { %v5103_v31 = vshrl.u32 %v2375_v49, 5  ;;  %v2377_v27 = vand.u32 31, %v2375_v49  ;;  %3603 = vmatprep.subr.bf16.mxu1 %v3602_v6 }
 0x3bf   : > { %v2274_v50 = vsub.s32 32, %v2273_v41  ;;  %v2276_v20 = vshll.u32 %v4098_v19, %v2273_v41  ;;  %v2279_v36 = vshll.u32 %v4099_v21, %v2273_v41  ;;  %v2282_v24 = vshll.u32 %v4100_v26, %v2273_v41 }
 0x3c0   : > { %v2285_v7 = vshll.u32 %v4101_v30, %v2273_v41  ;;  %v2288_v55 = vshll.u32 %v4102_v35, %v2273_v41  ;;  %vm2291_vm10 = vcmp.lt.s32.totalorder %v2272_v5, 1  ;;  %vm2292_vm11 = vcmp.lt.s32.totalorder %v2272_v5, 2 }
 0x3c1   : > { %v2277_v45 = vshrl.u32 %v4099_v21, %v2274_v50  ;;  %v2280_v43 = vshrl.u32 %v4100_v26, %v2274_v50  ;;  %v2283_v42 = vshrl.u32 %v4101_v30, %v2274_v50  ;;  %v2275_v9 = vshrl.u32 %v4098_v19, %v2274_v50  ;;  %3605 = vmatpush3.bf16.msra.mxu1 %v3604_v10 }
 0x3c2   : > { %v2286_v37 = vshrl.u32 %v4102_v35, %v2274_v50  ;;  %v2289_v56 = vshrl.u32 %v4103_v38, %v2274_v50  ;;  %v2378_v12 = vsub.s32 32, %v2377_v27  ;;  %vm2293_vm12 = vcmp.lt.s32.totalorder %v2272_v5, 3  ;;  %3607 = vmatprep.subr.bf16.mxu1 %v3606_v33 }
 0x3c3   : > { %v2278_v28 = vor.u32 %v2277_v45, %v2276_v20  ;;  %v2281_v8 = vor.u32 %v2280_v43, %v2279_v36  ;;  %v2284_v47 = vor.u32 %v2283_v42, %v2282_v24  ;;  %vm2294_vm13 = vcmp.lt.s32.totalorder %v2272_v5, 4 }
 0x3c4   : > { %v2287_v6 = vor.u32 %v2286_v37, %v2285_v7  ;;  %v2290_v2 = vor.u32 %v2289_v56, %v2288_v55  ;;  %v2380_v20 = vshll.u32 %v4098_v19, %v2377_v27  ;;  %v2381_v10 = vshrl.u32 %v4099_v21, %v2378_v12 }
 0x3c5   : > { %v2295_v13 = vsel %vm2291_vm10, %v2275_v9, %v2278_v28  ;;  %v2296_v29 = vsel %vm2294_vm13, %v2284_v47, 2102212464  ;;  %v2299_v25 = vsel %vm2291_vm10, %v2278_v28, %v2281_v8  ;;  %v2303_v41 = vsel %vm2291_vm10, %v2281_v8, %v2284_v47  ;;  %3609 = vmatpush3.bf16.msra.mxu1 %v3608_v58 }
 0x3c6   : > { %v2297_v49 = vsel %vm2293_vm12, %v2281_v8, %v2296_v29  ;;  %v2300_v50 = vsel %vm2294_vm13, %v2287_v6, 920167782  ;;  %v2304_v51 = vsel %vm2294_vm13, %v2290_v2, 1326507024  ;;  %v2383_v7 = vshll.u32 %v4099_v21, %v2377_v27  ;;  %3611 = vmatprep.subr.bf16.mxu1 %v3610_v44 }
 0x3c7   : > { %v2301_v36 = vsel %vm2293_vm12, %v2284_v47, %v2300_v50  ;;  %v2305_v24 = vsel %vm2293_vm12, %v2287_v6, %v2304_v51  ;;  %v2298_v33 = vsel %vm2292_vm11, %v2295_v13, %v2297_v49  ;;  %v2384_v43 = vshrl.u32 %v4100_v26, %v2378_v12  ;;  %v2562_v6 = vld [vmem:[#allocation10 + $0x2f8] sm:$0xff] }
 0x3c8   : > { %v2302_v55 = vsel %vm2292_vm11, %v2299_v25, %v2301_v36  ;;  %v2306_v45 = vsel %vm2292_vm11, %v2303_v41, %v2305_v24  ;;  %v2382_v18 = vor.u32 %v2381_v10, %v2380_v20  ;;  %v2386_v5 = vshll.u32 %v4100_v26, %v2377_v27  ;;  %v2545_v20 = vld [vmem:[#allocation10 + $0x270] sm:$0xff]  ;;  %v2546_v36 = vld [vmem:[#allocation10 + $0x278] sm:$0xff] }
 0x3c9   : > { %v5132_v51 = vmul.u32.u64.low %v5095_v22, %v2306_v45  ;;  %v5133_v42 = vmul.u32.u64.high %v5095_v22, %v2306_v45, %v5132_v51  ;;  %v5136_v21 = vmul.u32.u64.low %v5095_v22, %v2302_v55  ;;  %v5137_v34 = vmul.u32.u64.high %v5095_v22, %v2302_v55, %v5136_v21  ;;  %3613 = vmatpush3.bf16.msra.mxu1 %v3612_v16 }
 0x3ca   : > { %v2385_v58 = vor.u32 %v2384_v43, %v2383_v7  ;;  %v2387_v9 = vshrl.u32 %v4101_v30, %v2378_v12  ;;  %v2389_v37 = vshll.u32 %v4101_v30, %v2377_v27  ;;  %v2390_v62 = vshrl.u32 %v4102_v35, %v2378_v12  ;;  %3615 = vmatprep.subr.bf16.mxu1 %v3614_v60 }
 0x3cb   : > { %v2393_v14 = vshrl.u32 %v4103_v38, %v2378_v12  ;;  %v2411_v44 = vshll.u32 %v2371_v40, 8  ;;  %v2314_v56 = vmul.u32 %v5095_v22, %v2298_v33  ;;  %v2379_v28 = vshrl.u32 %v4098_v19, %v2378_v12  ;;  %v2543_v40 = vld [vmem:[#allocation10 + $0x260] sm:$0xff]  ;;  %v2561_v12 = vld [vmem:[#allocation10 + $0x2f0] sm:$0xff] }
 0x3cc   : > { %v2388_v8 = vor.u32 %v2387_v9, %v2386_v5  ;;  %v2392_v26 = vshll.u32 %v4102_v35, %v2377_v27  ;;  %vm2316_vm14 = vc.u32 %v5133_v42, %v5136_v21  ;;  %v2317_v30 = vadd.s32 1, %v5137_v34  ;;  %v2544_v27 = vld [vmem:[#allocation10 + $0x268] sm:$0xff] }
 0x3cd   : > { %v2391_v38 = vor.u32 %v2390_v62, %v2389_v37  ;;  %vm2395_vm15 = vcmp.lt.s32.totalorder %v5103_v31, 1  ;;  %vm2397_vm0 = vcmp.lt.s32.totalorder %v5103_v31, 3  ;;  %vm2398_vm1 = vcmp.lt.s32.totalorder %v5103_v31, 4  ;;  %3617 = vmatpush3.bf16.msra.mxu1 %v3616_v61 }
 0x3ce   : > { %v2394_v63 = vor.u32 %v2393_v14, %v2392_v26  ;;  %v2403_v19 = vsel %vm2395_vm15, %v2382_v18, %v2385_v58  ;;  %v2318_v35 = vsel %vm2316_vm14, %v2317_v30, %v5137_v34  ;;  %v2400_v54 = vsel %vm2398_vm1, %v2388_v8, 2102212464  ;;  %3619 = vmatprep.subr.bf16.mxu1 %v3618_v48 }
 0x3cf   : > { %v2404_v53 = vsel %vm2398_vm1, %v2391_v38, 920167782  ;;  %v2407_v57 = vsel %vm2395_vm15, %v2385_v58, %v2388_v8  ;;  %v2319_v16 = vadd.s32 %v2318_v35, %v2314_v56  ;;  %vm2396_vm2 = vcmp.lt.s32.totalorder %v5103_v31, 2 }
 0x3d0   : > { %v2405_v60 = vsel %vm2397_vm0, %v2388_v8, %v2404_v53  ;;  %v2408_v22 = vsel %vm2398_vm1, %v2394_v63, 1326507024  ;;  %v2399_v47 = vsel %vm2395_vm15, %v2379_v28, %v2382_v18  ;;  %v2401_v52 = vsel %vm2397_vm0, %v2385_v58, %v2400_v54 }
 0x3d1   : > { %v2406_v32 = vsel %vm2396_vm2, %v2403_v19, %v2405_v60  ;;  %v2409_v61 = vsel %vm2397_vm0, %v2391_v38, %v2408_v22  ;;  %v2320_v2 = vadd.s32 536870912, %v2319_v16  ;;  %3621 = vmatpush3.bf16.msra.mxu1 %v3620_v0  ;;  %v3624_v25 = vpack.c.bf16 %v2544_v27, %v2543_v40 }
 0x3d2   : > { %v2410_v46 = vsel %vm2396_vm2, %v2407_v57, %v2409_v61  ;;  %v5184_v59 = vmul.u32.u64.low %v2411_v44, %v2406_v32  ;;  %v5185_v48 = vmul.u32.u64.high %v2411_v44, %v2406_v32, %v5184_v59  ;;  %v2402_v49 = vsel %vm2396_vm2, %v2399_v47, %v2401_v52  ;;  %3623 = vmatprep.subr.bf16.mxu1 %v3622_v11 }
 0x3d3   : > { %v5187_v13 = vmul.u32.u64.low %v2411_v44, %v2410_v46  ;;  %v5188_v29 = vmul.u32.u64.high %v2411_v44, %v2410_v46, %v5187_v13  ;;  %v2321_v41 = vshrl.u32 %v2320_v2, 30  ;;  %v3626_v50 = vpack.c.bf16 %v2562_v6, %v2561_v12 }
 0x3d4   : > { %v2421_v10 = vadd.s32 1, %v5185_v48  ;;  %v2418_v7 = vmul.u32 %v2411_v44, %v2402_v49  ;;  %v3628_v1 = vpack.c.bf16 %v2546_v36, %v2545_v20  ;;  %v2315_v58 = vadd.s32 %v5136_v21, %v5133_v42 }
 0x3d5   : > { %v2322_v24 = vshll.u32 %v2321_v41, 30  ;;  %vm2420_vm3 = vc.u32 %v5188_v29, %v5184_v59  ;;  %3625 = vmatpush3.bf16.msra.mxu1 %v3624_v25  ;;  %v2419_v35 = vadd.s32 %v5184_v59, %v5188_v29  ;;  %v2345_v21 = vsub.s32 4, %v2321_v41 }
 0x3d6   : > { %v2422_v0 = vsel %vm2420_vm3, %v2421_v10, %v5185_v48  ;;  %3627 = vmatprep.subr.bf16.mxu1 %v3626_v50  ;;  %v5308_v25 = vand.u32 2147483647, %v5000_v23  ;;  %vm2351_vm13 = vweird.f32 %v4998_v39  ;;  %vm2455_vm1 = vweird.f32 %v5000_v23 }
 0x3d7   : > { %v2323_v17 = vsub.s32 %v2319_v16, %v2322_v24  ;;  %v2423_v31 = vadd.s32 %v2422_v0, %v2418_v7  ;;  %v2346_v52 = vsel %vm2261_vm6, %v2345_v21, %v2321_v41 }
 0x3d8   : > { %v2348_v2 = vsel %vm2260_vm7, 0, %v2346_v52  ;;  %vm2364_vm9 = vcmp.le.f32.partialorder %v5308_v25, 0.7853982 }
 0x3d9   : > { %v2325_v33 = vsub.s32 0, %v2323_v17  ;;  %v2424_v55 = vadd.s32 536870912, %v2423_v31  ;;  %3629 = vmatpush3.bf16.msra.mxu1 %v3628_v1  ;;  %v2352_v48 = vadd.s32 3, %v2348_v2 }
 0x3db   : > { %v2969_v4 = vmin.u32 %v2325_v33, %v2323_v17  ;;  %v2425_v15 = vshrl.u32 %v2424_v55, 30  ;;  %v2353_v49 = vand.u32 3, %v2352_v48 }
 0x3dd   : > { %v2327_v11 = vclz %v2969_v4  ;;  %v2426_v45 = vshll.u32 %v2425_v15, 30  ;;  %v2449_v59 = vsub.s32 4, %v2425_v15  ;;  %vm2358_vm10 = vcmp.eq.s32.totalorder %v2353_v49, 2 }
 0x3de   : > { %vm2355_vm11 = vcmp.eq.s32.totalorder %v2353_v49, 0  ;;  %vm2354_vm12 = vcmp.lt.s32.totalorder %v2353_v49, 2 }
 0x3df   : > { %v2970_v43 = vadd.s32 4294967294, %v2327_v11  ;;  %v2427_v51 = vsub.s32 %v2423_v31, %v2426_v45  ;;  %v2450_v3 = vsel %vm2365_vm8, %v2449_v59, %v2425_v15 }
 0x3e0   : > { %v2452_v20 = vsel %vm2364_vm9, 0, %v2450_v3 }
 0x3e1   : > { %vm2971_vm4 = vcmp.lt.s32.totalorder %v2970_v43, 0  ;;  %v2429_v18 = vsub.s32 0, %v2427_v51  ;;  %v2456_v7 = vadd.s32 3, %v2452_v20 }
 0x3e2   : > { %v2330_v34 = vsel %vm2971_vm4, 0, %v2970_v43 }
 0x3e3   : > { %v2331_v5 = vsub.s32 32, %v2330_v34  ;;  %v2335_v9 = vsub.s32 4294967266, %v2330_v34  ;;  %v2973_v37 = vmin.u32 %v2429_v18, %v2427_v51  ;;  %v2332_v62 = vshll.u32 %v2323_v17, %v2330_v34 }
 0x3e4   : > { %v2457_v33 = vand.u32 3, %v2456_v7 }
 0x3e5   : > { %v2333_v14 = vshrl.u32 %v2315_v58, %v2331_v5  ;;  %v2336_v44 = vadd.s32 127, %v2335_v9  ;;  %v2431_v56 = vclz %v2973_v37  ;;  %v2976_v5 = vld [vmem:[#allocation11] ss:$0 sm:$0xff] }
 0x3e6   : > { %vm2462_vm14 = vcmp.eq.s32.totalorder %v2457_v33, 2  ;;  %vm2459_vm15 = vcmp.eq.s32.totalorder %v2457_v33, 0  ;;  %vm2458_vm0 = vcmp.lt.s32.totalorder %v2457_v33, 2 }
 0x3e7   : > { %v2334_v28 = vor.u32 %v2333_v14, %v2332_v62  ;;  %v2337_v8 = vshll.u32 %v2336_v44, 23  ;;  %v2974_v26 = vadd.s32 4294967294, %v2431_v56 }
 0x3e9   : > { %v2338_v30 = vor.u32 4788187, %v2337_v8  ;;  %vm2975_vm5 = vcmp.lt.s32.totalorder %v2974_v26, 0  ;;  %v2341_v63 = vcvt.s32.f32 %v2334_v28 }
 0x3ea   : > { %v2434_v19 = vsel %vm2975_vm5, 0, %v2974_v26 }
 0x3eb   : > { %v2339_v38 = vand.u32 2147483647, %v2338_v30  ;;  %v2435_v54 = vsub.s32 32, %v2434_v19  ;;  %v2439_v53 = vsub.s32 4294967266, %v2434_v19  ;;  %v2436_v57 = vshll.u32 %v2427_v51, %v2434_v19 }
 0x3ed   : > { %v2342_v42 = vmul.f32 %v2341_v63, %v2339_v38  ;;  %v2437_v16 = vshrl.u32 %v2419_v35, %v2435_v54  ;;  %v2440_v60 = vadd.s32 127, %v2439_v53 }
 0x3ef   : > { %v2343_v22 = vxor.u32 2147483648, %v2342_v42  ;;  %v2438_v40 = vor.u32 %v2437_v16, %v2436_v57  ;;  %v2441_v27 = vshll.u32 %v2440_v60, 23 }
 0x3f1   : > { %v2344_v47 = vsel %vm2261_vm6, %v2343_v22, %v2342_v42  ;;  %v2442_v61 = vor.u32 4788187, %v2441_v27  ;;  %v2445_v6 = vcvt.s32.f32 %v2438_v40 }
 0x3f2   : > { %v2347_v32 = vsel %vm2260_vm7, %v4998_v39, %v2344_v47 }
 0x3f3   : > { %3827 = vcosq.f32 %v2347_v32  ;;  %v2443_v12 = vand.u32 2147483647, %v2442_v61 }
 0x3f4   : > { %3829 = vsinq.f32 %v2347_v32 }
 0x3f5   : > { %v2446_v46 = vmul.f32 %v2445_v6, %v2443_v12 }
 0x3f7   : > { %v2447_v13 = vxor.u32 2147483648, %v2446_v46 }
 0x3f9   : > { %v2448_v29 = vsel %vm2365_vm8, %v2447_v13, %v2446_v46 }
 0x3fa   : > { %v2451_v41 = vsel %vm2364_vm9, %v5000_v23, %v2448_v29 }
 0x3fb   : > { %3831 = vcosq.f32 %v2451_v41 }
 0x3fc   : > { %3833 = vsinq.f32 %v2451_v41 }
 0x3fd   : > { %v3828_v50 = vpop.eup %3827 }
 0x3fe   : > { %v3830_v36 = vpop.eup %3829  ;;  %v2359_v24 = vxor.u32 2147483648, %v3828_v50 }
 0x3ff   : > { %v2356_v10 = vxor.u32 2147483648, %v3830_v36 }
 0x400   : > { %v2360_v1 = vsel %vm2358_vm10, %v2359_v24, %v3830_v36 }
 0x401   : > { %v2357_v17 = vsel %vm2355_vm11, %v3828_v50, %v2356_v10 }
 0x402   : > { %v2361_v0 = vsel %vm2354_vm12, %v2357_v17, %v2360_v1 }
 0x403   : > { %v2362_v31 = vsel %vm2351_vm13, nan, %v2361_v0 }
 0x405   : > { %v3832_v55 = vpop.eup %3831 }
 0x406   : > { %v3834_v4 = vpop.eup %3833  ;;  %v2463_v15 = vxor.u32 2147483648, %v3832_v55 }
 0x407   : > { %v2460_v11 = vxor.u32 2147483648, %v3834_v4 }
 0x408   : > { %v2464_v45 = vsel %vm2462_vm14, %v2463_v15, %v3834_v4 }
 0x409   : > { %v2461_v43 = vsel %vm2459_vm15, %v3832_v55, %v2460_v11 }
 0x40a   : > { %v2465_v51 = vsel %vm2458_vm0, %v2461_v43, %v2464_v45 }
 0x40b   : > { %v2466_v34 = vsel %vm2455_vm1, nan, %v2465_v51 }
 0x40c   : > { %2774 = vmatprep.mubr.f32.mxu1 %v2466_v34 }
 0x40d   : > { %2775 = vmatmul.mubr.f32.vlgmr.msra.gmra.mrb[8].mxu1 %v2362_v31 }
 0x46f   : > { %v3013_v39 = vpop.f32.mrb[4].mxu1 }
 0x470   : > { %v3014_v18 = vpop.f32.mrb[5].mxu1 }
 0x471   : > { %v3015_v58 = vadd.f32 %v3014_v18, %v3013_v39 }
 0x473   : > { %v2637_v62 = vadd.f32 %v3015_v58, %v2976_v5 }
 0x48f   : > { %v3048_v9 = vpop.f32.mrb[6].mxu1 }
 0x490   : > { %v3049_v37 = vpop.f32.mrb[7].mxu1 }
 0x491   : > { %v3050_v14 = vadd.f32 %v3049_v37, %v3048_v9 }
 0x493   : > { %v2707_v44 = vadd.f32 %v3050_v14, %v2637_v62 }
 0x4e0   : > { %v3083_v56 = vpop.f32.mrb[8].mxu1 }
 0x4e1   : > { %v3084_v28 = vpop.f32.mrb[9].mxu1 }
 0x4e2   : > { %v3085_v8 = vadd.f32 %v3084_v28, %v3083_v56 }
 0x4e4   : > { %v2777_v26 = vadd.f32 %v3085_v8, %v2707_v44 }
 0x4e6   : > { %v2780_v23 = vmul.f32 0.5, %v2777_v26 }
 0x4e8   : > { %3835 = vtanh.f32 %v2780_v23 }
 0x4f2   : > { %v3836_v30 = vpop.eup %3835 }
 0x4f3   : > { %v2782_v38 = vadd.f32 1.0, %v3836_v30 }
 0x4f5   : > { %v2783_v63 = vmul.f32 0.5, %v2782_v38 }
 0x4f7   : > { %2784 = vst [vmem:[%s351_s16] sm:$0xff] %v2783_v63 }
 0x4f8   : > { %4018 = shalt.err (!%p4015_p6)
}
 0x4f9   : > { %s4019_s13 = scalar_lea.hbm %s5219_s29, 128  ;;  %s4023_s4 = scalar_lea.hbm %s5268_s7, 256 }
 0x4fa   : > { %p4020_p5 = scmp.ne.s32.totalorder %s5219_s29, %s4019_s13  ;;  %p4024_p10 = scmp.lt.u32.totalorder %s5219_s29, %s5268_s7 }
 0x4fb   : > { %p4025_p2 = scmp.lt.u32.totalorder %s4023_s4, %s4019_s13  ;;  %p4027_p4 = scmp.lt.u32.totalorder %s4019_s13, %s5219_s29 }
 0x4fc   : > { %p4021_p9 = pnand %p4020_p5, %p5309_p7 }
 0x4fd   : > { %p4026_p3 = por %p4025_p2, %p4024_p10 }
 0x4fe   : > { %p4022_p12 = pneg %p4021_p9 }
 0x4ff   : > { %p4028_p8 = por %p4027_p4, %p4026_p3 }
 0x501   : > { %p4029_p11 = pnand %p4028_p8, %p4022_p12 }
 0x503   : > { %4032 = shalt.err (!%p4029_p11)
}
 0x504   : > { %3706 = dma.vmem_to_hbm [thread:$0]  (%p5309_p7), %s5221_s19, 128, %s5219_s29, %s2786_s22  }
 0x505 PF: > { %p3743_p13 = scmp.ge.s32.totalorder %s4083_s27, 2  ;;  %s2811_s8 = sand.u32 1, %s4071_s24  }
 0x506   : > { %p5310_p1 = scmp.ne.s32.totalorder %s5277_s12, 0  ;;  %s2812_s14 = scalar_lea.sflag [#allocation4], %s2811_s8 }
 0x508   : > { %p3728_p0 = pnand %p3743_p13, %p5310_p1 }
 0x50a   : > { %4066 = dma.done.wait (!%p3728_p0), %s2812_s14, 128  }
 0x50b   : > { %4068 = vsyncadd (!%p3728_p0), %s2812_s14, 4294967168  ;;  %s5311_s16 = sld [smem:[#allocation19_spill]]  ;;  %p21_p6 = scmp.ge.s32.totalorder %s4170_s30, 4  }
 0x50c   : > { %s5312_s24 = smov %s4075_s25  ;;  %s5313_s25 = smov %s4079_s26 }
 0x50d   : > { %s5315_s27 = smov %s4170_s30  ;;  %23 = sbr.rel (!%p21_p6) target bundleno = 10 (0xa), region = 108 }
 0x511   : > { %s5314_s26 = smov %s5311_s16 }
 0x514   :  { %2817 = vsyncpa [#allocation3], 1 }
 0x515   :  { %2819 = vsyncpa [#allocation3 + $0x1], 1 }
 0x516   :  { %2820 = vsyncpa [#allocation6], 1 }
 0x517   :  { %2821 = vsyncpa [#allocation9], 1 }
 0x518   :  { %2822 = vsyncpa [#allocation12], 1 }
 0x519   :  { %2823 = vsyncpa [#allocation4], 1 }
 0x51a   :  { %2825 = vsyncpa [#allocation4 + $0x1], 1 }

</bundles_post_ra>
